<compile_context>
chip_gen: v7x
topology: tpu7x:2x2x1
jax: 0.10.0
libtpu: 0.0.40
codegen_flags: <defaults>
</compile_context>

<pallas_src>
import math
import numpy as np
import jax
import jax.numpy as jnp
from jax.experimental import pallas as pl
from jax.experimental.pallas import tpu as pltpu

# ----------------------------- config -----------------------------
EMBED = 32          # embed_size (d_model)
VOCAB = 64          # vocab_size
HEADS = 4           # num_heads
HEAD_DIM = EMBED // HEADS
FF = 2048           # nn.TransformerDecoderLayer default dim_feedforward
LAYERS = 2          # num_layers
LN_EPS = 1e-5       # nn.LayerNorm default eps
NEG_INF = -1e30


# ----------------------------- kernel -----------------------------
def _layer_norm(x, gb):
    # x: (rows, E), gb: (2, E) = [gamma; beta]
    mean = jnp.mean(x, axis=-1, keepdims=True)
    c = x - mean
    var = jnp.mean(c * c, axis=-1, keepdims=True)
    return c * jax.lax.rsqrt(var + LN_EPS) * gb[0:1, :] + gb[1:2, :]


def _make_fused_kernel(B, T):
    BT = B * T
    E, V, Dh = EMBED, VOCAB, HEAD_DIM
    scale = 1.0 / math.sqrt(Dh)

    def kernel(tok_ref, mem_ref, embed_ref, pos_ref,
               possel_ref, bsel_ref, negmask_ref,
               sa_w_ref, sa_b_ref, sa_ow_ref, sa_ob_ref,
               ca_vw_ref, ca_vb_ref, ca_ow_ref, ca_ob_ref,
               ff1_w_ref, ff1_b_ref, ff2_w_ref, ff2_b_ref,
               n1_ref, n2_ref, n3_ref,
               fc_w_ref, fc_b_ref,
               out_ref):
        # ---- embedding: one-hot built in-kernel (iota compare) -> MXU lookup + positional add ----
        tok = tok_ref[...]                                                # (BT, 1) int32
        vocab_iota = jax.lax.broadcasted_iota(jnp.int32, (BT, V), 1)
        onehot = (vocab_iota == tok).astype(jnp.float32)                  # (BT, V), exact lookup
        x = jnp.dot(onehot, embed_ref[...], preferred_element_type=jnp.float32)
        # positional encoding, tiled over batch with a tiny selector matmul (no reshapes)
        x = x + jnp.dot(possel_ref[...], pos_ref[...],
                        preferred_element_type=jnp.float32)

        mem = mem_ref[...]                                                # (B, E)
        negmask = negmask_ref[...]                                        # (BT, BT) block-diagonal mask
        bsel = bsel_ref[...]                                              # (BT, B) batch selector

        for l in range(LAYERS):                                           # static unroll (L=2)
            # ---- self attention: all B*T rows at once, block-diag mask separates batches ----
            qkv = jnp.dot(x, sa_w_ref[l], preferred_element_type=jnp.float32) + sa_b_ref[l]
            ow = sa_ow_ref[l]                                             # (E, E)
            attn = jnp.zeros((BT, E), jnp.float32)
            for h in range(HEADS):
                qh = qkv[:, h * Dh:(h + 1) * Dh] * scale
                kh = qkv[:, E + h * Dh:E + (h + 1) * Dh]
                vh = qkv[:, 2 * E + h * Dh:2 * E + (h + 1) * Dh]
                # (BT, Dh) x (BT, Dh) contracting Dh -> (BT, BT)  (no explicit transpose)
                s = jax.lax.dot_general(qh, kh, (((1,), (1,)), ((), ())),
                                        preferred_element_type=jnp.float32)
                s = s + negmask
                s = s - jnp.max(s, axis=-1, keepdims=True)
                p = jnp.exp(s)
                p = p * pl.reciprocal(jnp.sum(p, axis=-1, keepdims=True), approx=True)
                oh = jnp.dot(p, vh, preferred_element_type=jnp.float32)   # (BT, Dh)
                # fold output projection into the head loop (no lane-axis concat)
                attn = attn + jnp.dot(oh, ow[h * Dh:(h + 1) * Dh, :],
                                      preferred_element_type=jnp.float32)
            attn = attn + sa_ob_ref[l]
            x = _layer_norm(x + attn, n1_ref[l])

            # ---- cross attention: memory seq-len == 1 -> attention weights are identically 1 ----
            memv = jnp.dot(mem, ca_vw_ref[l], preferred_element_type=jnp.float32) + ca_vb_ref[l]
            ca = jnp.dot(memv, ca_ow_ref[l], preferred_element_type=jnp.float32) + ca_ob_ref[l]
            ca_full = jnp.dot(bsel, ca, preferred_element_type=jnp.float32)   # broadcast over T
            x = _layer_norm(x + ca_full, n2_ref[l])

            # ---- feed-forward (ReLU) ----
            h1 = jnp.maximum(
                jnp.dot(x, ff1_w_ref[l], preferred_element_type=jnp.float32) + ff1_b_ref[l],
                0.0)
            f = jnp.dot(h1, ff2_w_ref[l], preferred_element_type=jnp.float32) + ff2_b_ref[l]
            x = _layer_norm(x + f, n3_ref[l])

        # ---- final vocabulary projection (single lane-dense store) ----
        out_ref[...] = (jnp.dot(x, fc_w_ref[...], preferred_element_type=jnp.float32)
                        + fc_b_ref[...])

    return kernel


# ----------------------------- wrapper -----------------------------
def _decoder_transformer_forward(tokens, memory, params):
    """tokens: (B, T) int32; memory: (B, E) f32  ->  logits (B, T, V) f32."""
    B, T = tokens.shape
    BT = B * T
    E, V = EMBED, VOCAB

    # constant selector / mask matrices (built from static shapes at trace time)
    possel = jnp.asarray(np.tile(np.eye(T, dtype=np.float32), (B, 1)))           # (BT, T): row i -> pos i % T
    bsel = jnp.asarray(np.kron(np.eye(B, dtype=np.float32),
                               np.ones((T, 1), np.float32)))                      # (BT, B): row i -> batch i // T
    block = np.kron(np.eye(B, dtype=np.float32), np.ones((T, T), np.float32))
    negmask = jnp.asarray(np.where(block > 0, 0.0, NEG_INF).astype(np.float32))   # (BT, BT) additive mask

    # stack per-layer weights with a leading L axis (statically indexed inside the kernel)
    stk = lambda name: jnp.stack([lp[name] for lp in params['layers']])
    sa_w, sa_b = stk('sa_w'), stk('sa_b')
    sa_ow, sa_ob = stk('sa_ow'), stk('sa_ob')
    ca_w, ca_b = stk('ca_w'), stk('ca_b')
    ca_vw, ca_vb = ca_w[:, :, 2 * E:], ca_b[:, :, 2 * E:]    # only the V projection is needed (Tk == 1)
    ca_ow, ca_ob = stk('ca_ow'), stk('ca_ob')
    ff1_w, ff1_b = stk('ff1_w'), stk('ff1_b')
    ff2_w, ff2_b = stk('ff2_w'), stk('ff2_b')
    n1, n2, n3 = stk('n1'), stk('n2'), stk('n3')

    tok2d = tokens.reshape(BT, 1).astype(jnp.int32)
    pos = params['pos'][:T]                                   # (T, E)

    kernel = _make_fused_kernel(B, T)
    logits = pl.pallas_call(
        kernel,
        out_shape=jax.ShapeDtypeStruct((BT, V), jnp.float32),
        compiler_params=pltpu.CompilerParams(vmem_limit_bytes=32 * 1024 * 1024),
    )(tok2d, memory, params['embed'], pos,
      possel, bsel, negmask,
      sa_w, sa_b, sa_ow, sa_ob,
      ca_vw, ca_vb, ca_ow, ca_ob,
      ff1_w, ff1_b, ff2_w, ff2_b,
      n1, n2, n3,
      params['fc_w'], params['fc_b'])
    return logits.reshape(B, T, V)


decoder_transformer_forward = jax.jit(_decoder_transformer_forward)


# ----------------------------- params -----------------------------
def init_params(key):
    ks = iter(jax.random.split(key, 64))

    def nrm(shape, scale=0.05):
        return scale * jax.random.normal(next(ks), shape, dtype=jnp.float32)

    E, V = EMBED, VOCAB
    ln = jnp.concatenate([jnp.ones((1, E), jnp.float32),
                          jnp.zeros((1, E), jnp.float32)], axis=0)  # [gamma; beta]
    layers = []
    for _ in range(LAYERS):
        layers.append(dict(
            sa_w=nrm((E, 3 * E)), sa_b=nrm((1, 3 * E), 0.01),
            sa_ow=nrm((E, E)), sa_ob=nrm((1, E), 0.01),
            ca_w=nrm((E, 3 * E)), ca_b=nrm((1, 3 * E), 0.01),
            ca_ow=nrm((E, E)), ca_ob=nrm((1, E), 0.01),
            ff1_w=nrm((E, FF)), ff1_b=nrm((1, FF), 0.01),
            ff2_w=nrm((FF, E), 0.02), ff2_b=nrm((1, E), 0.01),
            n1=ln, n2=ln, n3=ln,
        ))
    return dict(
        embed=nrm((V, E), 0.1),
        pos=jax.random.uniform(next(ks), (100, E), dtype=jnp.float32),  # torch.rand(1,100,E)
        layers=layers,
        fc_w=nrm((E, V)),
        fc_b=nrm((1, V), 0.01),
    )


# ----------------------------- pure-JAX reference (for sanity check) -----------------------------
def _ref_ln(x, gb):
    mean = jnp.mean(x, axis=-1, keepdims=True)
    c = x - mean
    var = jnp.mean(c * c, axis=-1, keepdims=True)
    return c * jax.lax.rsqrt(var + LN_EPS) * gb[0] + gb[1]


def _ref_mha(q_src, kv_src, w, b, ow, ob):
    # Full multi-head attention (including the degenerate Tk=1 cross-attention path),
    # so the kernel's algebraic simplification is validated against the real softmax.
    E = EMBED
    q = q_src @ w[:, :E] + b[0, :E]
    k = kv_src @ w[:, E:2 * E] + b[0, E:2 * E]
    v = kv_src @ w[:, 2 * E:] + b[0, 2 * E:]
    B, Tq, _ = q.shape
    Tk = k.shape[1]
    qh = q.reshape(B, Tq, HEADS, HEAD_DIM) * (1.0 / math.sqrt(HEAD_DIM))
    kh = k.reshape(B, Tk, HEADS, HEAD_DIM)
    vh = v.reshape(B, Tk, HEADS, HEAD_DIM)
    s = jnp.einsum('bqhd,bkhd->bhqk', qh, kh)
    p = jax.nn.softmax(s, axis=-1)
    o = jnp.einsum('bhqk,bkhd->bqhd', p, vh).reshape(B, Tq, E)
    return o @ ow + ob[0]


def reference_forward(tokens, memory, params):
    B, T = tokens.shape
    x = params['embed'][tokens] + params['pos'][:T][None]
    mem3 = memory.reshape(B, 1, EMBED)
    for lp in params['layers']:
        sa = _ref_mha(x, x, lp['sa_w'], lp['sa_b'], lp['sa_ow'], lp['sa_ob'])
        x = _ref_ln(x + sa, lp['n1'])
        ca = _ref_mha(x, mem3, lp['ca_w'], lp['ca_b'], lp['ca_ow'], lp['ca_ob'])
        x = _ref_ln(x + ca, lp['n2'])
        h = jax.nn.relu(x @ lp['ff1_w'] + lp['ff1_b'][0])
        f = h @ lp['ff2_w'] + lp['ff2_b'][0]
        x = _ref_ln(x + f, lp['n3'])
    return x @ params['fc_w'] + params['fc_b'][0]


# ----------------------------- main -----------------------------
if __name__ == "__main__":
    B, T = 2, 8
    params = init_params(jax.random.PRNGKey(42))
    k1, k2 = jax.random.split(jax.random.PRNGKey(0))
    tokens = jax.random.randint(k1, (B, T), 0, VOCAB, dtype=jnp.int32)
    memory = jax.random.normal(k2, (B, EMBED), dtype=jnp.float32)

    out = decoder_transformer_forward(tokens, memory, params)
    out = jax.block_until_ready(out)
    assert out.shape == (B, T, VOCAB)

    # high-precision pure-JAX reference for validation
    with jax.default_matmul_precision("float32"):
        ref = reference_forward(tokens, memory, params)
    np.testing.assert_allclose(np.asarray(out), np.asarray(ref), rtol=2e-2, atol=2e-2)

    print("KERNEL_OK")
</pallas_src>

<mosaic_0001>
module attributes {stable_mosaic.version = 11 : i64} {
  func.func @kernel(%arg0: memref<16x1xi32, #tpu.memory_space<vmem>>, %arg1: memref<2x32xf32, #tpu.memory_space<vmem>>, %arg2: memref<64x32xf32, #tpu.memory_space<vmem>>, %arg3: memref<8x32xf32, #tpu.memory_space<vmem>>, %arg4: memref<16x8xf32, #tpu.memory_space<vmem>>, %arg5: memref<16x2xf32, #tpu.memory_space<vmem>>, %arg6: memref<16x16xf32, #tpu.memory_space<vmem>>, %arg7: memref<2x32x96xf32, #tpu.memory_space<vmem>>, %arg8: memref<2x1x96xf32, #tpu.memory_space<vmem>>, %arg9: memref<2x32x32xf32, #tpu.memory_space<vmem>>, %arg10: memref<2x1x32xf32, #tpu.memory_space<vmem>>, %arg11: memref<2x32x32xf32, #tpu.memory_space<vmem>>, %arg12: memref<2x1x32xf32, #tpu.memory_space<vmem>>, %arg13: memref<2x32x32xf32, #tpu.memory_space<vmem>>, %arg14: memref<2x1x32xf32, #tpu.memory_space<vmem>>, %arg15: memref<2x32x2048xf32, #tpu.memory_space<vmem>>, %arg16: memref<2x1x2048xf32, #tpu.memory_space<vmem>>, %arg17: memref<2x2048x32xf32, #tpu.memory_space<vmem>>, %arg18: memref<2x1x32xf32, #tpu.memory_space<vmem>>, %arg19: memref<2x2x32xf32, #tpu.memory_space<vmem>>, %arg20: memref<2x2x32xf32, #tpu.memory_space<vmem>>, %arg21: memref<2x2x32xf32, #tpu.memory_space<vmem>>, %arg22: memref<32x64xf32, #tpu.memory_space<vmem>>, %arg23: memref<1x64xf32, #tpu.memory_space<vmem>>, %arg24: memref<16x64xf32, #tpu.memory_space<vmem>>) attributes {dimension_semantics = [], scalar_prefetch = 0 : i64, scratch_operands = 0 : i64, tpu.core_type = #tpu.core_type<tc>} {
    %c0 = arith.constant 0 : index
    %c0_0 = arith.constant 0 : index
    %0 = vector.load %arg0[%c0, %c0_0] : memref<16x1xi32, #tpu.memory_space<vmem>>, vector<16x1xi32>
    %1 = tpu.iota {dimensions = array<i32: 1>} : vector<16x64xi32>
    %2 = vector.broadcast %0 : vector<16x1xi32> to vector<16x64xi32>
    %3 = arith.cmpi eq, %1, %2 : vector<16x64xi32>
    %4 = arith.extui %3 : vector<16x64xi1> to vector<16x64xi32>
    %5 = arith.sitofp %4 : vector<16x64xi32> to vector<16x64xf32>
    %c0_1 = arith.constant 0 : index
    %c0_2 = arith.constant 0 : index
    %6 = vector.load %arg2[%c0_1, %c0_2] : memref<64x32xf32, #tpu.memory_space<vmem>>, vector<64x32xf32>
    %cst = arith.constant dense<0.000000e+00> : vector<16x32xf32>
    %7 = tpu.matmul %5, %6, %cst {dimension_numbers = #tpu.dot_dimension_numbers<[1], [0], [0], [1], [0, 0, 1, 1], [], []>} : vector<16x64xf32>, vector<64x32xf32>, vector<16x32xf32> -> vector<16x32xf32>
    %c0_3 = arith.constant 0 : index
    %c0_4 = arith.constant 0 : index
    %8 = vector.load %arg4[%c0_3, %c0_4] : memref<16x8xf32, #tpu.memory_space<vmem>>, vector<16x8xf32>
    %c0_5 = arith.constant 0 : index
    %c0_6 = arith.constant 0 : index
    %9 = vector.load %arg3[%c0_5, %c0_6] : memref<8x32xf32, #tpu.memory_space<vmem>>, vector<8x32xf32>
    %cst_7 = arith.constant dense<0.000000e+00> : vector<16x32xf32>
    %10 = tpu.matmul %8, %9, %cst_7 {dimension_numbers = #tpu.dot_dimension_numbers<[1], [0], [0], [1], [0, 0, 1, 1], [], []>} : vector<16x8xf32>, vector<8x32xf32>, vector<16x32xf32> -> vector<16x32xf32>
    %11 = arith.addf %7, %10 : vector<16x32xf32>
    %c0_8 = arith.constant 0 : index
    %c0_9 = arith.constant 0 : index
    %12 = vector.load %arg1[%c0_8, %c0_9] : memref<2x32xf32, #tpu.memory_space<vmem>>, vector<2x32xf32>
    %c0_10 = arith.constant 0 : index
    %c0_11 = arith.constant 0 : index
    %13 = vector.load %arg6[%c0_10, %c0_11] : memref<16x16xf32, #tpu.memory_space<vmem>>, vector<16x16xf32>
    %c0_12 = arith.constant 0 : index
    %c0_13 = arith.constant 0 : index
    %14 = vector.load %arg5[%c0_12, %c0_13] : memref<16x2xf32, #tpu.memory_space<vmem>>, vector<16x2xf32>
    %c0_14 = arith.constant 0 : index
    %c0_15 = arith.constant 0 : index
    %c0_16 = arith.constant 0 : index
    %15 = vector.load %arg7[%c0_14, %c0_15, %c0_16] : memref<2x32x96xf32, #tpu.memory_space<vmem>>, vector<1x32x96xf32>
    %16 = vector.shape_cast %15 : vector<1x32x96xf32> to vector<32x96xf32>
    %cst_17 = arith.constant dense<0.000000e+00> : vector<16x96xf32>
    %17 = tpu.matmul %11, %16, %cst_17 {dimension_numbers = #tpu.dot_dimension_numbers<[1], [0], [0], [1], [0, 0, 1, 1], [], []>} : vector<16x32xf32>, vector<32x96xf32>, vector<16x96xf32> -> vector<16x96xf32>
    %c0_18 = arith.constant 0 : index
    %c0_19 = arith.constant 0 : index
    %c0_20 = arith.constant 0 : index
    %18 = vector.load %arg8[%c0_18, %c0_19, %c0_20] : memref<2x1x96xf32, #tpu.memory_space<vmem>>, vector<1x1x96xf32>
    %19 = vector.shape_cast %18 : vector<1x1x96xf32> to vector<1x96xf32>
    %20 = vector.broadcast %19 : vector<1x96xf32> to vector<16x96xf32>
    %21 = arith.addf %17, %20 : vector<16x96xf32>
    %c0_21 = arith.constant 0 : index
    %c0_22 = arith.constant 0 : index
    %c0_23 = arith.constant 0 : index
    %22 = vector.load %arg9[%c0_21, %c0_22, %c0_23] : memref<2x32x32xf32, #tpu.memory_space<vmem>>, vector<1x32x32xf32>
    %23 = vector.shape_cast %22 : vector<1x32x32xf32> to vector<32x32xf32>
    %cst_24 = arith.constant 0.000000e+00 : f32
    %24 = vector.broadcast %cst_24 : f32 to vector<16x32xf32>
    %25 = vector.extract_strided_slice %21 {offsets = [0, 0], sizes = [16, 8], strides = [1, 1]} : vector<16x96xf32> to vector<16x8xf32>
    %cst_25 = arith.constant 0.353553385 : f32
    %26 = vector.broadcast %cst_25 : f32 to vector<16x8xf32>
    %27 = arith.mulf %25, %26 : vector<16x8xf32>
    %28 = vector.extract_strided_slice %21 {offsets = [0, 32], sizes = [16, 8], strides = [1, 1]} : vector<16x96xf32> to vector<16x8xf32>
    %29 = vector.extract_strided_slice %21 {offsets = [0, 64], sizes = [16, 8], strides = [1, 1]} : vector<16x96xf32> to vector<16x8xf32>
    %cst_26 = arith.constant dense<0.000000e+00> : vector<16x16xf32>
    %30 = tpu.matmul %27, %28, %cst_26 {dimension_numbers = #tpu.dot_dimension_numbers<[1], [1], [0], [0], [0, 0, 1, 0], [], []>} : vector<16x8xf32>, vector<16x8xf32>, vector<16x16xf32> -> vector<16x16xf32>
    %31 = arith.addf %30, %13 : vector<16x16xf32>
    %cst_27 = arith.constant dense<0xFF800000> : vector<16xf32>
    %32 = vector.multi_reduction <maximumf>, %31, %cst_27 [1] : vector<16x16xf32> to vector<16xf32>
    %33 = vector.shape_cast %32 : vector<16xf32> to vector<16x1xf32>
    %34 = vector.broadcast %33 : vector<16x1xf32> to vector<16x16xf32>
    %35 = arith.subf %31, %34 : vector<16x16xf32>
    %36 = math.exp %35 : vector<16x16xf32>
    %cst_28 = arith.constant dense<0.000000e+00> : vector<16xf32>
    %37 = vector.multi_reduction <add>, %36, %cst_28 [1] : vector<16x16xf32> to vector<16xf32>
    %38 = vector.shape_cast %37 : vector<16xf32> to vector<16x1xf32>
    %39 = tpu.reciprocal %38 {approx = true} : vector<16x1xf32> -> vector<16x1xf32>
    %40 = vector.broadcast %39 : vector<16x1xf32> to vector<16x16xf32>
    %41 = arith.mulf %36, %40 : vector<16x16xf32>
    %cst_29 = arith.constant dense<0.000000e+00> : vector<16x8xf32>
    %42 = tpu.matmul %41, %29, %cst_29 {dimension_numbers = #tpu.dot_dimension_numbers<[1], [0], [0], [1], [0, 0, 1, 1], [], []>} : vector<16x16xf32>, vector<16x8xf32>, vector<16x8xf32> -> vector<16x8xf32>
    %43 = vector.extract_strided_slice %23 {offsets = [0, 0], sizes = [8, 32], strides = [1, 1]} : vector<32x32xf32> to vector<8x32xf32>
    %cst_30 = arith.constant dense<0.000000e+00> : vector<16x32xf32>
    %44 = tpu.matmul %42, %43, %cst_30 {dimension_numbers = #tpu.dot_dimension_numbers<[1], [0], [0], [1], [0, 0, 1, 1], [], []>} : vector<16x8xf32>, vector<8x32xf32>, vector<16x32xf32> -> vector<16x32xf32>
    %45 = arith.addf %24, %44 : vector<16x32xf32>
    %46 = vector.extract_strided_slice %21 {offsets = [0, 8], sizes = [16, 8], strides = [1, 1]} : vector<16x96xf32> to vector<16x8xf32>
    %cst_31 = arith.constant 0.353553385 : f32
    %47 = vector.broadcast %cst_31 : f32 to vector<16x8xf32>
    %48 = arith.mulf %46, %47 : vector<16x8xf32>
    %49 = vector.extract_strided_slice %21 {offsets = [0, 40], sizes = [16, 8], strides = [1, 1]} : vector<16x96xf32> to vector<16x8xf32>
    %50 = vector.extract_strided_slice %21 {offsets = [0, 72], sizes = [16, 8], strides = [1, 1]} : vector<16x96xf32> to vector<16x8xf32>
    %cst_32 = arith.constant dense<0.000000e+00> : vector<16x16xf32>
    %51 = tpu.matmul %48, %49, %cst_32 {dimension_numbers = #tpu.dot_dimension_numbers<[1], [1], [0], [0], [0, 0, 1, 0], [], []>} : vector<16x8xf32>, vector<16x8xf32>, vector<16x16xf32> -> vector<16x16xf32>
    %52 = arith.addf %51, %13 : vector<16x16xf32>
    %cst_33 = arith.constant dense<0xFF800000> : vector<16xf32>
    %53 = vector.multi_reduction <maximumf>, %52, %cst_33 [1] : vector<16x16xf32> to vector<16xf32>
    %54 = vector.shape_cast %53 : vector<16xf32> to vector<16x1xf32>
    %55 = vector.broadcast %54 : vector<16x1xf32> to vector<16x16xf32>
    %56 = arith.subf %52, %55 : vector<16x16xf32>
    %57 = math.exp %56 : vector<16x16xf32>
    %cst_34 = arith.constant dense<0.000000e+00> : vector<16xf32>
    %58 = vector.multi_reduction <add>, %57, %cst_34 [1] : vector<16x16xf32> to vector<16xf32>
    %59 = vector.shape_cast %58 : vector<16xf32> to vector<16x1xf32>
    %60 = tpu.reciprocal %59 {approx = true} : vector<16x1xf32> -> vector<16x1xf32>
    %61 = vector.broadcast %60 : vector<16x1xf32> to vector<16x16xf32>
    %62 = arith.mulf %57, %61 : vector<16x16xf32>
    %cst_35 = arith.constant dense<0.000000e+00> : vector<16x8xf32>
    %63 = tpu.matmul %62, %50, %cst_35 {dimension_numbers = #tpu.dot_dimension_numbers<[1], [0], [0], [1], [0, 0, 1, 1], [], []>} : vector<16x16xf32>, vector<16x8xf32>, vector<16x8xf32> -> vector<16x8xf32>
    %64 = vector.extract_strided_slice %23 {offsets = [8, 0], sizes = [8, 32], strides = [1, 1]} : vector<32x32xf32> to vector<8x32xf32>
    %cst_36 = arith.constant dense<0.000000e+00> : vector<16x32xf32>
    %65 = tpu.matmul %63, %64, %cst_36 {dimension_numbers = #tpu.dot_dimension_numbers<[1], [0], [0], [1], [0, 0, 1, 1], [], []>} : vector<16x8xf32>, vector<8x32xf32>, vector<16x32xf32> -> vector<16x32xf32>
    %66 = arith.addf %45, %65 : vector<16x32xf32>
    %67 = vector.extract_strided_slice %21 {offsets = [0, 16], sizes = [16, 8], strides = [1, 1]} : vector<16x96xf32> to vector<16x8xf32>
    %cst_37 = arith.constant 0.353553385 : f32
    %68 = vector.broadcast %cst_37 : f32 to vector<16x8xf32>
    %69 = arith.mulf %67, %68 : vector<16x8xf32>
    %70 = vector.extract_strided_slice %21 {offsets = [0, 48], sizes = [16, 8], strides = [1, 1]} : vector<16x96xf32> to vector<16x8xf32>
    %71 = vector.extract_strided_slice %21 {offsets = [0, 80], sizes = [16, 8], strides = [1, 1]} : vector<16x96xf32> to vector<16x8xf32>
    %cst_38 = arith.constant dense<0.000000e+00> : vector<16x16xf32>
    %72 = tpu.matmul %69, %70, %cst_38 {dimension_numbers = #tpu.dot_dimension_numbers<[1], [1], [0], [0], [0, 0, 1, 0], [], []>} : vector<16x8xf32>, vector<16x8xf32>, vector<16x16xf32> -> vector<16x16xf32>
    %73 = arith.addf %72, %13 : vector<16x16xf32>
    %cst_39 = arith.constant dense<0xFF800000> : vector<16xf32>
    %74 = vector.multi_reduction <maximumf>, %73, %cst_39 [1] : vector<16x16xf32> to vector<16xf32>
    %75 = vector.shape_cast %74 : vector<16xf32> to vector<16x1xf32>
    %76 = vector.broadcast %75 : vector<16x1xf32> to vector<16x16xf32>
    %77 = arith.subf %73, %76 : vector<16x16xf32>
    %78 = math.exp %77 : vector<16x16xf32>
    %cst_40 = arith.constant dense<0.000000e+00> : vector<16xf32>
    %79 = vector.multi_reduction <add>, %78, %cst_40 [1] : vector<16x16xf32> to vector<16xf32>
    %80 = vector.shape_cast %79 : vector<16xf32> to vector<16x1xf32>
    %81 = tpu.reciprocal %80 {approx = true} : vector<16x1xf32> -> vector<16x1xf32>
    %82 = vector.broadcast %81 : vector<16x1xf32> to vector<16x16xf32>
    %83 = arith.mulf %78, %82 : vector<16x16xf32>
    %cst_41 = arith.constant dense<0.000000e+00> : vector<16x8xf32>
    %84 = tpu.matmul %83, %71, %cst_41 {dimension_numbers = #tpu.dot_dimension_numbers<[1], [0], [0], [1], [0, 0, 1, 1], [], []>} : vector<16x16xf32>, vector<16x8xf32>, vector<16x8xf32> -> vector<16x8xf32>
    %85 = vector.extract_strided_slice %23 {offsets = [16, 0], sizes = [8, 32], strides = [1, 1]} : vector<32x32xf32> to vector<8x32xf32>
    %cst_42 = arith.constant dense<0.000000e+00> : vector<16x32xf32>
    %86 = tpu.matmul %84, %85, %cst_42 {dimension_numbers = #tpu.dot_dimension_numbers<[1], [0], [0], [1], [0, 0, 1, 1], [], []>} : vector<16x8xf32>, vector<8x32xf32>, vector<16x32xf32> -> vector<16x32xf32>
    %87 = arith.addf %66, %86 : vector<16x32xf32>
    %88 = vector.extract_strided_slice %21 {offsets = [0, 24], sizes = [16, 8], strides = [1, 1]} : vector<16x96xf32> to vector<16x8xf32>
    %cst_43 = arith.constant 0.353553385 : f32
    %89 = vector.broadcast %cst_43 : f32 to vector<16x8xf32>
    %90 = arith.mulf %88, %89 : vector<16x8xf32>
    %91 = vector.extract_strided_slice %21 {offsets = [0, 56], sizes = [16, 8], strides = [1, 1]} : vector<16x96xf32> to vector<16x8xf32>
    %92 = vector.extract_strided_slice %21 {offsets = [0, 88], sizes = [16, 8], strides = [1, 1]} : vector<16x96xf32> to vector<16x8xf32>
    %cst_44 = arith.constant dense<0.000000e+00> : vector<16x16xf32>
    %93 = tpu.matmul %90, %91, %cst_44 {dimension_numbers = #tpu.dot_dimension_numbers<[1], [1], [0], [0], [0, 0, 1, 0], [], []>} : vector<16x8xf32>, vector<16x8xf32>, vector<16x16xf32> -> vector<16x16xf32>
    %94 = arith.addf %93, %13 : vector<16x16xf32>
    %cst_45 = arith.constant dense<0xFF800000> : vector<16xf32>
    %95 = vector.multi_reduction <maximumf>, %94, %cst_45 [1] : vector<16x16xf32> to vector<16xf32>
    %96 = vector.shape_cast %95 : vector<16xf32> to vector<16x1xf32>
    %97 = vector.broadcast %96 : vector<16x1xf32> to vector<16x16xf32>
    %98 = arith.subf %94, %97 : vector<16x16xf32>
    %99 = math.exp %98 : vector<16x16xf32>
    %cst_46 = arith.constant dense<0.000000e+00> : vector<16xf32>
    %100 = vector.multi_reduction <add>, %99, %cst_46 [1] : vector<16x16xf32> to vector<16xf32>
    %101 = vector.shape_cast %100 : vector<16xf32> to vector<16x1xf32>
    %102 = tpu.reciprocal %101 {approx = true} : vector<16x1xf32> -> vector<16x1xf32>
    %103 = vector.broadcast %102 : vector<16x1xf32> to vector<16x16xf32>
    %104 = arith.mulf %99, %103 : vector<16x16xf32>
    %cst_47 = arith.constant dense<0.000000e+00> : vector<16x8xf32>
    %105 = tpu.matmul %104, %92, %cst_47 {dimension_numbers = #tpu.dot_dimension_numbers<[1], [0], [0], [1], [0, 0, 1, 1], [], []>} : vector<16x16xf32>, vector<16x8xf32>, vector<16x8xf32> -> vector<16x8xf32>
    %106 = vector.extract_strided_slice %23 {offsets = [24, 0], sizes = [8, 32], strides = [1, 1]} : vector<32x32xf32> to vector<8x32xf32>
    %cst_48 = arith.constant dense<0.000000e+00> : vector<16x32xf32>
    %107 = tpu.matmul %105, %106, %cst_48 {dimension_numbers = #tpu.dot_dimension_numbers<[1], [0], [0], [1], [0, 0, 1, 1], [], []>} : vector<16x8xf32>, vector<8x32xf32>, vector<16x32xf32> -> vector<16x32xf32>
    %108 = arith.addf %87, %107 : vector<16x32xf32>
    %c0_49 = arith.constant 0 : index
    %c0_50 = arith.constant 0 : index
    %c0_51 = arith.constant 0 : index
    %109 = vector.load %arg10[%c0_49, %c0_50, %c0_51] : memref<2x1x32xf32, #tpu.memory_space<vmem>>, vector<1x1x32xf32>
    %110 = vector.shape_cast %109 : vector<1x1x32xf32> to vector<1x32xf32>
    %111 = vector.broadcast %110 : vector<1x32xf32> to vector<16x32xf32>
    %112 = arith.addf %108, %111 : vector<16x32xf32>
    %113 = arith.addf %11, %112 : vector<16x32xf32>
    %c0_52 = arith.constant 0 : index
    %c0_53 = arith.constant 0 : index
    %c0_54 = arith.constant 0 : index
    %114 = vector.load %arg19[%c0_52, %c0_53, %c0_54] : memref<2x2x32xf32, #tpu.memory_space<vmem>>, vector<1x2x32xf32>
    %115 = vector.shape_cast %114 : vector<1x2x32xf32> to vector<2x32xf32>
    %cst_55 = arith.constant dense<0.000000e+00> : vector<16xf32>
    %116 = vector.multi_reduction <add>, %113, %cst_55 [1] : vector<16x32xf32> to vector<16xf32>
    %117 = vector.shape_cast %116 : vector<16xf32> to vector<16x1xf32>
    %cst_56 = arith.constant 3.200000e+01 : f32
    %118 = vector.broadcast %cst_56 : f32 to vector<16x1xf32>
    %119 = arith.divf %117, %118 : vector<16x1xf32>
    %120 = vector.broadcast %119 : vector<16x1xf32> to vector<16x32xf32>
    %121 = arith.subf %113, %120 : vector<16x32xf32>
    %122 = arith.mulf %121, %121 : vector<16x32xf32>
    %cst_57 = arith.constant dense<0.000000e+00> : vector<16xf32>
    %123 = vector.multi_reduction <add>, %122, %cst_57 [1] : vector<16x32xf32> to vector<16xf32>
    %124 = vector.shape_cast %123 : vector<16xf32> to vector<16x1xf32>
    %cst_58 = arith.constant 3.200000e+01 : f32
    %125 = vector.broadcast %cst_58 : f32 to vector<16x1xf32>
    %126 = arith.divf %124, %125 : vector<16x1xf32>
    %cst_59 = arith.constant 9.99999974E-6 : f32
    %127 = vector.broadcast %cst_59 : f32 to vector<16x1xf32>
    %128 = arith.addf %126, %127 : vector<16x1xf32>
    %129 = math.rsqrt %128 : vector<16x1xf32>
    %130 = vector.broadcast %129 : vector<16x1xf32> to vector<16x32xf32>
    %131 = arith.mulf %121, %130 : vector<16x32xf32>
    %132 = vector.extract_strided_slice %115 {offsets = [0, 0], sizes = [1, 32], strides = [1, 1]} : vector<2x32xf32> to vector<1x32xf32>
    %133 = vector.broadcast %132 : vector<1x32xf32> to vector<16x32xf32>
    %134 = arith.mulf %131, %133 : vector<16x32xf32>
    %135 = vector.extract_strided_slice %115 {offsets = [1, 0], sizes = [1, 32], strides = [1, 1]} : vector<2x32xf32> to vector<1x32xf32>
    %136 = vector.broadcast %135 : vector<1x32xf32> to vector<16x32xf32>
    %137 = arith.addf %134, %136 : vector<16x32xf32>
    %c0_60 = arith.constant 0 : index
    %c0_61 = arith.constant 0 : index
    %c0_62 = arith.constant 0 : index
    %138 = vector.load %arg11[%c0_60, %c0_61, %c0_62] : memref<2x32x32xf32, #tpu.memory_space<vmem>>, vector<1x32x32xf32>
    %139 = vector.shape_cast %138 : vector<1x32x32xf32> to vector<32x32xf32>
    %cst_63 = arith.constant dense<0.000000e+00> : vector<2x32xf32>
    %140 = tpu.matmul %12, %139, %cst_63 {dimension_numbers = #tpu.dot_dimension_numbers<[1], [0], [0], [1], [0, 0, 1, 1], [], []>} : vector<2x32xf32>, vector<32x32xf32>, vector<2x32xf32> -> vector<2x32xf32>
    %c0_64 = arith.constant 0 : index
    %c0_65 = arith.constant 0 : index
    %c0_66 = arith.constant 0 : index
    %141 = vector.load %arg12[%c0_64, %c0_65, %c0_66] : memref<2x1x32xf32, #tpu.memory_space<vmem>>, vector<1x1x32xf32>
    %142 = vector.shape_cast %141 : vector<1x1x32xf32> to vector<1x32xf32>
    %143 = vector.broadcast %142 : vector<1x32xf32> to vector<2x32xf32>
    %144 = arith.addf %140, %143 : vector<2x32xf32>
    %c0_67 = arith.constant 0 : index
    %c0_68 = arith.constant 0 : index
    %c0_69 = arith.constant 0 : index
    %145 = vector.load %arg13[%c0_67, %c0_68, %c0_69] : memref<2x32x32xf32, #tpu.memory_space<vmem>>, vector<1x32x32xf32>
    %146 = vector.shape_cast %145 : vector<1x32x32xf32> to vector<32x32xf32>
    %cst_70 = arith.constant dense<0.000000e+00> : vector<2x32xf32>
    %147 = tpu.matmul %144, %146, %cst_70 {dimension_numbers = #tpu.dot_dimension_numbers<[1], [0], [0], [1], [0, 0, 1, 1], [], []>} : vector<2x32xf32>, vector<32x32xf32>, vector<2x32xf32> -> vector<2x32xf32>
    %c0_71 = arith.constant 0 : index
    %c0_72 = arith.constant 0 : index
    %c0_73 = arith.constant 0 : index
    %148 = vector.load %arg14[%c0_71, %c0_72, %c0_73] : memref<2x1x32xf32, #tpu.memory_space<vmem>>, vector<1x1x32xf32>
    %149 = vector.shape_cast %148 : vector<1x1x32xf32> to vector<1x32xf32>
    %150 = vector.broadcast %149 : vector<1x32xf32> to vector<2x32xf32>
    %151 = arith.addf %147, %150 : vector<2x32xf32>
    %cst_74 = arith.constant dense<0.000000e+00> : vector<16x32xf32>
    %152 = tpu.matmul %14, %151, %cst_74 {dimension_numbers = #tpu.dot_dimension_numbers<[1], [0], [0], [1], [0, 0, 1, 1], [], []>} : vector<16x2xf32>, vector<2x32xf32>, vector<16x32xf32> -> vector<16x32xf32>
    %153 = arith.addf %137, %152 : vector<16x32xf32>
    %c0_75 = arith.constant 0 : index
    %c0_76 = arith.constant 0 : index
    %c0_77 = arith.constant 0 : index
    %154 = vector.load %arg20[%c0_75, %c0_76, %c0_77] : memref<2x2x32xf32, #tpu.memory_space<vmem>>, vector<1x2x32xf32>
    %155 = vector.shape_cast %154 : vector<1x2x32xf32> to vector<2x32xf32>
    %cst_78 = arith.constant dense<0.000000e+00> : vector<16xf32>
    %156 = vector.multi_reduction <add>, %153, %cst_78 [1] : vector<16x32xf32> to vector<16xf32>
    %157 = vector.shape_cast %156 : vector<16xf32> to vector<16x1xf32>
    %cst_79 = arith.constant 3.200000e+01 : f32
    %158 = vector.broadcast %cst_79 : f32 to vector<16x1xf32>
    %159 = arith.divf %157, %158 : vector<16x1xf32>
    %160 = vector.broadcast %159 : vector<16x1xf32> to vector<16x32xf32>
    %161 = arith.subf %153, %160 : vector<16x32xf32>
    %162 = arith.mulf %161, %161 : vector<16x32xf32>
    %cst_80 = arith.constant dense<0.000000e+00> : vector<16xf32>
    %163 = vector.multi_reduction <add>, %162, %cst_80 [1] : vector<16x32xf32> to vector<16xf32>
    %164 = vector.shape_cast %163 : vector<16xf32> to vector<16x1xf32>
    %cst_81 = arith.constant 3.200000e+01 : f32
    %165 = vector.broadcast %cst_81 : f32 to vector<16x1xf32>
    %166 = arith.divf %164, %165 : vector<16x1xf32>
    %cst_82 = arith.constant 9.99999974E-6 : f32
    %167 = vector.broadcast %cst_82 : f32 to vector<16x1xf32>
    %168 = arith.addf %166, %167 : vector<16x1xf32>
    %169 = math.rsqrt %168 : vector<16x1xf32>
    %170 = vector.broadcast %169 : vector<16x1xf32> to vector<16x32xf32>
    %171 = arith.mulf %161, %170 : vector<16x32xf32>
    %172 = vector.extract_strided_slice %155 {offsets = [0, 0], sizes = [1, 32], strides = [1, 1]} : vector<2x32xf32> to vector<1x32xf32>
    %173 = vector.broadcast %172 : vector<1x32xf32> to vector<16x32xf32>
    %174 = arith.mulf %171, %173 : vector<16x32xf32>
    %175 = vector.extract_strided_slice %155 {offsets = [1, 0], sizes = [1, 32], strides = [1, 1]} : vector<2x32xf32> to vector<1x32xf32>
    %176 = vector.broadcast %175 : vector<1x32xf32> to vector<16x32xf32>
    %177 = arith.addf %174, %176 : vector<16x32xf32>
    %c0_83 = arith.constant 0 : index
    %c0_84 = arith.constant 0 : index
    %c0_85 = arith.constant 0 : index
    %178 = vector.load %arg15[%c0_83, %c0_84, %c0_85] : memref<2x32x2048xf32, #tpu.memory_space<vmem>>, vector<1x32x2048xf32>
    %179 = vector.shape_cast %178 : vector<1x32x2048xf32> to vector<32x2048xf32>
    %cst_86 = arith.constant dense<0.000000e+00> : vector<16x2048xf32>
    %180 = tpu.matmul %177, %179, %cst_86 {dimension_numbers = #tpu.dot_dimension_numbers<[1], [0], [0], [1], [0, 0, 1, 1], [], []>} : vector<16x32xf32>, vector<32x2048xf32>, vector<16x2048xf32> -> vector<16x2048xf32>
    %c0_87 = arith.constant 0 : index
    %c0_88 = arith.constant 0 : index
    %c0_89 = arith.constant 0 : index
    %181 = vector.load %arg16[%c0_87, %c0_88, %c0_89] : memref<2x1x2048xf32, #tpu.memory_space<vmem>>, vector<1x1x2048xf32>
    %182 = vector.shape_cast %181 : vector<1x1x2048xf32> to vector<1x2048xf32>
    %183 = vector.broadcast %182 : vector<1x2048xf32> to vector<16x2048xf32>
    %184 = arith.addf %180, %183 : vector<16x2048xf32>
    %cst_90 = arith.constant 0.000000e+00 : f32
    %185 = vector.broadcast %cst_90 : f32 to vector<16x2048xf32>
    %186 = arith.maximumf %184, %185 : vector<16x2048xf32>
    %c0_91 = arith.constant 0 : index
    %c0_92 = arith.constant 0 : index
    %c0_93 = arith.constant 0 : index
    %187 = vector.load %arg17[%c0_91, %c0_92, %c0_93] : memref<2x2048x32xf32, #tpu.memory_space<vmem>>, vector<1x2048x32xf32>
    %188 = vector.shape_cast %187 : vector<1x2048x32xf32> to vector<2048x32xf32>
    %cst_94 = arith.constant dense<0.000000e+00> : vector<16x32xf32>
    %189 = tpu.matmul %186, %188, %cst_94 {dimension_numbers = #tpu.dot_dimension_numbers<[1], [0], [0], [1], [0, 0, 1, 1], [], []>} : vector<16x2048xf32>, vector<2048x32xf32>, vector<16x32xf32> -> vector<16x32xf32>
    %c0_95 = arith.constant 0 : index
    %c0_96 = arith.constant 0 : index
    %c0_97 = arith.constant 0 : index
    %190 = vector.load %arg18[%c0_95, %c0_96, %c0_97] : memref<2x1x32xf32, #tpu.memory_space<vmem>>, vector<1x1x32xf32>
    %191 = vector.shape_cast %190 : vector<1x1x32xf32> to vector<1x32xf32>
    %192 = vector.broadcast %191 : vector<1x32xf32> to vector<16x32xf32>
    %193 = arith.addf %189, %192 : vector<16x32xf32>
    %194 = arith.addf %177, %193 : vector<16x32xf32>
    %c0_98 = arith.constant 0 : index
    %c0_99 = arith.constant 0 : index
    %c0_100 = arith.constant 0 : index
    %195 = vector.load %arg21[%c0_98, %c0_99, %c0_100] : memref<2x2x32xf32, #tpu.memory_space<vmem>>, vector<1x2x32xf32>
    %196 = vector.shape_cast %195 : vector<1x2x32xf32> to vector<2x32xf32>
    %cst_101 = arith.constant dense<0.000000e+00> : vector<16xf32>
    %197 = vector.multi_reduction <add>, %194, %cst_101 [1] : vector<16x32xf32> to vector<16xf32>
    %198 = vector.shape_cast %197 : vector<16xf32> to vector<16x1xf32>
    %cst_102 = arith.constant 3.200000e+01 : f32
    %199 = vector.broadcast %cst_102 : f32 to vector<16x1xf32>
    %200 = arith.divf %198, %199 : vector<16x1xf32>
    %201 = vector.broadcast %200 : vector<16x1xf32> to vector<16x32xf32>
    %202 = arith.subf %194, %201 : vector<16x32xf32>
    %203 = arith.mulf %202, %202 : vector<16x32xf32>
    %cst_103 = arith.constant dense<0.000000e+00> : vector<16xf32>
    %204 = vector.multi_reduction <add>, %203, %cst_103 [1] : vector<16x32xf32> to vector<16xf32>
    %205 = vector.shape_cast %204 : vector<16xf32> to vector<16x1xf32>
    %cst_104 = arith.constant 3.200000e+01 : f32
    %206 = vector.broadcast %cst_104 : f32 to vector<16x1xf32>
    %207 = arith.divf %205, %206 : vector<16x1xf32>
    %cst_105 = arith.constant 9.99999974E-6 : f32
    %208 = vector.broadcast %cst_105 : f32 to vector<16x1xf32>
    %209 = arith.addf %207, %208 : vector<16x1xf32>
    %210 = math.rsqrt %209 : vector<16x1xf32>
    %211 = vector.broadcast %210 : vector<16x1xf32> to vector<16x32xf32>
    %212 = arith.mulf %202, %211 : vector<16x32xf32>
    %213 = vector.extract_strided_slice %196 {offsets = [0, 0], sizes = [1, 32], strides = [1, 1]} : vector<2x32xf32> to vector<1x32xf32>
    %214 = vector.broadcast %213 : vector<1x32xf32> to vector<16x32xf32>
    %215 = arith.mulf %212, %214 : vector<16x32xf32>
    %216 = vector.extract_strided_slice %196 {offsets = [1, 0], sizes = [1, 32], strides = [1, 1]} : vector<2x32xf32> to vector<1x32xf32>
    %217 = vector.broadcast %216 : vector<1x32xf32> to vector<16x32xf32>
    %218 = arith.addf %215, %217 : vector<16x32xf32>
    %c1 = arith.constant 1 : index
    %c0_106 = arith.constant 0 : index
    %c0_107 = arith.constant 0 : index
    %219 = vector.load %arg7[%c1, %c0_106, %c0_107] : memref<2x32x96xf32, #tpu.memory_space<vmem>>, vector<1x32x96xf32>
    %220 = vector.shape_cast %219 : vector<1x32x96xf32> to vector<32x96xf32>
    %cst_108 = arith.constant dense<0.000000e+00> : vector<16x96xf32>
    %221 = tpu.matmul %218, %220, %cst_108 {dimension_numbers = #tpu.dot_dimension_numbers<[1], [0], [0], [1], [0, 0, 1, 1], [], []>} : vector<16x32xf32>, vector<32x96xf32>, vector<16x96xf32> -> vector<16x96xf32>
    %c1_109 = arith.constant 1 : index
    %c0_110 = arith.constant 0 : index
    %c0_111 = arith.constant 0 : index
    %222 = vector.load %arg8[%c1_109, %c0_110, %c0_111] : memref<2x1x96xf32, #tpu.memory_space<vmem>>, vector<1x1x96xf32>
    %223 = vector.shape_cast %222 : vector<1x1x96xf32> to vector<1x96xf32>
    %224 = vector.broadcast %223 : vector<1x96xf32> to vector<16x96xf32>
    %225 = arith.addf %221, %224 : vector<16x96xf32>
    %c1_112 = arith.constant 1 : index
    %c0_113 = arith.constant 0 : index
    %c0_114 = arith.constant 0 : index
    %226 = vector.load %arg9[%c1_112, %c0_113, %c0_114] : memref<2x32x32xf32, #tpu.memory_space<vmem>>, vector<1x32x32xf32>
    %227 = vector.shape_cast %226 : vector<1x32x32xf32> to vector<32x32xf32>
    %cst_115 = arith.constant 0.000000e+00 : f32
    %228 = vector.broadcast %cst_115 : f32 to vector<16x32xf32>
    %229 = vector.extract_strided_slice %225 {offsets = [0, 0], sizes = [16, 8], strides = [1, 1]} : vector<16x96xf32> to vector<16x8xf32>
    %cst_116 = arith.constant 0.353553385 : f32
    %230 = vector.broadcast %cst_116 : f32 to vector<16x8xf32>
    %231 = arith.mulf %229, %230 : vector<16x8xf32>
    %232 = vector.extract_strided_slice %225 {offsets = [0, 32], sizes = [16, 8], strides = [1, 1]} : vector<16x96xf32> to vector<16x8xf32>
    %233 = vector.extract_strided_slice %225 {offsets = [0, 64], sizes = [16, 8], strides = [1, 1]} : vector<16x96xf32> to vector<16x8xf32>
    %cst_117 = arith.constant dense<0.000000e+00> : vector<16x16xf32>
    %234 = tpu.matmul %231, %232, %cst_117 {dimension_numbers = #tpu.dot_dimension_numbers<[1], [1], [0], [0], [0, 0, 1, 0], [], []>} : vector<16x8xf32>, vector<16x8xf32>, vector<16x16xf32> -> vector<16x16xf32>
    %235 = arith.addf %234, %13 : vector<16x16xf32>
    %cst_118 = arith.constant dense<0xFF800000> : vector<16xf32>
    %236 = vector.multi_reduction <maximumf>, %235, %cst_118 [1] : vector<16x16xf32> to vector<16xf32>
    %237 = vector.shape_cast %236 : vector<16xf32> to vector<16x1xf32>
    %238 = vector.broadcast %237 : vector<16x1xf32> to vector<16x16xf32>
    %239 = arith.subf %235, %238 : vector<16x16xf32>
    %240 = math.exp %239 : vector<16x16xf32>
    %cst_119 = arith.constant dense<0.000000e+00> : vector<16xf32>
    %241 = vector.multi_reduction <add>, %240, %cst_119 [1] : vector<16x16xf32> to vector<16xf32>
    %242 = vector.shape_cast %241 : vector<16xf32> to vector<16x1xf32>
    %243 = tpu.reciprocal %242 {approx = true} : vector<16x1xf32> -> vector<16x1xf32>
    %244 = vector.broadcast %243 : vector<16x1xf32> to vector<16x16xf32>
    %245 = arith.mulf %240, %244 : vector<16x16xf32>
    %cst_120 = arith.constant dense<0.000000e+00> : vector<16x8xf32>
    %246 = tpu.matmul %245, %233, %cst_120 {dimension_numbers = #tpu.dot_dimension_numbers<[1], [0], [0], [1], [0, 0, 1, 1], [], []>} : vector<16x16xf32>, vector<16x8xf32>, vector<16x8xf32> -> vector<16x8xf32>
    %247 = vector.extract_strided_slice %227 {offsets = [0, 0], sizes = [8, 32], strides = [1, 1]} : vector<32x32xf32> to vector<8x32xf32>
    %cst_121 = arith.constant dense<0.000000e+00> : vector<16x32xf32>
    %248 = tpu.matmul %246, %247, %cst_121 {dimension_numbers = #tpu.dot_dimension_numbers<[1], [0], [0], [1], [0, 0, 1, 1], [], []>} : vector<16x8xf32>, vector<8x32xf32>, vector<16x32xf32> -> vector<16x32xf32>
    %249 = arith.addf %228, %248 : vector<16x32xf32>
    %250 = vector.extract_strided_slice %225 {offsets = [0, 8], sizes = [16, 8], strides = [1, 1]} : vector<16x96xf32> to vector<16x8xf32>
    %cst_122 = arith.constant 0.353553385 : f32
    %251 = vector.broadcast %cst_122 : f32 to vector<16x8xf32>
    %252 = arith.mulf %250, %251 : vector<16x8xf32>
    %253 = vector.extract_strided_slice %225 {offsets = [0, 40], sizes = [16, 8], strides = [1, 1]} : vector<16x96xf32> to vector<16x8xf32>
    %254 = vector.extract_strided_slice %225 {offsets = [0, 72], sizes = [16, 8], strides = [1, 1]} : vector<16x96xf32> to vector<16x8xf32>
    %cst_123 = arith.constant dense<0.000000e+00> : vector<16x16xf32>
    %255 = tpu.matmul %252, %253, %cst_123 {dimension_numbers = #tpu.dot_dimension_numbers<[1], [1], [0], [0], [0, 0, 1, 0], [], []>} : vector<16x8xf32>, vector<16x8xf32>, vector<16x16xf32> -> vector<16x16xf32>
    %256 = arith.addf %255, %13 : vector<16x16xf32>
    %cst_124 = arith.constant dense<0xFF800000> : vector<16xf32>
    %257 = vector.multi_reduction <maximumf>, %256, %cst_124 [1] : vector<16x16xf32> to vector<16xf32>
    %258 = vector.shape_cast %257 : vector<16xf32> to vector<16x1xf32>
    %259 = vector.broadcast %258 : vector<16x1xf32> to vector<16x16xf32>
    %260 = arith.subf %256, %259 : vector<16x16xf32>
    %261 = math.exp %260 : vector<16x16xf32>
    %cst_125 = arith.constant dense<0.000000e+00> : vector<16xf32>
    %262 = vector.multi_reduction <add>, %261, %cst_125 [1] : vector<16x16xf32> to vector<16xf32>
    %263 = vector.shape_cast %262 : vector<16xf32> to vector<16x1xf32>
    %264 = tpu.reciprocal %263 {approx = true} : vector<16x1xf32> -> vector<16x1xf32>
    %265 = vector.broadcast %264 : vector<16x1xf32> to vector<16x16xf32>
    %266 = arith.mulf %261, %265 : vector<16x16xf32>
    %cst_126 = arith.constant dense<0.000000e+00> : vector<16x8xf32>
    %267 = tpu.matmul %266, %254, %cst_126 {dimension_numbers = #tpu.dot_dimension_numbers<[1], [0], [0], [1], [0, 0, 1, 1], [], []>} : vector<16x16xf32>, vector<16x8xf32>, vector<16x8xf32> -> vector<16x8xf32>
    %268 = vector.extract_strided_slice %227 {offsets = [8, 0], sizes = [8, 32], strides = [1, 1]} : vector<32x32xf32> to vector<8x32xf32>
    %cst_127 = arith.constant dense<0.000000e+00> : vector<16x32xf32>
    %269 = tpu.matmul %267, %268, %cst_127 {dimension_numbers = #tpu.dot_dimension_numbers<[1], [0], [0], [1], [0, 0, 1, 1], [], []>} : vector<16x8xf32>, vector<8x32xf32>, vector<16x32xf32> -> vector<16x32xf32>
    %270 = arith.addf %249, %269 : vector<16x32xf32>
    %271 = vector.extract_strided_slice %225 {offsets = [0, 16], sizes = [16, 8], strides = [1, 1]} : vector<16x96xf32> to vector<16x8xf32>
    %cst_128 = arith.constant 0.353553385 : f32
    %272 = vector.broadcast %cst_128 : f32 to vector<16x8xf32>
    %273 = arith.mulf %271, %272 : vector<16x8xf32>
    %274 = vector.extract_strided_slice %225 {offsets = [0, 48], sizes = [16, 8], strides = [1, 1]} : vector<16x96xf32> to vector<16x8xf32>
    %275 = vector.extract_strided_slice %225 {offsets = [0, 80], sizes = [16, 8], strides = [1, 1]} : vector<16x96xf32> to vector<16x8xf32>
    %cst_129 = arith.constant dense<0.000000e+00> : vector<16x16xf32>
    %276 = tpu.matmul %273, %274, %cst_129 {dimension_numbers = #tpu.dot_dimension_numbers<[1], [1], [0], [0], [0, 0, 1, 0], [], []>} : vector<16x8xf32>, vector<16x8xf32>, vector<16x16xf32> -> vector<16x16xf32>
    %277 = arith.addf %276, %13 : vector<16x16xf32>
    %cst_130 = arith.constant dense<0xFF800000> : vector<16xf32>
    %278 = vector.multi_reduction <maximumf>, %277, %cst_130 [1] : vector<16x16xf32> to vector<16xf32>
    %279 = vector.shape_cast %278 : vector<16xf32> to vector<16x1xf32>
    %280 = vector.broadcast %279 : vector<16x1xf32> to vector<16x16xf32>
    %281 = arith.subf %277, %280 : vector<16x16xf32>
    %282 = math.exp %281 : vector<16x16xf32>
    %cst_131 = arith.constant dense<0.000000e+00> : vector<16xf32>
    %283 = vector.multi_reduction <add>, %282, %cst_131 [1] : vector<16x16xf32> to vector<16xf32>
    %284 = vector.shape_cast %283 : vector<16xf32> to vector<16x1xf32>
    %285 = tpu.reciprocal %284 {approx = true} : vector<16x1xf32> -> vector<16x1xf32>
    %286 = vector.broadcast %285 : vector<16x1xf32> to vector<16x16xf32>
    %287 = arith.mulf %282, %286 : vector<16x16xf32>
    %cst_132 = arith.constant dense<0.000000e+00> : vector<16x8xf32>
    %288 = tpu.matmul %287, %275, %cst_132 {dimension_numbers = #tpu.dot_dimension_numbers<[1], [0], [0], [1], [0, 0, 1, 1], [], []>} : vector<16x16xf32>, vector<16x8xf32>, vector<16x8xf32> -> vector<16x8xf32>
    %289 = vector.extract_strided_slice %227 {offsets = [16, 0], sizes = [8, 32], strides = [1, 1]} : vector<32x32xf32> to vector<8x32xf32>
    %cst_133 = arith.constant dense<0.000000e+00> : vector<16x32xf32>
    %290 = tpu.matmul %288, %289, %cst_133 {dimension_numbers = #tpu.dot_dimension_numbers<[1], [0], [0], [1], [0, 0, 1, 1], [], []>} : vector<16x8xf32>, vector<8x32xf32>, vector<16x32xf32> -> vector<16x32xf32>
    %291 = arith.addf %270, %290 : vector<16x32xf32>
    %292 = vector.extract_strided_slice %225 {offsets = [0, 24], sizes = [16, 8], strides = [1, 1]} : vector<16x96xf32> to vector<16x8xf32>
    %cst_134 = arith.constant 0.353553385 : f32
    %293 = vector.broadcast %cst_134 : f32 to vector<16x8xf32>
    %294 = arith.mulf %292, %293 : vector<16x8xf32>
    %295 = vector.extract_strided_slice %225 {offsets = [0, 56], sizes = [16, 8], strides = [1, 1]} : vector<16x96xf32> to vector<16x8xf32>
    %296 = vector.extract_strided_slice %225 {offsets = [0, 88], sizes = [16, 8], strides = [1, 1]} : vector<16x96xf32> to vector<16x8xf32>
    %cst_135 = arith.constant dense<0.000000e+00> : vector<16x16xf32>
    %297 = tpu.matmul %294, %295, %cst_135 {dimension_numbers = #tpu.dot_dimension_numbers<[1], [1], [0], [0], [0, 0, 1, 0], [], []>} : vector<16x8xf32>, vector<16x8xf32>, vector<16x16xf32> -> vector<16x16xf32>
    %298 = arith.addf %297, %13 : vector<16x16xf32>
    %cst_136 = arith.constant dense<0xFF800000> : vector<16xf32>
    %299 = vector.multi_reduction <maximumf>, %298, %cst_136 [1] : vector<16x16xf32> to vector<16xf32>
    %300 = vector.shape_cast %299 : vector<16xf32> to vector<16x1xf32>
    %301 = vector.broadcast %300 : vector<16x1xf32> to vector<16x16xf32>
    %302 = arith.subf %298, %301 : vector<16x16xf32>
    %303 = math.exp %302 : vector<16x16xf32>
    %cst_137 = arith.constant dense<0.000000e+00> : vector<16xf32>
    %304 = vector.multi_reduction <add>, %303, %cst_137 [1] : vector<16x16xf32> to vector<16xf32>
    %305 = vector.shape_cast %304 : vector<16xf32> to vector<16x1xf32>
    %306 = tpu.reciprocal %305 {approx = true} : vector<16x1xf32> -> vector<16x1xf32>
    %307 = vector.broadcast %306 : vector<16x1xf32> to vector<16x16xf32>
    %308 = arith.mulf %303, %307 : vector<16x16xf32>
    %cst_138 = arith.constant dense<0.000000e+00> : vector<16x8xf32>
    %309 = tpu.matmul %308, %296, %cst_138 {dimension_numbers = #tpu.dot_dimension_numbers<[1], [0], [0], [1], [0, 0, 1, 1], [], []>} : vector<16x16xf32>, vector<16x8xf32>, vector<16x8xf32> -> vector<16x8xf32>
    %310 = vector.extract_strided_slice %227 {offsets = [24, 0], sizes = [8, 32], strides = [1, 1]} : vector<32x32xf32> to vector<8x32xf32>
    %cst_139 = arith.constant dense<0.000000e+00> : vector<16x32xf32>
    %311 = tpu.matmul %309, %310, %cst_139 {dimension_numbers = #tpu.dot_dimension_numbers<[1], [0], [0], [1], [0, 0, 1, 1], [], []>} : vector<16x8xf32>, vector<8x32xf32>, vector<16x32xf32> -> vector<16x32xf32>
    %312 = arith.addf %291, %311 : vector<16x32xf32>
    %c1_140 = arith.constant 1 : index
    %c0_141 = arith.constant 0 : index
    %c0_142 = arith.constant 0 : index
    %313 = vector.load %arg10[%c1_140, %c0_141, %c0_142] : memref<2x1x32xf32, #tpu.memory_space<vmem>>, vector<1x1x32xf32>
    %314 = vector.shape_cast %313 : vector<1x1x32xf32> to vector<1x32xf32>
    %315 = vector.broadcast %314 : vector<1x32xf32> to vector<16x32xf32>
    %316 = arith.addf %312, %315 : vector<16x32xf32>
    %317 = arith.addf %218, %316 : vector<16x32xf32>
    %c1_143 = arith.constant 1 : index
    %c0_144 = arith.constant 0 : index
    %c0_145 = arith.constant 0 : index
    %318 = vector.load %arg19[%c1_143, %c0_144, %c0_145] : memref<2x2x32xf32, #tpu.memory_space<vmem>>, vector<1x2x32xf32>
    %319 = vector.shape_cast %318 : vector<1x2x32xf32> to vector<2x32xf32>
    %cst_146 = arith.constant dense<0.000000e+00> : vector<16xf32>
    %320 = vector.multi_reduction <add>, %317, %cst_146 [1] : vector<16x32xf32> to vector<16xf32>
    %321 = vector.shape_cast %320 : vector<16xf32> to vector<16x1xf32>
    %cst_147 = arith.constant 3.200000e+01 : f32
    %322 = vector.broadcast %cst_147 : f32 to vector<16x1xf32>
    %323 = arith.divf %321, %322 : vector<16x1xf32>
    %324 = vector.broadcast %323 : vector<16x1xf32> to vector<16x32xf32>
    %325 = arith.subf %317, %324 : vector<16x32xf32>
    %326 = arith.mulf %325, %325 : vector<16x32xf32>
    %cst_148 = arith.constant dense<0.000000e+00> : vector<16xf32>
    %327 = vector.multi_reduction <add>, %326, %cst_148 [1] : vector<16x32xf32> to vector<16xf32>
    %328 = vector.shape_cast %327 : vector<16xf32> to vector<16x1xf32>
    %cst_149 = arith.constant 3.200000e+01 : f32
    %329 = vector.broadcast %cst_149 : f32 to vector<16x1xf32>
    %330 = arith.divf %328, %329 : vector<16x1xf32>
    %cst_150 = arith.constant 9.99999974E-6 : f32
    %331 = vector.broadcast %cst_150 : f32 to vector<16x1xf32>
    %332 = arith.addf %330, %331 : vector<16x1xf32>
    %333 = math.rsqrt %332 : vector<16x1xf32>
    %334 = vector.broadcast %333 : vector<16x1xf32> to vector<16x32xf32>
    %335 = arith.mulf %325, %334 : vector<16x32xf32>
    %336 = vector.extract_strided_slice %319 {offsets = [0, 0], sizes = [1, 32], strides = [1, 1]} : vector<2x32xf32> to vector<1x32xf32>
    %337 = vector.broadcast %336 : vector<1x32xf32> to vector<16x32xf32>
    %338 = arith.mulf %335, %337 : vector<16x32xf32>
    %339 = vector.extract_strided_slice %319 {offsets = [1, 0], sizes = [1, 32], strides = [1, 1]} : vector<2x32xf32> to vector<1x32xf32>
    %340 = vector.broadcast %339 : vector<1x32xf32> to vector<16x32xf32>
    %341 = arith.addf %338, %340 : vector<16x32xf32>
    %c1_151 = arith.constant 1 : index
    %c0_152 = arith.constant 0 : index
    %c0_153 = arith.constant 0 : index
    %342 = vector.load %arg11[%c1_151, %c0_152, %c0_153] : memref<2x32x32xf32, #tpu.memory_space<vmem>>, vector<1x32x32xf32>
    %343 = vector.shape_cast %342 : vector<1x32x32xf32> to vector<32x32xf32>
    %cst_154 = arith.constant dense<0.000000e+00> : vector<2x32xf32>
    %344 = tpu.matmul %12, %343, %cst_154 {dimension_numbers = #tpu.dot_dimension_numbers<[1], [0], [0], [1], [0, 0, 1, 1], [], []>} : vector<2x32xf32>, vector<32x32xf32>, vector<2x32xf32> -> vector<2x32xf32>
    %c1_155 = arith.constant 1 : index
    %c0_156 = arith.constant 0 : index
    %c0_157 = arith.constant 0 : index
    %345 = vector.load %arg12[%c1_155, %c0_156, %c0_157] : memref<2x1x32xf32, #tpu.memory_space<vmem>>, vector<1x1x32xf32>
    %346 = vector.shape_cast %345 : vector<1x1x32xf32> to vector<1x32xf32>
    %347 = vector.broadcast %346 : vector<1x32xf32> to vector<2x32xf32>
    %348 = arith.addf %344, %347 : vector<2x32xf32>
    %c1_158 = arith.constant 1 : index
    %c0_159 = arith.constant 0 : index
    %c0_160 = arith.constant 0 : index
    %349 = vector.load %arg13[%c1_158, %c0_159, %c0_160] : memref<2x32x32xf32, #tpu.memory_space<vmem>>, vector<1x32x32xf32>
    %350 = vector.shape_cast %349 : vector<1x32x32xf32> to vector<32x32xf32>
    %cst_161 = arith.constant dense<0.000000e+00> : vector<2x32xf32>
    %351 = tpu.matmul %348, %350, %cst_161 {dimension_numbers = #tpu.dot_dimension_numbers<[1], [0], [0], [1], [0, 0, 1, 1], [], []>} : vector<2x32xf32>, vector<32x32xf32>, vector<2x32xf32> -> vector<2x32xf32>
    %c1_162 = arith.constant 1 : index
    %c0_163 = arith.constant 0 : index
    %c0_164 = arith.constant 0 : index
    %352 = vector.load %arg14[%c1_162, %c0_163, %c0_164] : memref<2x1x32xf32, #tpu.memory_space<vmem>>, vector<1x1x32xf32>
    %353 = vector.shape_cast %352 : vector<1x1x32xf32> to vector<1x32xf32>
    %354 = vector.broadcast %353 : vector<1x32xf32> to vector<2x32xf32>
    %355 = arith.addf %351, %354 : vector<2x32xf32>
    %cst_165 = arith.constant dense<0.000000e+00> : vector<16x32xf32>
    %356 = tpu.matmul %14, %355, %cst_165 {dimension_numbers = #tpu.dot_dimension_numbers<[1], [0], [0], [1], [0, 0, 1, 1], [], []>} : vector<16x2xf32>, vector<2x32xf32>, vector<16x32xf32> -> vector<16x32xf32>
    %357 = arith.addf %341, %356 : vector<16x32xf32>
    %c1_166 = arith.constant 1 : index
    %c0_167 = arith.constant 0 : index
    %c0_168 = arith.constant 0 : index
    %358 = vector.load %arg20[%c1_166, %c0_167, %c0_168] : memref<2x2x32xf32, #tpu.memory_space<vmem>>, vector<1x2x32xf32>
    %359 = vector.shape_cast %358 : vector<1x2x32xf32> to vector<2x32xf32>
    %cst_169 = arith.constant dense<0.000000e+00> : vector<16xf32>
    %360 = vector.multi_reduction <add>, %357, %cst_169 [1] : vector<16x32xf32> to vector<16xf32>
    %361 = vector.shape_cast %360 : vector<16xf32> to vector<16x1xf32>
    %cst_170 = arith.constant 3.200000e+01 : f32
    %362 = vector.broadcast %cst_170 : f32 to vector<16x1xf32>
    %363 = arith.divf %361, %362 : vector<16x1xf32>
    %364 = vector.broadcast %363 : vector<16x1xf32> to vector<16x32xf32>
    %365 = arith.subf %357, %364 : vector<16x32xf32>
    %366 = arith.mulf %365, %365 : vector<16x32xf32>
    %cst_171 = arith.constant dense<0.000000e+00> : vector<16xf32>
    %367 = vector.multi_reduction <add>, %366, %cst_171 [1] : vector<16x32xf32> to vector<16xf32>
    %368 = vector.shape_cast %367 : vector<16xf32> to vector<16x1xf32>
    %cst_172 = arith.constant 3.200000e+01 : f32
    %369 = vector.broadcast %cst_172 : f32 to vector<16x1xf32>
    %370 = arith.divf %368, %369 : vector<16x1xf32>
    %cst_173 = arith.constant 9.99999974E-6 : f32
    %371 = vector.broadcast %cst_173 : f32 to vector<16x1xf32>
    %372 = arith.addf %370, %371 : vector<16x1xf32>
    %373 = math.rsqrt %372 : vector<16x1xf32>
    %374 = vector.broadcast %373 : vector<16x1xf32> to vector<16x32xf32>
    %375 = arith.mulf %365, %374 : vector<16x32xf32>
    %376 = vector.extract_strided_slice %359 {offsets = [0, 0], sizes = [1, 32], strides = [1, 1]} : vector<2x32xf32> to vector<1x32xf32>
    %377 = vector.broadcast %376 : vector<1x32xf32> to vector<16x32xf32>
    %378 = arith.mulf %375, %377 : vector<16x32xf32>
    %379 = vector.extract_strided_slice %359 {offsets = [1, 0], sizes = [1, 32], strides = [1, 1]} : vector<2x32xf32> to vector<1x32xf32>
    %380 = vector.broadcast %379 : vector<1x32xf32> to vector<16x32xf32>
    %381 = arith.addf %378, %380 : vector<16x32xf32>
    %c1_174 = arith.constant 1 : index
    %c0_175 = arith.constant 0 : index
    %c0_176 = arith.constant 0 : index
    %382 = vector.load %arg15[%c1_174, %c0_175, %c0_176] : memref<2x32x2048xf32, #tpu.memory_space<vmem>>, vector<1x32x2048xf32>
    %383 = vector.shape_cast %382 : vector<1x32x2048xf32> to vector<32x2048xf32>
    %cst_177 = arith.constant dense<0.000000e+00> : vector<16x2048xf32>
    %384 = tpu.matmul %381, %383, %cst_177 {dimension_numbers = #tpu.dot_dimension_numbers<[1], [0], [0], [1], [0, 0, 1, 1], [], []>} : vector<16x32xf32>, vector<32x2048xf32>, vector<16x2048xf32> -> vector<16x2048xf32>
    %c1_178 = arith.constant 1 : index
    %c0_179 = arith.constant 0 : index
    %c0_180 = arith.constant 0 : index
    %385 = vector.load %arg16[%c1_178, %c0_179, %c0_180] : memref<2x1x2048xf32, #tpu.memory_space<vmem>>, vector<1x1x2048xf32>
    %386 = vector.shape_cast %385 : vector<1x1x2048xf32> to vector<1x2048xf32>
    %387 = vector.broadcast %386 : vector<1x2048xf32> to vector<16x2048xf32>
    %388 = arith.addf %384, %387 : vector<16x2048xf32>
    %cst_181 = arith.constant 0.000000e+00 : f32
    %389 = vector.broadcast %cst_181 : f32 to vector<16x2048xf32>
    %390 = arith.maximumf %388, %389 : vector<16x2048xf32>
    %c1_182 = arith.constant 1 : index
    %c0_183 = arith.constant 0 : index
    %c0_184 = arith.constant 0 : index
    %391 = vector.load %arg17[%c1_182, %c0_183, %c0_184] : memref<2x2048x32xf32, #tpu.memory_space<vmem>>, vector<1x2048x32xf32>
    %392 = vector.shape_cast %391 : vector<1x2048x32xf32> to vector<2048x32xf32>
    %cst_185 = arith.constant dense<0.000000e+00> : vector<16x32xf32>
    %393 = tpu.matmul %390, %392, %cst_185 {dimension_numbers = #tpu.dot_dimension_numbers<[1], [0], [0], [1], [0, 0, 1, 1], [], []>} : vector<16x2048xf32>, vector<2048x32xf32>, vector<16x32xf32> -> vector<16x32xf32>
    %c1_186 = arith.constant 1 : index
    %c0_187 = arith.constant 0 : index
    %c0_188 = arith.constant 0 : index
    %394 = vector.load %arg18[%c1_186, %c0_187, %c0_188] : memref<2x1x32xf32, #tpu.memory_space<vmem>>, vector<1x1x32xf32>
    %395 = vector.shape_cast %394 : vector<1x1x32xf32> to vector<1x32xf32>
    %396 = vector.broadcast %395 : vector<1x32xf32> to vector<16x32xf32>
    %397 = arith.addf %393, %396 : vector<16x32xf32>
    %398 = arith.addf %381, %397 : vector<16x32xf32>
    %c1_189 = arith.constant 1 : index
    %c0_190 = arith.constant 0 : index
    %c0_191 = arith.constant 0 : index
    %399 = vector.load %arg21[%c1_189, %c0_190, %c0_191] : memref<2x2x32xf32, #tpu.memory_space<vmem>>, vector<1x2x32xf32>
    %400 = vector.shape_cast %399 : vector<1x2x32xf32> to vector<2x32xf32>
    %cst_192 = arith.constant dense<0.000000e+00> : vector<16xf32>
    %401 = vector.multi_reduction <add>, %398, %cst_192 [1] : vector<16x32xf32> to vector<16xf32>
    %402 = vector.shape_cast %401 : vector<16xf32> to vector<16x1xf32>
    %cst_193 = arith.constant 3.200000e+01 : f32
    %403 = vector.broadcast %cst_193 : f32 to vector<16x1xf32>
    %404 = arith.divf %402, %403 : vector<16x1xf32>
    %405 = vector.broadcast %404 : vector<16x1xf32> to vector<16x32xf32>
    %406 = arith.subf %398, %405 : vector<16x32xf32>
    %407 = arith.mulf %406, %406 : vector<16x32xf32>
    %cst_194 = arith.constant dense<0.000000e+00> : vector<16xf32>
    %408 = vector.multi_reduction <add>, %407, %cst_194 [1] : vector<16x32xf32> to vector<16xf32>
    %409 = vector.shape_cast %408 : vector<16xf32> to vector<16x1xf32>
    %cst_195 = arith.constant 3.200000e+01 : f32
    %410 = vector.broadcast %cst_195 : f32 to vector<16x1xf32>
    %411 = arith.divf %409, %410 : vector<16x1xf32>
    %cst_196 = arith.constant 9.99999974E-6 : f32
    %412 = vector.broadcast %cst_196 : f32 to vector<16x1xf32>
    %413 = arith.addf %411, %412 : vector<16x1xf32>
    %414 = math.rsqrt %413 : vector<16x1xf32>
    %415 = vector.broadcast %414 : vector<16x1xf32> to vector<16x32xf32>
    %416 = arith.mulf %406, %415 : vector<16x32xf32>
    %417 = vector.extract_strided_slice %400 {offsets = [0, 0], sizes = [1, 32], strides = [1, 1]} : vector<2x32xf32> to vector<1x32xf32>
    %418 = vector.broadcast %417 : vector<1x32xf32> to vector<16x32xf32>
    %419 = arith.mulf %416, %418 : vector<16x32xf32>
    %420 = vector.extract_strided_slice %400 {offsets = [1, 0], sizes = [1, 32], strides = [1, 1]} : vector<2x32xf32> to vector<1x32xf32>
    %421 = vector.broadcast %420 : vector<1x32xf32> to vector<16x32xf32>
    %422 = arith.addf %419, %421 : vector<16x32xf32>
    %c0_197 = arith.constant 0 : index
    %c0_198 = arith.constant 0 : index
    %423 = vector.load %arg22[%c0_197, %c0_198] : memref<32x64xf32, #tpu.memory_space<vmem>>, vector<32x64xf32>
    %cst_199 = arith.constant dense<0.000000e+00> : vector<16x64xf32>
    %424 = tpu.matmul %422, %423, %cst_199 {dimension_numbers = #tpu.dot_dimension_numbers<[1], [0], [0], [1], [0, 0, 1, 1], [], []>} : vector<16x32xf32>, vector<32x64xf32>, vector<16x64xf32> -> vector<16x64xf32>
    %c0_200 = arith.constant 0 : index
    %c0_201 = arith.constant 0 : index
    %425 = vector.load %arg23[%c0_200, %c0_201] : memref<1x64xf32, #tpu.memory_space<vmem>>, vector<1x64xf32>
    %426 = vector.broadcast %425 : vector<1x64xf32> to vector<16x64xf32>
    %427 = arith.addf %424, %426 : vector<16x64xf32>
    %c0_202 = arith.constant 0 : index
    %c0_203 = arith.constant 0 : index
    %428 = vector.load %arg24[%c0_202, %c0_203] : memref<16x64xf32, #tpu.memory_space<vmem>>, vector<16x64xf32>
    tpu.vector_store %arg24[%c0_202, %c0_203], %427 {strides = array<i32>} : memref<16x64xf32, #tpu.memory_space<vmem>>, vector<16x64xf32>,
    return
  }
}

</mosaic_0001>

<bundles_post_ra>
// kernel: _decoder_transformer_forward.1
= control target key start
LH: loop header
LB: loop body
LE: loop exit
PB: predicated region body
PF: predicated region fallthrough
CT: control target
= control target key end

     0   :  { %s12481_s0 = inlined_call_operand.vmem [shape: s32[16,1], index: 0, kind: input, shape index: {}]   ;;  %s12482_s1 = inlined_call_operand.vmem [shape: f32[2,32], index: 1, kind: input, shape index: {}]   ;;  %s12483_s2 = inlined_call_operand.vmem [shape: f32[64,32], index: 2, kind: input, shape index: {}]   ;;  %s12484_s3 = inlined_call_operand.vmem [shape: f32[8,32], index: 3, kind: input, shape index: {}]   ;;  %s12485_s4 = inlined_call_operand.vmem [shape: f32[16,8], index: 4, kind: input, shape index: {}]   ;;  %s12486_s5 = inlined_call_operand.vmem [shape: f32[16,2], index: 5, kind: input, shape index: {}]   ;;  %s12487_s6 = inlined_call_operand.vmem [shape: f32[16,16], index: 6, kind: input, shape index: {}]   ;;  %s12488_s7 = inlined_call_operand.vmem [shape: f32[2,32,96], index: 7, kind: input, shape index: {}]   ;;  %s12489_s8 = inlined_call_operand.vmem [shape: f32[2,1,96], index: 8, kind: input, shape index: {}]   ;;  %s12490_s9 = inlined_call_operand.vmem [shape: f32[2,32,32], index: 9, kind: input, shape index: {}]   ;;  %s12491_s10 = inlined_call_operand.vmem [shape: f32[2,1,32], index: 10, kind: input, shape index: {}]   ;;  %s12492_s11 = inlined_call_operand.vmem [shape: f32[2,32,32], index: 11, kind: input, shape index: {}]   ;;  %s12493_s12 = inlined_call_operand.vmem [shape: f32[2,1,32], index: 12, kind: input, shape index: {}]   ;;  %s12494_s13 = inlined_call_operand.vmem [shape: f32[2,32,32], index: 13, kind: input, shape index: {}]   ;;  %s12495_s14 = inlined_call_operand.vmem [shape: f32[2,1,32], index: 14, kind: input, shape index: {}]   ;;  %s12496_s15 = inlined_call_operand.vmem [shape: f32[2,32,2048], index: 15, kind: input, shape index: {}]   ;;  %s12497_s16 = inlined_call_operand.vmem [shape: f32[2,1,2048], index: 16, kind: input, shape index: {}]   ;;  %s12498_s17 = inlined_call_operand.vmem [shape: f32[2,2048,32], index: 17, kind: input, shape index: {}]   ;;  %s12499_s18 = inlined_call_operand.vmem [shape: f32[2,1,32], index: 18, kind: input, shape index: {}]   ;;  %s12500_s19 = inlined_call_operand.vmem [shape: f32[2,2,32], index: 19, kind: input, shape index: {}]   ;;  %s12501_s20 = inlined_call_operand.vmem [shape: f32[2,2,32], index: 20, kind: input, shape index: {}]   ;;  %s12502_s21 = inlined_call_operand.vmem [shape: f32[2,2,32], index: 21, kind: input, shape index: {}]   ;;  %s12503_s22 = inlined_call_operand.vmem [shape: f32[32,64], index: 22, kind: input, shape index: {}]   ;;  %s12504_s23 = inlined_call_operand.vmem [shape: f32[1,64], index: 23, kind: input, shape index: {}]   ;;  %s12505_s24 = inlined_call_operand.hbm [shape: f32[16,64], index: 24, kind: output, shape index: {}]  }
   0x1   :  { %12530 = sst [smem:[#allocation5_spill]] %s12481_s0 }
   0x2   :  { %12531 = sst [smem:[#allocation6_spill]] %s12482_s1 }
   0x3   :  { %12532 = sst [smem:[#allocation7_spill]] %s12483_s2 }
   0x4   :  { %12533 = sst [smem:[#allocation8_spill]] %s12484_s3 }
   0x5   :  { %12534 = sst [smem:[#allocation9_spill]] %s12485_s4 }
   0x6   :  { %12535 = sst [smem:[#allocation10_spill]] %s12486_s5 }
   0x7   :  { %12536 = sst [smem:[#allocation11_spill]] %s12487_s6 }
   0x8   :  { %12537 = sst [smem:[#allocation12_spill]] %s12488_s7 }
   0x9   :  { %12538 = sst [smem:[#allocation13_spill]] %s12489_s8 }
   0xa   :  { %12539 = sst [smem:[#allocation14_spill]] %s12499_s18 }
   0xb   :  { %12540 = sst [smem:[#allocation15_spill]] %s12505_s24 }
   0xc   :  { %s12541_s27 = sld [smem:[#allocation5_spill]]  ;;  %s12542_s18 = sld [smem:[#allocation8_spill]]  ;;  %vm105_vm0 = vcmask 64512   ;;  %v9450_v2 = vmov 0  }
   0xd   :  { %9252 = vset.pattern.permute.xlu0 %v9450_v2  ;;  %s12543_s0 = sld [smem:[#allocation9_spill]]  ;;  %s12544_s3 = sld [smem:[#allocation7_spill]] }
  0x12   :  { %v78_v0 = vld [vmem:[%s12541_s27] sm:$0xff]  ;;  %v79_v10 = vld [vmem:[%s12541_s27 + $0x8] sm:$0xff] }
  0x13   :  { %v104_v1 = vld [vmem:[%s12542_s18] sm:$0xff]  ;;  %v95_v5 = vld [vmem:[%s12544_s3 + $0x8] sm:$0xff]  ;;  %83 = vperm.xlu0 %9252, %v78_v0   ;;  %v96_v8 = vld [vmem:[%s12544_s3 + $0x10] sm:$0xff] }
  0x14   :  { %8173 = vmatprep.subr.mxu0 %v104_v1  ;;  %v102_v3 = vld [vmem:[%s12543_s0] sm:$0xff]  ;;  %v103_v7 = vld [vmem:[%s12543_s0 + $0x8] sm:$0xff]  ;;  %v97_v9 = vld [vmem:[%s12544_s3 + $0x18] sm:$0xff] }
  0x15   :  { %v94_v4 = vld [vmem:[%s12544_s3] sm:$0xff]  ;;  %8174 = vmatpush3.msra.mxu0 %v104_v1  ;;  %8175 = vmatprep.mubr.msk.f32.mxu0 %vm105_vm0, %v102_v3  ;;  %v8440_v11 = vpack.c.bf16 %v97_v9, %v96_v8  ;;  %v99_v13 = vld [vmem:[%s12544_s3 + $0x28] sm:$0xff] }
  0x16   :  { %v8436_v6 = vpack.c.bf16 %v95_v5, %v94_v4  ;;  %v98_v12 = vld [vmem:[%s12544_s3 + $0x20] sm:$0xff]  ;;  %8176 = vmatmul.mubr.msk.f32.vlgmr.msra.gmra.mrb[0].mxu0 %vm105_vm0, %v103_v7 }
  0x18   :  { %8437 = vmatprep.subr.bf16.mxu0 %v8436_v6 }
  0x19   :  { %29 = vsyncpa [#allocation3], 0  ;;  %8439 = vmatpush3.bf16.msra.mxu0 %v8436_v6  ;;  %86 = vperm.xlu0 %9252, %v79_v10   ;;  %v8444_v14 = vpack.c.bf16 %v99_v13, %v98_v12  ;;  %v100_v15 = vld [vmem:[%s12544_s3 + $0x30] sm:$0xff]  ;;  %v101_v16 = vld [vmem:[%s12544_s3 + $0x38] sm:$0xff]  ;;  %s12545_s5 = sld [smem:[#allocation12_spill]]  ;;  %v80_v24 = vlaneseq  ;;  %vm187_vm1 = vcmask 523264  }
  0x1a   :  { %8441 = vmatprep.subr.bf16.mxu0 %v8440_v11  ;;  %v8448_v22 = vpack.c.bf16 %v101_v16, %v100_v15  ;;  %v9451_v27 = vmov 0.0   ;;  %vm285_vm4 = vcmask 261120   ;;  %s12546_s30 = sld [smem:[#allocation13_spill]]  ;;  %s12527_s27 = smov 96   ;;  %vm9687_vm5 = vmpackc.low %vm105_vm0, %vm105_vm0  ;;  %vm464_vm6 = vcmask 130048  }
  0x1b   :  { %v81_v25 = vand.u32 127, %v80_v24  ;;  %s12525_s25 = smov 120   ;;  %s12528_s8 = smov 88   ;;  %vm9464_vm7 = vmmov 0   ;;  %vm1721_vm8 = vcmask 15360   ;;  %vm1728_vm9 = vcmask 1041408  }
  0x1c   :  { %s12522_s18 = smov 80   ;;  %s12523_s4 = smov 112  }
  0x1d   :  { %8443 = vmatpush3.bf16.msra.mxu0 %v8440_v11  ;;  %s12549_s28 = sld [smem:[#allocation11_spill]]  ;;  %s12517_s29 = smov 56  }
  0x1e   :  { %8445 = vmatprep.subr.bf16.mxu0 %v8444_v14  ;;  %s12520_s7 = smov 72   ;;  %s12521_s3 = smov 64  }
  0x1f   :  { %v274_v17 = vld [vmem:[%s12545_s5] sm:$0xff]  ;;  %v275_v18 = vld [vmem:[%s12545_s5 + $0x8] sm:$0xff]  ;;  %v276_v19 = vld [vmem:[%s12545_s5 + $0x10] sm:$0xff]  ;;  %s12518_s0 = smov 104   ;;  %s12516_s1 = smov 48  }
  0x20   :  { %v8452_v20 = vpack.c.bf16 %v275_v18, %v274_v17  ;;  %v277_v21 = vld [vmem:[%s12545_s5 + $0x18] sm:$0xff]  ;;  %v6951_v33 = vld [vmem:[%s12546_s30] ss:$0 sm:$0xff]  ;;  %s12515_s26 = smov 40   ;;  %s12551_s6 = sld [smem:[#allocation10_spill]] }
  0x21   :  { %v8456_v23 = vpack.c.bf16 %v277_v21, %v276_v19  ;;  %8447 = vmatpush3.bf16.msra.mxu0 %v8444_v14  ;;  %s12557_s24 = smov 80   ;;  %s12559_s2 = smov 72  }
  0x22   :  { %8453 = vmatprep.subr.bf16.mxu1 %v8452_v20  ;;  %8449 = vmatprep.subr.bf16.mxu0 %v8448_v22 }
  0x23   :  { %8455 = vmatpush3.bf16.msra.mxu1 %v8452_v20  ;;  %v9711_v58 = vld [vmem:[%s12549_s28 + $0x8] sm:$0xff]  ;;  %v9716_v59 = vld [vmem:[%s12549_s28] sm:$0xff] }
  0x24   :  { %8457 = vmatprep.subr.bf16.mxu1 %v8456_v23 }
  0x25   :  { %8451 = vmatpush3.bf16.msra.mxu0 %v8448_v22 }
  0x27   :  { %8459 = vmatpush3.bf16.msra.mxu1 %v8456_v23 }
  0x92   :  { %v84_v26 = vpop.permute.xlu0 %83 }
  0x93   :  { %vm88_vm2 = vcmp.eq.s32.totalorder %v81_v25, %v84_v26 }
  0x94   :  { %v6945_v28 = vsel %vm88_vm2, 1.0, %v9451_v27 }
  0x95   :  { %8194 = vmatprep.mubr.msk.f32.mxu0 %vm187_vm1, %v6945_v28 }
  0x98   :  { %v87_v29 = vpop.permute.xlu0 %86 }
  0x99   :  { %vm89_vm3 = vcmp.eq.s32.totalorder %v81_v25, %v87_v29 }
  0x9a   :  { %v6946_v30 = vsel %vm89_vm3, 1.0, %v9451_v27 }
  0x9b   :  { %8195 = vmatmul.mubr.msk.f32.vlgmr.msra.gmra.mrb[0].mxu0 %vm187_vm1, %v6946_v30 }
 0x16e   :  { %v9651_v31 = vpop.f32.mrb[0].mxu0 }
 0x16f   :  { %v9653_v32 = vpop.f32.mrb[1].mxu0 }
 0x170   :  { %8205 = vmatprep.mubr.msk.f32.mxu1 %vm285_vm4, %v9653_v32 }
 0x171   :  { %8206 = vmatmul.mubr.msk.f32.vlgmr.msra.gmra.mrb[0].mxu1 %vm285_vm4, %v9651_v31 }
 0x244   :  { %v8207_v34 = vpop.f32.mrb[0].mxu1 }
 0x245   :  { %v364_v35 = vadd.f32 %v8207_v34, %v6951_v33  ;;  %v358_v36 = vpop.f32.mrb[1].mxu1 }
 0x246   :  { %v359_v37 = vadd.f32 %v6951_v33, %v358_v36 }
 0x247   :  { %v9676_v40 = vmul.f32 0.35355338, %v364_v35 }
 0x248   :  { %v9662_v38 = vpack.i.bf16 %v364_v35, %v359_v37  ;;  %v9664_v39 = vmul.f32 0.35355338, %v359_v37 }
 0x24a   :  { %9254 = vrot.lane.b32.xlu1 %v9662_v38, %s12527_s27  ;;  %574 = vrot.lane.b32.xlu0 %v9664_v39, %s12525_s25  ;;  %s12552_s27 = sld [smem:[#allocation14_spill]] }
 0x24b   :  { %8212 = vmatprep.mubr.msk.f32.mxu1 %vm105_vm0, %v9664_v39 }
 0x24e   :  { %9259 = vrot.lane.b32.xlu1 %v9662_v38, %s12528_s8  ;;  %9264 = vrot.lane.b32.xlu0 %v9662_v38, %s12522_s18  ;;  %s12554_s8 = smov 96   ;;  %s12562_s18 = smov 48  }
 0x252   :  { %576 = vrot.lane.b32.xlu1 %v9676_v40, %s12525_s25  ;;  %938 = vrot.lane.b32.xlu0 %v9676_v40, %s12523_s4  ;;  %s12553_s25 = smov 88  }
 0x256   :  { %936 = vrot.lane.b32.xlu1 %v9664_v39, %s12523_s4  ;;  %s12556_s4 = smov 112  }
 0x2bc   :  { %v9255_v41 = vpop.permute.xlu1 %9254  ;;  %v575_v42 = vpop.permute.xlu0 %574 }
 0x2bd   :  { %v9257_v43 = vunpack.i.h.bf16 %v9255_v41  ;;  %v9256_v44 = vunpack.i.l.bf16 %v9255_v41  ;;  %8226 = vmatprep.mubr.msk.f32.mxu0 %vm105_vm0, %v575_v42 }
 0x2bf   :  { %v8460_v46 = vpack.c.bf16 %v9257_v43, %v9256_v44 }
 0x2c0   :  { %v9260_v47 = vpop.permute.xlu1 %9259  ;;  %v9265_v48 = vpop.permute.xlu0 %9264 }
 0x2c1   :  { %v9262_v49 = vunpack.i.h.bf16 %v9260_v47  ;;  %v9261_v50 = vunpack.i.l.bf16 %v9260_v47  ;;  %v9267_v51 = vunpack.i.h.bf16 %v9265_v48  ;;  %v9266_v52 = vunpack.i.l.bf16 %v9265_v48  ;;  %8462 = vmatprep.subr.msk.bf16.mxu1 %vm9687_vm5, %v8460_v46 }
 0x2c2   :  { %8465 = vmatpush3.bf16.xpose.msk.msra.mxu1 %vm9687_vm5, %v8460_v46 }
 0x2c3   :  { %v8470_v53 = vpack.c.bf16 %v9262_v49, %v9261_v50  ;;  %v8480_v54 = vpack.c.bf16 %v9267_v51, %v9266_v52 }
 0x2c4   :  { %v577_v55 = vpop.permute.xlu1 %576  ;;  %v939_v57 = vpop.permute.xlu0 %938 }
 0x2c5   :  { %8472 = vmatprep.subr.msk.bf16.mxu0 %vm9687_vm5, %v8470_v53 }
 0x2c6   :  { %8475 = vmatpush3.bf16.xpose.msk.msra.mxu0 %vm9687_vm5, %v8470_v53 }
 0x2c7   :  { %8482 = vmatprep.subr.msk.bf16.mxu0 %vm9687_vm5, %v8480_v54 }
 0x2c8   :  { %v937_v56 = vpop.permute.xlu1 %936 }
 0x2c9   :  { %8213 = vmatmul.mubr.msk.f32.vlgmr.msra.gmra.mrb[2].mxu1 %vm105_vm0, %v9676_v40 }
 0x2cd   :  { %8227 = vmatmul.mubr.msk.f32.vlgmr.msra.gmra.mrb[2].mxu0 %vm105_vm0, %v577_v55 }
 0x2ce   :  { %8485 = vmatpush3.bf16.xpose.msk.msra.mxu0 %vm9687_vm5, %v8480_v54  ;;  %8250 = vmatprep.mubr.msk.f32.mxu0 %vm105_vm0, %v937_v56 }
 0x2d5   :  { %8251 = vmatmul.mubr.msk.f32.vlgmr.msra.gmra.mrb[4].mxu0 %vm105_vm0, %v939_v57 }
 0x39c   :  { %v8214_v60 = vpop.f32.mrb[2].mxu1 }
 0x39d   :  { %v461_v61 = vadd.f32 %v8214_v60, %v9711_v58  ;;  %v455_v62 = vpop.f32.mrb[3].mxu1 }
 0x39e   :  { %v456_v63 = vadd.f32 %v455_v62, %v9716_v59 }
 0x39f   :  { %v468_v0 = vsel %vm464_vm6, %v461_v61, -inf }
 0x3a0   :  { %v8228_v1 = vpop.f32.mrb[2].mxu0  ;;  %469 = vmax.xlane.f32.xlu0 %v468_v0  ;;  %v465_v2 = vsel %vm464_vm6, %v456_v63, -inf }
 0x3a1   :  { %v662_v3 = vadd.f32 %v8228_v1, %v9711_v58  ;;  %v656_v4 = vpop.f32.mrb[3].mxu0  ;;  %466 = vmax.xlane.f32.xlu1 %v465_v2 }
 0x3a2   :  { %v657_v5 = vadd.f32 %v656_v4, %v9716_v59 }
 0x3a3   :  { %v668_v6 = vsel %vm464_vm6, %v662_v3, -inf }
 0x3a4   :  { %v665_v7 = vsel %vm464_vm6, %v657_v5, -inf }
 0x3a5   :  { %666 = vmax.xlane.f32.xlu0 %v665_v7  ;;  %669 = vmax.xlane.f32.xlu1 %v668_v6 }
 0x3a8   :  { %v8252_v8 = vpop.f32.mrb[4].mxu0 }
 0x3a9   :  { %v1018_v9 = vpop.f32.mrb[5].mxu0  ;;  %v1024_v36 = vadd.f32 %v8252_v8, %v9711_v58 }
 0x3aa   :  { %v1019_v34 = vadd.f32 %v1018_v9, %v9716_v59 }
 0x3ab   :  { %v1030_v37 = vsel %vm464_vm6, %v1024_v36, -inf }
 0x3ac   :  { %v1027_v35 = vsel %vm464_vm6, %v1019_v34, -inf }
 0x42d   :  { %v470_v10 = vpop.xlane.xlu0 %469 }
 0x42e   :  { %v472_v11 = vsub.f32 %v461_v61, %v470_v10  ;;  %v467_v12 = vpop.xlane.xlu1 %466 }
 0x42f   :  { %v471_v13 = vsub.f32 %v456_v63, %v467_v12 }
 0x430   :  { %v475_v14 = vmul.f32 1.442695, %v472_v11 }
 0x431   :  { %v473_v15 = vmul.f32 1.442695, %v471_v13  ;;  %v368_v13 = vld [vmem:[%s12490_s9 + $0x8] sm:$0xff] }
 0x432   :  { %9333 = vpow2.f32 %v475_v14  ;;  %v667_v16 = vpop.xlane.xlu0 %666  ;;  %v670_v17 = vpop.xlane.xlu1 %669  ;;  %v367_v14 = vld [vmem:[%s12490_s9] sm:$0xff] }
 0x433   :  { %9335 = vpow2.f32 %v473_v15  ;;  %v671_v18 = vsub.f32 %v657_v5, %v667_v16  ;;  %v672_v19 = vsub.f32 %v662_v3, %v670_v17 }
 0x435   :  { %v673_v20 = vmul.f32 1.442695, %v671_v18  ;;  %v675_v21 = vmul.f32 1.442695, %v672_v19 }
 0x437   :  { %9337 = vpow2.f32 %v673_v20 }
 0x438   :  { %9339 = vpow2.f32 %v675_v21 }
 0x43c   :  { %v9334_v22 = vpop.eup %9333 }
 0x43d   :  { %v9336_v23 = vpop.eup %9335  ;;  %v480_v25 = vsel %vm464_vm6, %v9334_v22, 0.0 }
 0x43e   :  { %481 = vadd.xlane.f32.xlu1 %v480_v25  ;;  %v477_v26 = vsel %vm464_vm6, %v9336_v23, 0.0 }
 0x43f   :  { %478 = vadd.xlane.f32.xlu0 %v477_v26 }
 0x441   :  { %v9338_v28 = vpop.eup %9337 }
 0x442   :  { %v9340_v29 = vpop.eup %9339  ;;  %v677_v30 = vsel %vm464_vm6, %v9338_v28, 0.0 }
 0x443   :  { %678 = vadd.xlane.f32.xlu0 %v677_v30  ;;  %v680_v33 = vsel %vm464_vm6, %v9340_v29, 0.0 }
 0x444   :  { %681 = vadd.xlane.f32.xlu1 %v680_v33 }
 0x455   :  { %9274 = vrot.lane.b32.xlu1 %v9662_v38, %s12517_s29  ;;  %s12563_s29 = smov 40  }
 0x459   :  { %9279 = vrot.lane.b32.xlu1 %v9662_v38, %s12520_s7  ;;  %9269 = vrot.lane.b32.xlu0 %v9662_v38, %s12521_s3 }
 0x45d   :  { %1221 = vrot.lane.b32.xlu1 %v9676_v40, %s12518_s0  ;;  %1219 = vrot.lane.b32.xlu0 %v9664_v39, %s12518_s0  ;;  %s12550_s0 = sld [smem:[#allocation6_spill]] }
 0x47c   :  { %1028 = vmax.xlane.f32.xlu0 %v1027_v35 }
 0x481   :  { %1031 = vmax.xlane.f32.xlu1 %v1030_v37 }
 0x492   :  { %9284 = vrot.lane.b32.xlu1 %v9662_v38, %s12516_s1  ;;  %s12560_s1 = smov 104  }
 0x496   :  { %9289 = vrot.lane.b32.xlu1 %v9662_v38, %s12515_s26 }
 0x4cb   :  { %v482_v40 = vpop.xlane.xlu1 %481 }
 0x4cc   :  { %v479_v39 = vpop.xlane.xlu0 %478 }
 0x4cd   :  { %9341 = vrcp.f32 %v479_v39 }
 0x4ce   :  { %9343 = vrcp.f32 %v482_v40  ;;  %v369_v40 = vld [vmem:[%s12490_s9 + $0x10] sm:$0xff] }
 0x4d0   :  { %v679_v41 = vpop.xlane.xlu0 %678 }
 0x4d1   :  { %9345 = vrcp.f32 %v679_v41  ;;  %v682_v42 = vpop.xlane.xlu1 %681 }
 0x4d2   :  { %9347 = vrcp.f32 %v682_v42 }
 0x4d4   :  { %v9270_v43 = vpop.permute.xlu0 %9269 }
 0x4d5   :  { %v9272_v44 = vunpack.i.h.bf16 %v9270_v43  ;;  %v9271_v46 = vunpack.i.l.bf16 %v9270_v43  ;;  %v9275_v47 = vpop.permute.xlu1 %9274 }
 0x4d6   :  { %v9277_v48 = vunpack.i.h.bf16 %v9275_v47  ;;  %v9276_v49 = vunpack.i.l.bf16 %v9275_v47 }
 0x4d7   :  { %v9342_v50 = vpop.eup %9341  ;;  %v8466_v51 = vpack.c.bf16 %v9272_v44, %v9271_v46 }
 0x4d8   :  { %v9344_v52 = vpop.eup %9343  ;;  %v1220_v53 = vpop.permute.xlu0 %1219  ;;  %v485_v54 = vmul.f32 %v9342_v50, %v9336_v23  ;;  %v8476_v38 = vpack.c.bf16 %v9277_v48, %v9276_v49 }
 0x4d9   :  { %v9280_v55 = vpop.permute.xlu1 %9279  ;;  %8467 = vmatprep.subr.bf16.mxu1 %v8466_v51  ;;  %8269 = vmatprep.mubr.msk.f32.mxu0 %vm105_vm0, %v1220_v53  ;;  %v486_v61 = vmul.f32 %v9344_v52, %v9334_v22 }
 0x4da   :  { %v9282_v56 = vunpack.i.h.bf16 %v9280_v55  ;;  %v9281_v57 = vunpack.i.l.bf16 %v9280_v55  ;;  %8469 = vmatpush3.bf16.msra.mxu1 %v8466_v51  ;;  %8219 = vmatprep.mubr.msk.f32.mxu1 %vm464_vm6, %v485_v54  ;;  %v1553_v54 = vld [vmem:[%s12492_s11] sm:$0xff]  ;;  %v1555_v55 = vld [vmem:[%s12492_s11 + $0x10] sm:$0xff] }
 0x4db   :  { %v9346_v60 = vpop.eup %9345  ;;  %8477 = vmatprep.subr.bf16.mxu1 %v8476_v38 }
 0x4dc   :  { %v9348_v62 = vpop.eup %9347  ;;  %v8490_v63 = vpack.c.bf16 %v9282_v56, %v9281_v57  ;;  %v685_v0 = vmul.f32 %v9346_v60, %v9338_v28  ;;  %v9463_v56 = vmov 0.0|0.0   ;;  %v1556_v60 = vld [vmem:[%s12492_s11 + $0x18] sm:$0xff] }
 0x4dd   :  { %8220 = vmatmul.mubr.msk.f32.vlgmr.msra.gmra.mrb[4].mxu1 %vm464_vm6, %v486_v61  ;;  %v686_v1 = vmul.f32 %v9348_v62, %v9340_v29  ;;  %v1222_v2 = vpop.permute.xlu1 %1221  ;;  %v8504_v61 = vpack.c.bf16 %v1556_v60, %v1555_v55  ;;  %v269_v62 = vld [vmem:[%s12550_s0] sm:$0x3] }
 0x4de   :  { %8492 = vmatprep.subr.msk.bf16.mxu0 %vm9687_vm5, %v8490_v63  ;;  %8479 = vmatpush3.bf16.msra.mxu1 %v8476_v38  ;;  %v1554_v38 = vld [vmem:[%s12492_s11 + $0x8] sm:$0xff] }
 0x4df   :  { %8233 = vmatprep.mubr.msk.f32.mxu1 %vm464_vm6, %v685_v0  ;;  %8495 = vmatpush3.bf16.xpose.msk.msra.mxu0 %vm9687_vm5, %v8490_v63  ;;  %v8501_v57 = vpack.c.bf16 %v1554_v38, %v1553_v54  ;;  %v9855_v54 = vshrl.u32 %v80_v24, 7 }
 0x4e0   :  { %8236 = vmatprep.subr.mxu1 %v368_v13  ;;  %8500 = vmatprep.subr.bf16.mxu0 %v9463_v56 }
 0x4e1   :  { %8234 = vmatmul.mubr.msk.f32.vlgmr.msra.gmra.mrb[6].mxu1 %vm464_vm6, %v686_v1  ;;  %v370_v1 = vld [vmem:[%s12490_s9 + $0x18] sm:$0xff]  ;;  %v9858_v55 = vsub.s32 0, %v9855_v54  ;;  %v9864_v60 = vsub.s32 1, %v9855_v54 }
 0x4e2   :  { %8237 = vmatpush3.msra.mxu1 %v368_v13 }
 0x4e3   :  { %8241 = vmatprep.subr.mxu1 %v367_v14 }
 0x4e6   :  { %8270 = vmatmul.mubr.msk.f32.vlgmr.msra.gmra.mrb[6].mxu0 %vm105_vm0, %v1222_v2 }
 0x4e7   :  { %8292 = vmatprep.mubr.msk.f32.mxu0 %vm9464_vm7, %v9451_v27  ;;  %8502 = vmatpush3.bf16.msra.mxu0 %v8501_v57  ;;  %v1513_v57 = vld [vmem:[%s12500_s19] sm:$0x3] }
 0x4e8   :  { %8503 = vmatprep.subr.bf16.mxu0 %v9463_v56 }
 0x4eb   :  { %8505 = vmatpush3.bf16.msra.mxu0 %v8504_v61  ;;  %v1544_v61 = vrot.slane %v1513_v57, %v9858_v55 }
 0x4ee   :  { %8293 = vmatmul.mubr.msk.f32.vlgmr.msra.gmra.mrb[8].mxu0 %vm285_vm4, %v269_v62 }
 0x509   :  { %v1029_v3 = vpop.xlane.xlu0 %1028 }
 0x50a   :  { %v1033_v4 = vsub.f32 %v1019_v34, %v1029_v3 }
 0x50c   :  { %v1035_v5 = vmul.f32 1.442695, %v1033_v4 }
 0x50e   :  { %9349 = vpow2.f32 %v1035_v5  ;;  %v1032_v6 = vpop.xlane.xlu1 %1031 }
 0x50f   :  { %v1034_v7 = vsub.f32 %v1024_v36, %v1032_v6 }
 0x511   :  { %v1037_v8 = vmul.f32 1.442695, %v1034_v7 }
 0x512   :  { %v9285_v16 = vpop.permute.xlu1 %9284 }
 0x513   :  { %9351 = vpow2.f32 %v1037_v8  ;;  %v9287_v20 = vunpack.i.h.bf16 %v9285_v16  ;;  %v9286_v21 = vunpack.i.l.bf16 %v9285_v16  ;;  %v1640_v16 = vld [vmem:[%s12494_s13 + $0x18] sm:$0xff] }
 0x515   :  { %v8486_v25 = vpack.c.bf16 %v9287_v20, %v9286_v21  ;;  %v272_v20 = vld [vmem:[%s12551_s6] sm:$0xff] }
 0x516   :  { %v9290_v33 = vpop.permute.xlu1 %9289  ;;  %8308 = vmatprep.mubr.msk.f32.mxu0 %vm1721_vm8, %v272_v20  ;;  %v6986_v21 = vld [vmem:[%s12491_s10] ss:$0 sm:$0xff]  ;;  %v1849_v20 = vld [vmem:[%s12496_s15 + $0x8] sm:$0xff] }
 0x517   :  { %v9292_v39 = vunpack.i.h.bf16 %v9290_v33  ;;  %v9291_v41 = vunpack.i.l.bf16 %v9290_v33 }
 0x518   :  { %v9350_v9 = vpop.eup %9349 }
 0x519   :  { %v1039_v10 = vsel %vm464_vm6, %v9350_v9, 0.0 }
 0x51a   :  { %1040 = vadd.xlane.f32.xlu0 %v1039_v10  ;;  %v1637_v10 = vld [vmem:[%s12494_s13] sm:$0xff] }
 0x51d   :  { %v9352_v11 = vpop.eup %9351 }
 0x51e   :  { %v1042_v12 = vsel %vm464_vm6, %v9352_v11, 0.0 }
 0x51f   :  { %1043 = vadd.xlane.f32.xlu0 %v1042_v12 }
 0x5a7   :  { %v1041_v15 = vpop.xlane.xlu0 %1040 }
 0x5a8   :  { %9353 = vrcp.f32 %v1041_v15  ;;  %v1639_v15 = vld [vmem:[%s12494_s13 + $0x10] sm:$0xff] }
 0x5ac   :  { %v1044_v18 = vpop.xlane.xlu0 %1043 }
 0x5ad   :  { %9355 = vrcp.f32 %v1044_v18  ;;  %v8510_v18 = vpack.c.bf16 %v1640_v16, %v1639_v15 }
 0x5b0   :  { %v8221_v17 = vpop.f32.mrb[4].mxu1 }
 0x5b1   :  { %v565_v19 = vpop.f32.mrb[5].mxu1 }
 0x5b2   :  { %v9354_v29 = vpop.eup %9353 }
 0x5b3   :  { %v1047_v37 = vmul.f32 %v9354_v29, %v9350_v9 }
 0x5b4   :  { %v8235_v22 = vpop.f32.mrb[6].mxu1 }
 0x5b5   :  { %v765_v23 = vpop.f32.mrb[7].mxu1 }
 0x5b6   :  { %8238 = vmatprep.mubr.msk.f32.mxu1 %vm105_vm0, %v765_v23 }
 0x5b7   :  { %8239 = vmatmul.mubr.msk.f32.vlgmr.msra.gmra.mrb[8].mxu1 %vm105_vm0, %v8235_v22  ;;  %v9356_v36 = vpop.eup %9355 }
 0x5b8   :  { %8242 = vmatpush3.msra.mxu1 %v367_v14  ;;  %8243 = vmatprep.mubr.msk.f32.mxu1 %vm105_vm0, %v565_v19 }
 0x5b9   :  { %8487 = vmatprep.subr.bf16.mxu1 %v8486_v25  ;;  %v8271_v26 = vpop.f32.mrb[6].mxu0 }
 0x5ba   :  { %v1301_v28 = vpop.f32.mrb[7].mxu0  ;;  %v1307_v34 = vadd.f32 %v8271_v26, %v9711_v58  ;;  %v8496_v58 = vpack.c.bf16 %v9292_v39, %v9291_v41 }
 0x5bb   :  { %v1302_v30 = vadd.f32 %v1301_v28, %v9716_v59  ;;  %v1048_v59 = vmul.f32 %v9356_v36, %v9352_v11  ;;  %v1638_v11 = vld [vmem:[%s12494_s13 + $0x8] sm:$0xff] }
 0x5bc   :  { %v1313_v42 = vsel %vm464_vm6, %v1307_v34, -inf  ;;  %v8507_v13 = vpack.c.bf16 %v1638_v11, %v1637_v10 }
 0x5bd   :  { %v1310_v35 = vsel %vm464_vm6, %v1302_v30, -inf }
 0x5be   :  { %1311 = vmax.xlane.f32.xlu0 %v1310_v35 }
 0x5bf   :  { %8244 = vmatmul.mubr.msk.f32.vlgmr.msra.gmra.mrb[8].mxu1 %vm105_vm0, %v8221_v17  ;;  %v6987_v17 = vld [vmem:[%s12493_s12] ss:$0 sm:$0xff] }
 0x5c0   :  { %8489 = vmatpush3.bf16.msra.mxu1 %v8486_v25  ;;  %8257 = vmatprep.mubr.msk.f32.mxu1 %vm464_vm6, %v1047_v37 }
 0x5c1   :  { %8260 = vmatprep.subr.mxu1 %v369_v40  ;;  %v1633_v8 = vpop.f32.mrb[8].mxu0 }
 0x5c2   :  { %1314 = vmax.xlane.f32.xlu0 %v1313_v42  ;;  %v8294_v9 = vpop.f32.mrb[9].mxu0  ;;  %v1634_v19 = vadd.f32 %v6987_v17, %v1633_v8 }
 0x5c3   :  { %8258 = vmatmul.mubr.msk.f32.vlgmr.msra.gmra.mrb[10].mxu1 %vm464_vm6, %v1048_v59 }
 0x5c4   :  { %8261 = vmatpush3.msra.mxu1 %v369_v40 }
 0x5c5   :  { %8497 = vmatprep.subr.bf16.mxu1 %v8496_v58 }
 0x64b   :  { %v1312_v43 = vpop.xlane.xlu0 %1311 }
 0x64c   :  { %v1316_v44 = vsub.f32 %v1302_v30, %v1312_v43 }
 0x64e   :  { %v1318_v46 = vmul.f32 1.442695, %v1316_v44 }
 0x64f   :  { %v1315_v47 = vpop.xlane.xlu0 %1314 }
 0x650   :  { %9357 = vpow2.f32 %v1318_v46  ;;  %v1317_v48 = vsub.f32 %v1307_v34, %v1315_v47  ;;  %v6989_v34 = vld [vmem:[%s12495_s14] ss:$0 sm:$0xff] }
 0x652   :  { %v1320_v49 = vmul.f32 1.442695, %v1317_v48 }
 0x654   :  { %9359 = vpow2.f32 %v1320_v49 }
 0x65a   :  { %v9358_v50 = vpop.eup %9357 }
 0x65b   :  { %v1322_v51 = vsel %vm464_vm6, %v9358_v50, 0.0 }
 0x65c   :  { %1323 = vadd.xlane.f32.xlu0 %v1322_v51 }
 0x65e   :  { %v9360_v52 = vpop.eup %9359 }
 0x65f   :  { %v1325_v53 = vsel %vm464_vm6, %v9360_v52, 0.0 }
 0x660   :  { %1326 = vadd.xlane.f32.xlu0 %v1325_v53 }
 0x696   :  { %v8259_v63 = vpop.f32.mrb[10].mxu1 }
 0x697   :  { %v1127_v0 = vpop.f32.mrb[11].mxu1 }
 0x698   :  { %8262 = vmatprep.mubr.msk.f32.mxu1 %vm105_vm0, %v1127_v0 }
 0x699   :  { %8263 = vmatmul.mubr.msk.f32.vlgmr.msra.gmra.mrb[8].mxu1 %vm105_vm0, %v8259_v63  ;;  %v1550_v63 = vrot.slane %v1513_v57, %v9864_v60 }
 0x69a   :  { %8499 = vmatpush3.bf16.msra.mxu1 %v8496_v58 }
 0x69b   :  { %8279 = vmatprep.subr.mxu1 %v370_v1 }
 0x6e9   :  { %v1324_v2 = vpop.xlane.xlu0 %1323 }
 0x6ea   :  { %9361 = vrcp.f32 %v1324_v2 }
 0x6ed   :  { %v1327_v3 = vpop.xlane.xlu0 %1326 }
 0x6ee   :  { %9363 = vrcp.f32 %v1327_v3 }
 0x6f4   :  { %v9362_v4 = vpop.eup %9361 }
 0x6f5   :  { %v1330_v5 = vmul.f32 %v9362_v4, %v9358_v50 }
 0x6f7   :  { %8276 = vmatprep.mubr.msk.f32.mxu1 %vm464_vm6, %v1330_v5 }
 0x6f8   :  { %v9364_v6 = vpop.eup %9363 }
 0x6f9   :  { %v1331_v7 = vmul.f32 %v9364_v6, %v9360_v52 }
 0x6fb   :  { %8277 = vmatmul.mubr.msk.f32.vlgmr.msra.gmra.mrb[12].mxu1 %vm464_vm6, %v1331_v7 }
 0x6fc   :  { %8280 = vmatpush3.msra.mxu1 %v370_v1 }
 0x6fd   :  { %8506 = vmatprep.subr.bf16.mxu1 %v9463_v56 }
 0x7ce   :  { %v8278_v12 = vpop.f32.mrb[12].mxu1 }
 0x7cf   :  { %v1410_v14 = vpop.f32.mrb[13].mxu1 }
 0x7d0   :  { %8281 = vmatprep.mubr.msk.f32.mxu1 %vm105_vm0, %v1410_v14 }
 0x7d1   :  { %8282 = vmatmul.mubr.msk.f32.vlgmr.msra.gmra.mrb[8].mxu1 %vm105_vm0, %v8278_v12 }
 0x7d2   :  { %8508 = vmatpush3.bf16.msra.mxu1 %v8507_v13  ;;  %8303 = vmatprep.mubr.msk.f32.mxu1 %vm9464_vm7, %v9451_v27 }
 0x7d3   :  { %8509 = vmatprep.subr.bf16.mxu1 %v9463_v56 }
 0x7d6   :  { %8511 = vmatpush3.bf16.msra.mxu1 %v8510_v18 }
 0x7d9   :  { %8304 = vmatmul.mubr.msk.f32.vlgmr.msra.gmra.mrb[14].mxu1 %vm285_vm4, %v1634_v19 }
 0x7da   :  { %2143 = vmatprep.mubr.f32.mxu1 %v9451_v27 }
 0x8a4   :  { %v8283_v22 = vpop.f32.mrb[8].mxu1 }
 0x8a5   :  { %v1510_v23 = vadd.f32 %v8283_v22, %v6986_v21  ;;  %v1491_v25 = vpop.f32.mrb[9].mxu1  ;;  %v1851_v22 = vld [vmem:[%s12496_s15 + $0x18] sm:$0xff] }
 0x8a6   :  { %v1509_v26 = vadd.f32 %v6986_v21, %v1491_v25  ;;  %v1865_v21 = vld [vmem:[%s12496_s15 + $0x88] sm:$0xff]  ;;  %v1867_v25 = vld [vmem:[%s12496_s15 + $0x98] sm:$0xff] }
 0x8a7   :  { %v1512_v28 = vadd.f32 %v9651_v31, %v1510_v23  ;;  %v273_v31 = vld [vmem:[%s12551_s6 + $0x8] sm:$0xff]  ;;  %v8512_v23 = vpack.c.bf16 %v1865_v21, %v1849_v20  ;;  %v1886_v20 = vld [vmem:[%s12496_s15 + $0x130] sm:$0xff] }
 0x8a8   :  { %v1511_v29 = vadd.f32 %v1509_v26, %v9653_v32  ;;  %v1848_v26 = vld [vmem:[%s12496_s15] sm:$0xff]  ;;  %v1902_v21 = vld [vmem:[%s12496_s15 + $0x1b0] sm:$0xff] }
 0x8a9   :  { %v1517_v30 = vsel %vm285_vm4, %v1512_v28, 0.0 }
 0x8aa   :  { %1518 = vadd.xlane.f32.xlu1 %v1517_v30  ;;  %v1514_v33 = vsel %vm285_vm4, %v1511_v29, 0.0 }
 0x8ab   :  { %1515 = vadd.xlane.f32.xlu0 %v1514_v33  ;;  %v1850_v33 = vld [vmem:[%s12496_s15 + $0x10] sm:$0xff] }
 0x8ac   :  { %v1717_v35 = vpop.f32.mrb[14].mxu1 }
 0x8ad   :  { %v1718_v36 = vadd.f32 %v6989_v34, %v1717_v35  ;;  %v8305_v37 = vpop.f32.mrb[15].mxu1  ;;  %v1866_v34 = vld [vmem:[%s12496_s15 + $0x90] sm:$0xff] }
 0x8ae   :  { %v8522_v35 = vpack.c.bf16 %v1866_v34, %v1850_v33  ;;  %v1897_v37 = vld [vmem:[%s12496_s15 + $0x188] sm:$0xff]  ;;  %v8542_v33 = vpack.c.bf16 %v1902_v21, %v1886_v20  ;;  %v1856_v34 = vld [vmem:[%s12496_s15 + $0x40] sm:$0xff] }
 0x8af   :  { %8306 = vmatprep.subr.msk.mxu0 %vm1728_vm9, %v1718_v36  ;;  %v2699_v20 = vld [vmem:[%s12498_s17 + $0x188] sm:$0xff] }
 0x8b0   :  { %8307 = vmatpush3.msk.msra.mxu0 %vm1728_vm9, %v1718_v36  ;;  %v1881_v36 = vld [vmem:[%s12496_s15 + $0x108] sm:$0xff] }
 0x8b1   :  { %8309 = vmatmul.mubr.msk.f32.vlgmr.msra.gmra.mrb[10].mxu0 %vm1721_vm8, %v273_v31  ;;  %8513 = vmatprep.subr.bf16.mxu0 %v8512_v23  ;;  %v1883_v31 = vld [vmem:[%s12496_s15 + $0x118] sm:$0xff] }
 0x8b2   :  { %2066 = vmatprep.mubr.f32.mxu0 %v9451_v27 }
 0x937   :  { %v1519_v32 = vpop.xlane.xlu1 %1518 }
 0x938   :  { %v1522_v40 = vmul.f32 0.03125, %v1519_v32  ;;  %v1516_v39 = vpop.xlane.xlu0 %1515  ;;  %v8516_v32 = vpack.c.bf16 %v1897_v37, %v1881_v36  ;;  %v1872_v36 = vld [vmem:[%s12496_s15 + $0xc0] sm:$0xff]  ;;  %v1858_v37 = vld [vmem:[%s12496_s15 + $0x50] sm:$0xff] }
 0x939   :  { %v1521_v41 = vmul.f32 0.03125, %v1516_v39  ;;  %v1880_v39 = vld [vmem:[%s12496_s15 + $0x100] sm:$0xff] }
 0x93a   :  { %v1524_v59 = vsub.f32 %v1512_v28, %v1522_v40  ;;  %v1864_v28 = vld [vmem:[%s12496_s15 + $0x80] sm:$0xff]  ;;  %v1899_v40 = vld [vmem:[%s12496_s15 + $0x198] sm:$0xff] }
 0x93b   :  { %v1523_v42 = vsub.f32 %v1511_v29, %v1521_v41  ;;  %v8520_v29 = vpack.c.bf16 %v1867_v25, %v1851_v22  ;;  %v8514_v30 = vpack.c.bf16 %v1864_v28, %v1848_v26  ;;  %v1896_v41 = vld [vmem:[%s12496_s15 + $0x180] sm:$0xff]  ;;  %v1857_v25 = vld [vmem:[%s12496_s15 + $0x48] sm:$0xff]  ;;  %v1859_v28 = vld [vmem:[%s12496_s15 + $0x58] sm:$0xff] }
 0x93c   :  { %v1526_v44 = vmul.f32 %v1524_v59, %v1524_v59 }
 0x93d   :  { %v1525_v58 = vmul.f32 %v1523_v42, %v1523_v42  ;;  %8521 = vmatprep.subr.bf16.mxu1 %v8520_v29  ;;  %8515 = vmatpush1.bf16.msra.mxu0 %v8514_v30  ;;  %v1875_v29 = vld [vmem:[%s12496_s15 + $0xd8] sm:$0xff] }
 0x93e   :  { %v1530_v46 = vsel %vm285_vm4, %v1526_v44, 0.0  ;;  %8523 = vmatpush1.bf16.msra.mxu1 %v8522_v35  ;;  %8517 = vmatprep.subr.bf16.mxu0 %v8516_v32 }
 0x93f   :  { %v1527_v43 = vsel %vm285_vm4, %v1525_v58, 0.0  ;;  %v1882_v58 = vld [vmem:[%s12496_s15 + $0x110] sm:$0xff] }
 0x940   :  { %1528 = vadd.xlane.f32.xlu0 %v1527_v43  ;;  %v1898_v43 = vld [vmem:[%s12496_s15 + $0x190] sm:$0xff] }
 0x941   :  { %v8526_v44 = vpack.c.bf16 %v1898_v43, %v1882_v58  ;;  %v8546_v58 = vpack.c.bf16 %v1872_v36, %v1856_v34  ;;  %v2700_v34 = vld [vmem:[%s12498_s17 + $0x190] sm:$0xff]  ;;  %v2701_v36 = vld [vmem:[%s12498_s17 + $0x198] sm:$0xff] }
 0x944   :  { %1531 = vadd.xlane.f32.xlu0 %v1530_v46  ;;  %v1853_v46 = vld [vmem:[%s12496_s15 + $0x28] sm:$0xff] }
 0x984   :  { %v8310_v47 = vpop.f32.mrb[10].mxu0 }
 0x985   :  { %v1798_v48 = vpop.f32.mrb[11].mxu0 }
 0x9cd   :  { %v1529_v49 = vpop.xlane.xlu0 %1528 }
 0x9ce   :  { %v1533_v50 = vmul.f32 0.03125, %v1529_v49 }
 0x9d0   :  { %v1535_v51 = vadd.f32 1e-05, %v1533_v50  ;;  %v1871_v50 = vld [vmem:[%s12496_s15 + $0xb8] sm:$0xff] }
 0x9d1   :  { %v1532_v52 = vpop.xlane.xlu0 %1531 }
 0x9d2   :  { %9365 = vrsqrt.f32 %v1535_v51  ;;  %v1534_v53 = vmul.f32 0.03125, %v1532_v52 }
 0x9d4   :  { %v1536_v38 = vadd.f32 1e-05, %v1534_v53 }
 0x9d6   :  { %9367 = vrsqrt.f32 %v1536_v38 }
 0x9dc   :  { %v9366_v62 = vpop.eup %9365 }
 0x9dd   :  { %v1539_v0 = vmul.f32 %v9366_v62, %v1523_v42  ;;  %v8518_v42 = vpack.c.bf16 %v1896_v41, %v1880_v39  ;;  %v1889_v39 = vld [vmem:[%s12496_s15 + $0x148] sm:$0xff] }
 0x9de   :  { %v1905_v41 = vld [vmem:[%s12496_s15 + $0x1c8] sm:$0xff] }
 0x9df   :  { %v1545_v24 = vmul.f32 %v1544_v61, %v1539_v0  ;;  %8519 = vmatpush1.bf16.msra.mxu0 %v8518_v42  ;;  %v1907_v42 = vld [vmem:[%s12496_s15 + $0x1d8] sm:$0xff] }
 0x9e0   :  { %v9368_v1 = vpop.eup %9367 }
 0x9e1   :  { %v1540_v2 = vmul.f32 %v9368_v1, %v1524_v59  ;;  %v1551_v3 = vadd.f32 %v1550_v63, %v1545_v24  ;;  %v8524_v59 = vpack.c.bf16 %v1899_v40, %v1883_v31  ;;  %v1852_v1 = vld [vmem:[%s12496_s15 + $0x20] sm:$0xff]  ;;  %v1874_v31 = vld [vmem:[%s12496_s15 + $0xd0] sm:$0xff]  ;;  %v8552_v40 = vpack.c.bf16 %v1875_v29, %v1859_v28  ;;  %v2683_v29 = vld [vmem:[%s12498_s17 + $0x108] sm:$0xff] }
 0x9e2   :  { %v8554_v43 = vpack.c.bf16 %v1874_v31, %v1858_v37  ;;  %v2682_v28 = vld [vmem:[%s12498_s17 + $0x100] sm:$0xff] }
 0x9e3   :  { %v1546_v4 = vmul.f32 %v1544_v61, %v1540_v2  ;;  %v1807_v5 = vadd.f32 %v1798_v48, %v1551_v3  ;;  %8525 = vmatprep.subr.bf16.mxu1 %v8524_v59  ;;  %v1855_v48 = vld [vmem:[%s12496_s15 + $0x38] sm:$0xff]  ;;  %v8610_v31 = vpack.c.bf16 %v2683_v29, %v2682_v28  ;;  %v2660_v28 = vld [vmem:[%s12498_s17 + $0x50] sm:$0xff] }
 0x9e4   :  { %8527 = vmatpush1.bf16.msra.mxu1 %v8526_v44  ;;  %v8536_v51 = vpack.c.bf16 %v1871_v50, %v1855_v48  ;;  %v1891_v59 = vld [vmem:[%s12496_s15 + $0x158] sm:$0xff]  ;;  %v1888_v44 = vld [vmem:[%s12496_s15 + $0x140] sm:$0xff]  ;;  %v1906_v48 = vld [vmem:[%s12496_s15 + $0x1d0] sm:$0xff] }
 0x9e5   :  { %v1552_v6 = vadd.f32 %v1550_v63, %v1546_v4  ;;  %v1810_v7 = vsel %vm285_vm4, %v1807_v5, 0.0  ;;  %v1809_v63 = vld [vmem:[%s12501_s20] sm:$0x3]  ;;  %v8556_v50 = vpack.c.bf16 %v1907_v42, %v1891_v59  ;;  %v2684_v59 = vld [vmem:[%s12498_s17 + $0x110] sm:$0xff]  ;;  %v2685_v42 = vld [vmem:[%s12498_s17 + $0x118] sm:$0xff] }
 0x9e6   :  { %1811 = vadd.xlane.f32.xlu0 %v1810_v7  ;;  %8537 = vmatprep.subr.bf16.mxu1 %v8536_v51  ;;  %v1839_v0 = vrot.slane %v1809_v63, %v9858_v55  ;;  %v1845_v2 = vrot.slane %v1809_v63, %v9864_v60  ;;  %v1868_v4 = vld [vmem:[%s12496_s15 + $0xa0] sm:$0xff]  ;;  %v1885_v7 = vld [vmem:[%s12496_s15 + $0x128] sm:$0xff]  ;;  %v2661_v29 = vld [vmem:[%s12498_s17 + $0x58] sm:$0xff] }
 0x9e7   :  { %v1808_v8 = vadd.f32 %v8310_v47, %v1552_v6  ;;  %v1869_v47 = vld [vmem:[%s12496_s15 + $0xa8] sm:$0xff]  ;;  %v1870_v6 = vld [vmem:[%s12496_s15 + $0xb0] sm:$0xff]  ;;  %v1876_v63 = vld [vmem:[%s12496_s15 + $0xe0] sm:$0xff] }
 0x9e8   :  { %v8528_v49 = vpack.c.bf16 %v1869_v47, %v1853_v46  ;;  %v1904_v46 = vld [vmem:[%s12496_s15 + $0x1c0] sm:$0xff]  ;;  %v1890_v47 = vld [vmem:[%s12496_s15 + $0x150] sm:$0xff]  ;;  %v1861_v51 = vld [vmem:[%s12496_s15 + $0x68] sm:$0xff] }
 0x9e9   :  { %v1813_v9 = vsel %vm285_vm4, %v1808_v8, 0.0 }
 0x9ea   :  { %1814 = vadd.xlane.f32.xlu0 %v1813_v9  ;;  %8529 = vmatprep.subr.bf16.mxu0 %v8528_v49  ;;  %v1901_v9 = vld [vmem:[%s12496_s15 + $0x1a8] sm:$0xff]  ;;  %v8548_v49 = vpack.c.bf16 %v1905_v41, %v1889_v39  ;;  %v8612_v41 = vpack.c.bf16 %v2701_v36, %v2700_v34  ;;  %v2692_v34 = vld [vmem:[%s12498_s17 + $0x150] sm:$0xff]  ;;  %v2693_v36 = vld [vmem:[%s12498_s17 + $0x158] sm:$0xff] }
 0x9eb   :  { %v8532_v22 = vpack.c.bf16 %v1901_v9, %v1885_v7  ;;  %v1892_v9 = vld [vmem:[%s12496_s15 + $0x160] sm:$0xff] }
 0xa73   :  { %v1812_v10 = vpop.xlane.xlu0 %1811 }
 0xa74   :  { %v1816_v11 = vmul.f32 0.03125, %v1812_v10  ;;  %v1887_v10 = vld [vmem:[%s12496_s15 + $0x138] sm:$0xff] }
 0xa76   :  { %v9870_v12 = vsub.f32 %v1807_v5, %v1816_v11  ;;  %v1854_v5 = vld [vmem:[%s12496_s15 + $0x30] sm:$0xff]  ;;  %v1903_v11 = vld [vmem:[%s12496_s15 + $0x1b8] sm:$0xff] }
 0xa77   :  { %v1815_v13 = vpop.xlane.xlu0 %1814  ;;  %v8540_v23 = vpack.c.bf16 %v1903_v11, %v1887_v10  ;;  %v1908_v10 = vld [vmem:[%s12496_s15 + $0x1e0] sm:$0xff]  ;;  %v1894_v11 = vld [vmem:[%s12496_s15 + $0x170] sm:$0xff] }
 0xa78   :  { %v1817_v14 = vmul.f32 0.03125, %v1815_v13  ;;  %v1820_v15 = vmul.f32 %v9870_v12, %v9870_v12  ;;  %v8530_v13 = vpack.c.bf16 %v1868_v4, %v1852_v1  ;;  %v1909_v4 = vld [vmem:[%s12496_s15 + $0x1e8] sm:$0xff]  ;;  %v8566_v21 = vpack.c.bf16 %v1908_v10, %v1892_v9  ;;  %v2706_v9 = vld [vmem:[%s12498_s17 + $0x1c0] sm:$0xff] }
 0xa79   :  { %v2707_v10 = vld [vmem:[%s12498_s17 + $0x1c8] sm:$0xff] }
 0xa7a   :  { %v9874_v16 = vsub.f32 %v1808_v8, %v1817_v14  ;;  %v1822_v17 = vsel %vm285_vm4, %v1820_v15, 0.0  ;;  %v8538_v14 = vpack.c.bf16 %v1870_v6, %v1854_v5  ;;  %v1884_v15 = vld [vmem:[%s12496_s15 + $0x120] sm:$0xff]  ;;  %v1895_v5 = vld [vmem:[%s12496_s15 + $0x178] sm:$0xff] }
 0xa7b   :  { %1823 = vadd.xlane.f32.xlu0 %v1822_v17  ;;  %v1911_v6 = vld [vmem:[%s12496_s15 + $0x1f8] sm:$0xff] }
 0xa7c   :  { %v1821_v18 = vmul.f32 %v9874_v16, %v9874_v16 }
 0xa7e   :  { %v1825_v19 = vsel %vm285_vm4, %v1821_v18, 0.0 }
 0xa7f   :  { %1826 = vadd.xlane.f32.xlu0 %v1825_v19  ;;  %v1900_v19 = vld [vmem:[%s12496_s15 + $0x1a0] sm:$0xff] }
 0xa80   :  { %v8534_v30 = vpack.c.bf16 %v1900_v19, %v1884_v15  ;;  %v2666_v15 = vld [vmem:[%s12498_s17 + $0x80] sm:$0xff] }
 0xa81   :  { %v2698_v19 = vld [vmem:[%s12498_s17 + $0x180] sm:$0xff] }
 0xb08   :  { %v1824_v52 = vpop.xlane.xlu0 %1823 }
 0xb09   :  { %v1828_v53 = vmul.f32 0.03125, %v1824_v52  ;;  %v1877_v52 = vld [vmem:[%s12496_s15 + $0xe8] sm:$0xff] }
 0xb0a   :  { %v8560_v1 = vpack.c.bf16 %v1877_v52, %v1861_v51 }
 0xb0b   :  { %v1830_v38 = vadd.f32 1e-05, %v1828_v53  ;;  %v1863_v53 = vld [vmem:[%s12496_s15 + $0x78] sm:$0xff] }
 0xb0c   :  { %v1827_v57 = vpop.xlane.xlu0 %1826 }
 0xb0d   :  { %9369 = vrsqrt.f32 %v1830_v38  ;;  %v1829_v61 = vmul.f32 0.03125, %v1827_v57  ;;  %v1879_v38 = vld [vmem:[%s12496_s15 + $0xf8] sm:$0xff]  ;;  %v8550_v57 = vpack.c.bf16 %v1904_v46, %v1888_v44  ;;  %v2702_v44 = vld [vmem:[%s12498_s17 + $0x1a0] sm:$0xff]  ;;  %v2703_v46 = vld [vmem:[%s12498_s17 + $0x1a8] sm:$0xff] }
 0xb0e   :  { %v8616_v52 = vpack.c.bf16 %v2703_v46, %v2702_v44  ;;  %v2694_v44 = vld [vmem:[%s12498_s17 + $0x160] sm:$0xff]  ;;  %v2695_v46 = vld [vmem:[%s12498_s17 + $0x168] sm:$0xff] }
 0xb0f   :  { %v1831_v62 = vadd.f32 1e-05, %v1829_v61  ;;  %v8558_v61 = vpack.c.bf16 %v1906_v48, %v1890_v47  ;;  %v8614_v48 = vpack.c.bf16 %v2685_v42, %v2684_v59  ;;  %v2662_v59 = vld [vmem:[%s12498_s17 + $0x60] sm:$0xff] }
 0xb11   :  { %9371 = vrsqrt.f32 %v1831_v62  ;;  %v1860_v62 = vld [vmem:[%s12496_s15 + $0x60] sm:$0xff] }
 0xb12   :  { %v8562_v7 = vpack.c.bf16 %v1876_v63, %v1860_v62  ;;  %v2704_v62 = vld [vmem:[%s12498_s17 + $0x1b0] sm:$0xff]  ;;  %v2705_v63 = vld [vmem:[%s12498_s17 + $0x1b8] sm:$0xff] }
 0xb17   :  { %v9370_v24 = vpop.eup %9369 }
 0xb18   :  { %v1834_v3 = vmul.f32 %v9370_v24, %v9870_v12  ;;  %v1878_v24 = vld [vmem:[%s12496_s15 + $0xf0] sm:$0xff] }
 0xb1a   :  { %v1840_v8 = vmul.f32 %v1839_v0, %v1834_v3  ;;  %v1893_v3 = vld [vmem:[%s12496_s15 + $0x168] sm:$0xff] }
 0xb1b   :  { %v9372_v12 = vpop.eup %9371 }
 0xb1c   :  { %v9973_v17 = vadd.f32 %v1845_v2, %v1840_v8  ;;  %v1835_v18 = vmul.f32 %v9372_v12, %v9874_v16  ;;  %v1873_v16 = vld [vmem:[%s12496_s15 + $0xc8] sm:$0xff]  ;;  %v1910_v12 = vld [vmem:[%s12496_s15 + $0x1f0] sm:$0xff] }
 0xb1d   :  { %v8544_v32 = vpack.c.bf16 %v1873_v16, %v1857_v25  ;;  %v2651_v25 = vld [vmem:[%s12498_s17 + $0x8] sm:$0xff]  ;;  %v8608_v16 = vpack.c.bf16 %v2699_v20, %v2698_v19  ;;  %v2690_v19 = vld [vmem:[%s12498_s17 + $0x140] sm:$0xff] }
 0xb1e   :  { %v1841_v26 = vmul.f32 %v1839_v0, %v1835_v18  ;;  %6994 = vmatmul.mubr.msk.f32.vlgmr.msra.gmra.mrb[12].mxu0 %vm285_vm4, %v9973_v17  ;;  %6996 = vmatmul.mubr.msk.f32.vlgmr.msra.gmra.mrb[16].mxu1 %vm285_vm4, %v9973_v17  ;;  %v1862_v0 = vld [vmem:[%s12496_s15 + $0x70] sm:$0xff]  ;;  %v2667_v18 = vld [vmem:[%s12498_s17 + $0x88] sm:$0xff] }
 0xb1f   :  { %8531 = vmatpush1.bf16.msra.mxu0 %v8530_v13  ;;  %8539 = vmatpush1.bf16.msra.mxu1 %v8538_v14  ;;  %v8570_v8 = vpack.c.bf16 %v1878_v24, %v1862_v0  ;;  %v8564_v13 = vpack.c.bf16 %v1909_v4, %v1893_v3  ;;  %v8572_v14 = vpack.c.bf16 %v1911_v6, %v1895_v5  ;;  %v2688_v5 = vld [vmem:[%s12498_s17 + $0x130] sm:$0xff]  ;;  %v2689_v6 = vld [vmem:[%s12498_s17 + $0x138] sm:$0xff]  ;;  %v2691_v20 = vld [vmem:[%s12498_s17 + $0x148] sm:$0xff] }
 0xb20   :  { %v10004_v35 = vadd.f32 %v1845_v2, %v1841_v26  ;;  %2072 = vmatprep.mubr.f32.mxu0 %v9451_v27  ;;  %2149 = vmatprep.mubr.f32.mxu1 %v9451_v27  ;;  %v8568_v2 = vpack.c.bf16 %v1879_v38, %v1863_v53  ;;  %v8576_v26 = vpack.c.bf16 %v2667_v18, %v2666_v15  ;;  %v2686_v53 = vld [vmem:[%s12498_s17 + $0x120] sm:$0xff]  ;;  %v2687_v38 = vld [vmem:[%s12498_s17 + $0x128] sm:$0xff] }
 0xb21   :  { %8533 = vmatprep.subr.bf16.mxu0 %v8532_v22  ;;  %8541 = vmatprep.subr.bf16.mxu1 %v8540_v23  ;;  %v8574_v22 = vpack.c.bf16 %v1910_v12, %v1894_v11  ;;  %v2650_v23 = vld [vmem:[%s12498_s17] sm:$0xff]  ;;  %v8618_v24 = vpack.c.bf16 %v2687_v38, %v2686_v53  ;;  %v8620_v4 = vpack.c.bf16 %v2705_v63, %v2704_v62  ;;  %v2713_v53 = vld [vmem:[%s12498_s17 + $0x1f8] sm:$0xff]  ;;  %v2664_v38 = vld [vmem:[%s12498_s17 + $0x70] sm:$0xff] }
 0xb22   :  { %6995 = vmatmul.mubr.msk.f32.gmra.mrb[14].mxu0 %vm285_vm4, %v10004_v35  ;;  %6997 = vmatmul.mubr.msk.f32.gmra.mrb[18].mxu1 %vm285_vm4, %v10004_v35  ;;  %v8578_v37 = vpack.c.bf16 %v2651_v25, %v2650_v23  ;;  %v8622_v12 = vpack.c.bf16 %v2689_v6, %v2688_v5  ;;  %v8624_v18 = vpack.c.bf16 %v2707_v10, %v2706_v9  ;;  %v2708_v23 = vld [vmem:[%s12498_s17 + $0x1d0] sm:$0xff]  ;;  %v2709_v25 = vld [vmem:[%s12498_s17 + $0x1d8] sm:$0xff]  ;;  %v2763_v5 = vld [vmem:[%s12498_s17 + $0x388] sm:$0xff]  ;;  %v10342_v9 = vsub.s32 3, %v9855_v54 }
 0xb23   :  { %8535 = vmatpush1.bf16.msra.mxu0 %v8534_v30  ;;  %8543 = vmatpush1.bf16.msra.mxu1 %v8542_v33  ;;  %v2668_v30 = vld [vmem:[%s12498_s17 + $0x90] sm:$0xff]  ;;  %v2669_v33 = vld [vmem:[%s12498_s17 + $0x98] sm:$0xff] }
 0xb24   :  { %2220 = vmatprep.mubr.f32.mxu0 %v9451_v27  ;;  %2297 = vmatprep.mubr.f32.mxu1 %v9451_v27  ;;  %v8580_v39 = vpack.c.bf16 %v2669_v33, %v2668_v30  ;;  %v8628_v33 = vpack.c.bf16 %v2709_v25, %v2708_v23  ;;  %v2696_v63 = vld [vmem:[%s12498_s17 + $0x170] sm:$0xff] }
 0xb25   :  { %8545 = vmatprep.subr.bf16.mxu0 %v8544_v32  ;;  %8553 = vmatprep.subr.bf16.mxu1 %v8552_v40  ;;  %v2652_v32 = vld [vmem:[%s12498_s17 + $0x10] sm:$0xff]  ;;  %v2653_v40 = vld [vmem:[%s12498_s17 + $0x18] sm:$0xff] }
 0xb26   :  { %6998 = vmatmul.mubr.msk.f32.vlgmr.msra.gmra.mrb[16].mxu0 %vm285_vm4, %v9973_v17  ;;  %7000 = vmatmul.mubr.msk.f32.vlgmr.msra.gmra.mrb[20].mxu1 %vm285_vm4, %v9973_v17  ;;  %v8582_v47 = vpack.c.bf16 %v2653_v40, %v2652_v32  ;;  %v2710_v32 = vld [vmem:[%s12498_s17 + $0x1e0] sm:$0xff]  ;;  %v2711_v40 = vld [vmem:[%s12498_s17 + $0x1e8] sm:$0xff]  ;;  %v2732_v23 = vld [vmem:[%s12498_s17 + $0x290] sm:$0xff] }
 0xb27   :  { %8547 = vmatpush1.bf16.msra.mxu0 %v8546_v58  ;;  %8555 = vmatpush1.bf16.msra.mxu1 %v8554_v43  ;;  %v2670_v58 = vld [vmem:[%s12498_s17 + $0xa0] sm:$0xff]  ;;  %v2671_v43 = vld [vmem:[%s12498_s17 + $0xa8] sm:$0xff] }
 0xb28   :  { %2226 = vmatprep.mubr.f32.mxu0 %v9451_v27  ;;  %2303 = vmatprep.mubr.f32.mxu1 %v9451_v27  ;;  %v8584_v51 = vpack.c.bf16 %v2671_v43, %v2670_v58  ;;  %v8632_v58 = vpack.c.bf16 %v2711_v40, %v2710_v32  ;;  %v2663_v43 = vld [vmem:[%s12498_s17 + $0x68] sm:$0xff] }
 0xb29   :  { %8549 = vmatprep.subr.bf16.mxu0 %v8548_v49  ;;  %8557 = vmatprep.subr.bf16.mxu1 %v8556_v50  ;;  %v2654_v49 = vld [vmem:[%s12498_s17 + $0x20] sm:$0xff]  ;;  %v2655_v50 = vld [vmem:[%s12498_s17 + $0x28] sm:$0xff] }
 0xb2a   :  { %6999 = vmatmul.mubr.msk.f32.gmra.mrb[18].mxu0 %vm285_vm4, %v10004_v35  ;;  %7001 = vmatmul.mubr.msk.f32.gmra.mrb[22].mxu1 %vm285_vm4, %v10004_v35  ;;  %v8586_v0 = vpack.c.bf16 %v2655_v50, %v2654_v49  ;;  %v2680_v49 = vld [vmem:[%s12498_s17 + $0xf0] sm:$0xff]  ;;  %v2681_v50 = vld [vmem:[%s12498_s17 + $0xf8] sm:$0xff] }
 0xb2b   :  { %8551 = vmatpush1.bf16.msra.mxu0 %v8550_v57  ;;  %8559 = vmatpush1.bf16.msra.mxu1 %v8558_v61  ;;  %v2672_v57 = vld [vmem:[%s12498_s17 + $0xb0] sm:$0xff]  ;;  %v2673_v61 = vld [vmem:[%s12498_s17 + $0xb8] sm:$0xff] }
 0xb2c   :  { %2374 = vmatprep.mubr.f32.mxu0 %v9451_v27  ;;  %2451 = vmatprep.mubr.f32.mxu1 %v9451_v27  ;;  %v8588_v3 = vpack.c.bf16 %v2673_v61, %v2672_v57  ;;  %v2665_v57 = vld [vmem:[%s12498_s17 + $0x78] sm:$0xff] }
 0xb2d   :  { %8561 = vmatprep.subr.bf16.mxu0 %v8560_v1  ;;  %8569 = vmatprep.subr.bf16.mxu1 %v8568_v2  ;;  %v2656_v1 = vld [vmem:[%s12498_s17 + $0x30] sm:$0xff]  ;;  %v2657_v2 = vld [vmem:[%s12498_s17 + $0x38] sm:$0xff]  ;;  %v8606_v62 = vpack.c.bf16 %v2665_v57, %v2664_v38  ;;  %v2734_v57 = vld [vmem:[%s12498_s17 + $0x2a0] sm:$0xff] }
 0xb2e   :  { %7002 = vmatmul.mubr.msk.f32.vlgmr.msra.gmra.mrb[20].mxu0 %vm285_vm4, %v9973_v17  ;;  %7004 = vmatmul.mubr.msk.f32.vlgmr.msra.gmra.mrb[24].mxu1 %vm285_vm4, %v9973_v17  ;;  %v8590_v11 = vpack.c.bf16 %v2657_v2, %v2656_v1  ;;  %v2730_v1 = vld [vmem:[%s12498_s17 + $0x280] sm:$0xff]  ;;  %v2731_v2 = vld [vmem:[%s12498_s17 + $0x288] sm:$0xff]  ;;  %v2749_v38 = vld [vmem:[%s12498_s17 + $0x318] sm:$0xff] }
 0xb2f   :  { %8563 = vmatpush1.bf16.msra.mxu0 %v8562_v7  ;;  %8571 = vmatpush1.bf16.msra.mxu1 %v8570_v8  ;;  %v2674_v7 = vld [vmem:[%s12498_s17 + $0xc0] sm:$0xff]  ;;  %v2675_v8 = vld [vmem:[%s12498_s17 + $0xc8] sm:$0xff] }
 0xb30   :  { %2380 = vmatprep.mubr.f32.mxu0 %v9451_v27  ;;  %2457 = vmatprep.mubr.f32.mxu1 %v9451_v27  ;;  %v8592_v15 = vpack.c.bf16 %v2675_v8, %v2674_v7  ;;  %v10334_v7 = vsub.s32 2, %v9855_v54  ;;  %v10339_v8 = vld [vmem:[%s12497_s16] sm:$0xff] }
 0xb31   :  { %8565 = vmatprep.subr.bf16.mxu0 %v8564_v13  ;;  %8573 = vmatprep.subr.bf16.mxu1 %v8572_v14  ;;  %v2658_v13 = vld [vmem:[%s12498_s17 + $0x40] sm:$0xff]  ;;  %v2659_v14 = vld [vmem:[%s12498_s17 + $0x48] sm:$0xff]  ;;  %v1919_v10 = vrot.slane %v10339_v8, %v9858_v55 }
 0xb32   :  { %7003 = vmatmul.mubr.msk.f32.gmra.mrb[22].mxu0 %vm285_vm4, %v10004_v35  ;;  %7005 = vmatmul.mubr.msk.f32.gmra.mrb[26].mxu1 %vm285_vm4, %v10004_v35 }
 0xb33   :  { %8567 = vmatpush1.bf16.msra.mxu0 %v8566_v21  ;;  %8575 = vmatpush1.bf16.msra.mxu1 %v8574_v22  ;;  %v2676_v21 = vld [vmem:[%s12498_s17 + $0xd0] sm:$0xff]  ;;  %v2677_v22 = vld [vmem:[%s12498_s17 + $0xd8] sm:$0xff] }
 0xb34   :  { %2528 = vmatprep.mubr.f32.mxu0 %v9451_v27  ;;  %2605 = vmatprep.mubr.f32.mxu1 %v9451_v27  ;;  %v8596_v30 = vpack.c.bf16 %v2677_v22, %v2676_v21  ;;  %v2746_v21 = vld [vmem:[%s12498_s17 + $0x300] sm:$0xff]  ;;  %v2747_v22 = vld [vmem:[%s12498_s17 + $0x308] sm:$0xff] }
 0xb35   :  { %8577 = vmatprep.subr.bf16.mxu0 %v8576_v26  ;;  %8609 = vmatprep.subr.bf16.mxu1 %v8608_v16  ;;  %v8594_v26 = vpack.c.bf16 %v2659_v14, %v2658_v13  ;;  %v8626_v16 = vpack.c.bf16 %v2691_v20, %v2690_v19  ;;  %v1931_v13 = vrot.slane %v10339_v8, %v10342_v9  ;;  %v2714_v14 = vld [vmem:[%s12498_s17 + $0x200] sm:$0xff] }
 0xb36   :  { %7006 = vmatmul.mubr.msk.f32.vlgmr.msra.gmra.mrb[24].mxu0 %vm285_vm4, %v9973_v17  ;;  %7008 = vmatmul.mubr.msk.f32.vlgmr.msra.gmra.mrb[28].mxu1 %vm285_vm4, %v9973_v17  ;;  %v8674_v32 = vpack.c.bf16 %v2747_v22, %v2746_v21 }
 0xb37   :  { %2534 = vmatprep.mubr.f32.mxu0 %v9451_v27  ;;  %2611 = vmatprep.mubr.f32.mxu1 %v9451_v27 }
 0xb38   :  { %8579 = vmatpush3.bf16.msra.mxu0 %v8578_v37  ;;  %8611 = vmatpush3.bf16.msra.mxu1 %v8610_v31  ;;  %v2678_v37 = vld [vmem:[%s12498_s17 + $0xe0] sm:$0xff]  ;;  %v2679_v31 = vld [vmem:[%s12498_s17 + $0xe8] sm:$0xff] }
 0xb39   :  { %8581 = vmatprep.subr.bf16.mxu0 %v8580_v39  ;;  %8613 = vmatprep.subr.bf16.mxu1 %v8612_v41  ;;  %v8598_v39 = vpack.c.bf16 %v2661_v29, %v2660_v28  ;;  %v8630_v41 = vpack.c.bf16 %v2693_v36, %v2692_v34  ;;  %v8600_v42 = vpack.c.bf16 %v2679_v31, %v2678_v37  ;;  %v2733_v29 = vld [vmem:[%s12498_s17 + $0x298] sm:$0xff]  ;;  %v10380_v37 = vsub.s32 7, %v9855_v54 }
 0xb3a   :  { %7007 = vmatmul.mubr.msk.f32.gmra.mrb[26].mxu0 %vm285_vm4, %v10004_v35  ;;  %7009 = vmatmul.mubr.msk.f32.gmra.mrb[30].mxu1 %vm285_vm4, %v10004_v35 }
 0xb3c   :  { %8583 = vmatpush3.bf16.msra.mxu0 %v8582_v47  ;;  %8615 = vmatpush3.bf16.msra.mxu1 %v8614_v48  ;;  %v8602_v47 = vpack.c.bf16 %v2663_v43, %v2662_v59  ;;  %v8634_v48 = vpack.c.bf16 %v2695_v46, %v2694_v44  ;;  %v8644_v43 = vpack.c.bf16 %v2733_v29, %v2732_v23  ;;  %v2717_v46 = vld [vmem:[%s12498_s17 + $0x218] sm:$0xff]  ;;  %v2751_v23 = vld [vmem:[%s12498_s17 + $0x328] sm:$0xff]  ;;  %v2768_v29 = vld [vmem:[%s12498_s17 + $0x3b0] sm:$0xff] }
 0xb3d   :  { %8585 = vmatprep.subr.bf16.mxu0 %v8584_v51  ;;  %8617 = vmatprep.subr.bf16.mxu1 %v8616_v52  ;;  %v2712_v51 = vld [vmem:[%s12498_s17 + $0x1f0] sm:$0xff]  ;;  %v8604_v52 = vpack.c.bf16 %v2681_v50, %v2680_v49 }
 0xb3e   :  { %v8636_v61 = vpack.c.bf16 %v2713_v53, %v2712_v51 }
 0xb40   :  { %8587 = vmatpush3.bf16.msra.mxu0 %v8586_v0  ;;  %8619 = vmatpush3.bf16.msra.mxu1 %v8618_v24  ;;  %v2697_v0 = vld [vmem:[%s12498_s17 + $0x178] sm:$0xff] }
 0xb41   :  { %8589 = vmatprep.subr.bf16.mxu0 %v8588_v3  ;;  %8621 = vmatprep.subr.bf16.mxu1 %v8620_v4  ;;  %v8638_v24 = vpack.c.bf16 %v2697_v0, %v2696_v63  ;;  %v2762_v3 = vld [vmem:[%s12498_s17 + $0x380] sm:$0xff]  ;;  %v8640_v4 = vpack.c.bf16 %v2731_v2, %v2730_v1  ;;  %v10403_v63 = vrot.slane %v10339_v8, %v10380_v37  ;;  %v2735_v0 = vld [vmem:[%s12498_s17 + $0x2a8] sm:$0xff] }
 0xb42   :  { %v8672_v6 = vpack.c.bf16 %v2763_v5, %v2762_v3  ;;  %v2767_v1 = vld [vmem:[%s12498_s17 + $0x3a8] sm:$0xff]  ;;  %v2718_v2 = vld [vmem:[%s12498_s17 + $0x220] sm:$0xff]  ;;  %v8648_v21 = vpack.c.bf16 %v2735_v0, %v2734_v57 }
 0xb44   :  { %8591 = vmatpush3.bf16.msra.mxu0 %v8590_v11  ;;  %8623 = vmatpush3.bf16.msra.mxu1 %v8622_v12  ;;  %v1927_v11 = vrot.slane %v10339_v8, %v10334_v7  ;;  %v1923_v12 = vrot.slane %v10339_v8, %v9864_v60 }
 0xb45   :  { %8593 = vmatprep.subr.bf16.mxu0 %v8592_v15  ;;  %8625 = vmatprep.subr.bf16.mxu1 %v8624_v18  ;;  %v2715_v15 = vld [vmem:[%s12498_s17 + $0x208] sm:$0xff]  ;;  %v10359_v18 = vsub.s32 5, %v9855_v54 }
 0xb46   :  { %v8642_v31 = vpack.c.bf16 %v2715_v15, %v2714_v14 }
 0xb47   :  { %v10384_v40 = vrot.slane %v10339_v8, %v10359_v18 }
 0xb48   :  { %8595 = vmatpush3.bf16.msra.mxu0 %v8594_v26  ;;  %8627 = vmatpush3.bf16.msra.mxu1 %v8626_v16 }
 0xb49   :  { %8597 = vmatprep.subr.bf16.mxu0 %v8596_v30  ;;  %8629 = vmatprep.subr.bf16.mxu1 %v8628_v33  ;;  %v2764_v30 = vld [vmem:[%s12498_s17 + $0x390] sm:$0xff]  ;;  %v2765_v33 = vld [vmem:[%s12498_s17 + $0x398] sm:$0xff] }
 0xb4a   :  { %v8676_v44 = vpack.c.bf16 %v2765_v33, %v2764_v30  ;;  %v2769_v30 = vld [vmem:[%s12498_s17 + $0x3b8] sm:$0xff] }
 0xb4c   :  { %8599 = vmatpush3.bf16.msra.mxu0 %v8598_v39  ;;  %8631 = vmatpush3.bf16.msra.mxu1 %v8630_v41  ;;  %v2716_v39 = vld [vmem:[%s12498_s17 + $0x210] sm:$0xff] }
 0xb4d   :  { %8601 = vmatprep.subr.bf16.mxu0 %v8600_v42  ;;  %8633 = vmatprep.subr.bf16.mxu1 %v8632_v58 }
 0xb50   :  { %8603 = vmatpush3.bf16.msra.mxu0 %v8602_v47  ;;  %8635 = vmatpush3.bf16.msra.mxu1 %v8634_v48  ;;  %v2748_v47 = vld [vmem:[%s12498_s17 + $0x310] sm:$0xff] }
 0xb51   :  { %8605 = vmatprep.subr.bf16.mxu0 %v8604_v52  ;;  %8637 = vmatprep.subr.bf16.mxu1 %v8636_v61 }
 0xb54   :  { %8607 = vmatpush3.bf16.msra.mxu0 %v8606_v62  ;;  %8639 = vmatpush3.bf16.msra.mxu1 %v8638_v24  ;;  %v2766_v24 = vld [vmem:[%s12498_s17 + $0x3a0] sm:$0xff] }
 0xb55   :  { %8641 = vmatprep.subr.bf16.mxu0 %v8640_v4  ;;  %8673 = vmatprep.subr.bf16.mxu1 %v8672_v6  ;;  %v8680_v22 = vpack.c.bf16 %v2767_v1, %v2766_v24 }
 0xbf1   :  { %v2068_v19 = vpop.f32.mrb[12].mxu0  ;;  %v2145_v20 = vpop.f32.mrb[16].mxu1 }
 0xbf2   :  { %v2069_v25 = vadd.f32 %v2068_v19, %v1919_v10  ;;  %v2146_v26 = vadd.f32 %v2145_v20, %v1927_v11  ;;  %v2070_v16 = vpop.f32.mrb[13].mxu0  ;;  %v2147_v28 = vpop.f32.mrb[17].mxu1 }
 0xbf3   :  { %v2071_v34 = vadd.f32 %v2070_v16, %v1923_v12  ;;  %v2148_v36 = vadd.f32 %v2147_v28, %v1931_v13  ;;  %v2737_v28 = vld [vmem:[%s12498_s17 + $0x2b8] sm:$0xff] }
 0xbf4   :  { %v2618_v48 = vmax.f32 %v2069_v25, 0.0  ;;  %v2620_v49 = vmax.f32 %v2146_v26, 0.0  ;;  %v2736_v25 = vld [vmem:[%s12498_s17 + $0x2b0] sm:$0xff] }
 0xbf5   :  { %v2619_v41 = vmax.f32 %v2071_v34, 0.0  ;;  %v2621_v59 = vmax.f32 %v2148_v36, 0.0  ;;  %v2074_v42 = vpop.f32.mrb[14].mxu0  ;;  %v2151_v58 = vpop.f32.mrb[18].mxu1 }
 0xbf6   :  { %v2075_v50 = vadd.f32 %v2074_v42, %v1919_v10  ;;  %v2152_v51 = vadd.f32 %v2151_v58, %v1927_v11  ;;  %v2076_v52 = vpop.f32.mrb[15].mxu0  ;;  %v2153_v53 = vpop.f32.mrb[19].mxu1  ;;  %v8646_v10 = vpack.c.bf16 %v2717_v46, %v2716_v39  ;;  %v8678_v11 = vpack.c.bf16 %v2749_v38, %v2748_v47  ;;  %v2752_v46 = vld [vmem:[%s12498_s17 + $0x330] sm:$0xff]  ;;  %v2753_v47 = vld [vmem:[%s12498_s17 + $0x338] sm:$0xff] }
 0xbf7   :  { %v2077_v61 = vadd.f32 %v2076_v52, %v1923_v12  ;;  %v2154_v62 = vadd.f32 %v2153_v53, %v1931_v13  ;;  %2977 = vmatprep.mubr.f32.mxu0 %v2619_v41  ;;  %3052 = vmatprep.mubr.f32.mxu1 %v2621_v59  ;;  %v2719_v12 = vld [vmem:[%s12498_s17 + $0x228] sm:$0xff]  ;;  %v2750_v13 = vld [vmem:[%s12498_s17 + $0x320] sm:$0xff]  ;;  %v2720_v41 = vld [vmem:[%s12498_s17 + $0x230] sm:$0xff]  ;;  %v8686_v57 = vpack.c.bf16 %v2753_v47, %v2752_v46 }
 0xbf8   :  { %2978 = vmatmul.mubr.f32.vlgmr.msra.gmra.mrb[28].mxu0 %v2618_v48  ;;  %3053 = vmatmul.mubr.f32.vlgmr.msra.gmra.mrb[32].mxu1 %v2620_v49  ;;  %v2634_v14 = vmax.f32 %v2075_v50, 0.0  ;;  %v2636_v15 = vmax.f32 %v2152_v51, 0.0  ;;  %v8682_v39 = vpack.c.bf16 %v2751_v23, %v2750_v13  ;;  %v2721_v59 = vld [vmem:[%s12498_s17 + $0x238] sm:$0xff]  ;;  %v2738_v48 = vld [vmem:[%s12498_s17 + $0x2c0] sm:$0xff]  ;;  %v2739_v49 = vld [vmem:[%s12498_s17 + $0x2c8] sm:$0xff] }
 0xbf9   :  { %v2635_v3 = vmax.f32 %v2077_v61, 0.0  ;;  %v2637_v4 = vmax.f32 %v2154_v62, 0.0  ;;  %8643 = vmatpush3.bf16.msra.mxu0 %v8642_v31  ;;  %8675 = vmatpush3.bf16.msra.mxu1 %v8674_v32  ;;  %v10417_v5 = vpop.f32.mrb[16].mxu0  ;;  %v10419_v6 = vpop.f32.mrb[20].mxu1  ;;  %v8650_v32 = vpack.c.bf16 %v2719_v12, %v2718_v2  ;;  %v2770_v50 = vld [vmem:[%s12498_s17 + $0x3c0] sm:$0xff]  ;;  %v2771_v51 = vld [vmem:[%s12498_s17 + $0x3c8] sm:$0xff]  ;;  %v8654_v38 = vpack.c.bf16 %v2721_v59, %v2720_v41 }
 0xbfa   :  { %v2224_v19 = vpop.f32.mrb[17].mxu0  ;;  %v2301_v20 = vpop.f32.mrb[21].mxu1  ;;  %8645 = vmatprep.subr.bf16.mxu0 %v8644_v43  ;;  %8677 = vmatprep.subr.bf16.mxu1 %v8676_v44  ;;  %v8652_v43 = vpack.c.bf16 %v2737_v28, %v2736_v25  ;;  %v8684_v44 = vpack.c.bf16 %v2769_v30, %v2768_v29  ;;  %v2722_v61 = vld [vmem:[%s12498_s17 + $0x240] sm:$0xff]  ;;  %v2723_v62 = vld [vmem:[%s12498_s17 + $0x248] sm:$0xff]  ;;  %v8656_v1 = vpack.c.bf16 %v2739_v49, %v2738_v48  ;;  %v2772_v12 = vld [vmem:[%s12498_s17 + $0x3d0] sm:$0xff]  ;;  %v10554_v48 = vsub.s32 6, %v9855_v54 }
 0xbfb   :  { %v2225_v26 = vadd.f32 %v2224_v19, %v10384_v40  ;;  %v2302_v16 = vadd.f32 %v2301_v20, %v10403_v63  ;;  %2982 = vmatprep.mubr.f32.mxu0 %v2635_v3  ;;  %3057 = vmatprep.mubr.f32.mxu1 %v2637_v4  ;;  %v8688_v2 = vpack.c.bf16 %v2771_v51, %v2770_v50  ;;  %v2754_v3 = vld [vmem:[%s12498_s17 + $0x340] sm:$0xff]  ;;  %v2755_v4 = vld [vmem:[%s12498_s17 + $0x348] sm:$0xff]  ;;  %v2773_v13 = vld [vmem:[%s12498_s17 + $0x3d8] sm:$0xff] }
 0xbfc   :  { %2983 = vmatmul.mubr.f32.gmra.mrb[30].mxu0 %v2634_v14  ;;  %3058 = vmatmul.mubr.f32.gmra.mrb[34].mxu1 %v2636_v15  ;;  %v8658_v19 = vpack.c.bf16 %v2723_v62, %v2722_v61  ;;  %v8690_v20 = vpack.c.bf16 %v2755_v4, %v2754_v3  ;;  %v2756_v28 = vld [vmem:[%s12498_s17 + $0x350] sm:$0xff]  ;;  %v2757_v29 = vld [vmem:[%s12498_s17 + $0x358] sm:$0xff]  ;;  %v2742_v30 = vld [vmem:[%s12498_s17 + $0x2e0] sm:$0xff] }
 0xbfd   :  { %v2623_v33 = vmax.f32 %v2225_v26, 0.0  ;;  %v2625_v34 = vmax.f32 %v2302_v16, 0.0  ;;  %8647 = vmatpush3.bf16.msra.mxu0 %v8646_v10  ;;  %8679 = vmatpush3.bf16.msra.mxu1 %v8678_v11  ;;  %v10444_v36 = vpop.f32.mrb[18].mxu0  ;;  %v10446_v31 = vpop.f32.mrb[22].mxu1  ;;  %v2740_v10 = vld [vmem:[%s12498_s17 + $0x2d0] sm:$0xff]  ;;  %v2741_v11 = vld [vmem:[%s12498_s17 + $0x2d8] sm:$0xff]  ;;  %v8692_v16 = vpack.c.bf16 %v2773_v13, %v2772_v12 }
 0xbfe   :  { %v10454_v42 = vpop.f32.mrb[19].mxu0  ;;  %v10456_v58 = vpop.f32.mrb[23].mxu1  ;;  %8649 = vmatprep.subr.bf16.mxu0 %v8648_v21  ;;  %8681 = vmatprep.subr.bf16.mxu1 %v8680_v22  ;;  %v2724_v21 = vld [vmem:[%s12498_s17 + $0x250] sm:$0xff]  ;;  %v2725_v22 = vld [vmem:[%s12498_s17 + $0x258] sm:$0xff]  ;;  %v8660_v26 = vpack.c.bf16 %v2741_v11, %v2740_v10  ;;  %v2726_v46 = vld [vmem:[%s12498_s17 + $0x260] sm:$0xff] }
 0xbff   :  { %3127 = vmatprep.mubr.f32.mxu0 %v2623_v33  ;;  %3202 = vmatprep.mubr.f32.mxu1 %v2625_v34  ;;  %v2743_v33 = vld [vmem:[%s12498_s17 + $0x2e8] sm:$0xff]  ;;  %v2774_v34 = vld [vmem:[%s12498_s17 + $0x3e0] sm:$0xff]  ;;  %v2745_v62 = vld [vmem:[%s12498_s17 + $0x2f8] sm:$0xff] }
 0xc00   :  { %v2727_v47 = vld [vmem:[%s12498_s17 + $0x268] sm:$0xff]  ;;  %v8664_v51 = vpack.c.bf16 %v2743_v33, %v2742_v30  ;;  %v2728_v13 = vld [vmem:[%s12498_s17 + $0x270] sm:$0xff]  ;;  %v2794_v30 = vld [vmem:[%s12498_s17 + $0x480] sm:$0xff] }
 0xc01   :  { %8651 = vmatpush3.bf16.msra.mxu0 %v8650_v32  ;;  %8683 = vmatpush3.bf16.msra.mxu1 %v8682_v39  ;;  %v10476_v52 = vpop.f32.mrb[20].mxu0  ;;  %v10478_v53 = vpop.f32.mrb[24].mxu1  ;;  %v2775_v32 = vld [vmem:[%s12498_s17 + $0x3e8] sm:$0xff]  ;;  %v10541_v39 = vsub.s32 4, %v9855_v54  ;;  %v2744_v54 = vld [vmem:[%s12498_s17 + $0x2f0] sm:$0xff]  ;;  %v8666_v11 = vpack.c.bf16 %v2727_v47, %v2726_v46  ;;  %v2826_v33 = vld [vmem:[%s12498_s17 + $0x580] sm:$0xff] }
 0xc02   :  { %v10486_v0 = vpop.f32.mrb[21].mxu0  ;;  %v10488_v24 = vpop.f32.mrb[25].mxu1  ;;  %8653 = vmatprep.subr.bf16.mxu0 %v8652_v43  ;;  %8685 = vmatprep.subr.bf16.mxu1 %v8684_v44  ;;  %v8662_v43 = vpack.c.bf16 %v2725_v22, %v2724_v21  ;;  %v8694_v44 = vpack.c.bf16 %v2757_v29, %v2756_v28  ;;  %v2759_v61 = vld [vmem:[%s12498_s17 + $0x368] sm:$0xff]  ;;  %v1943_v21 = vrot.slane %v10339_v8, %v10554_v48  ;;  %v2761_v29 = vld [vmem:[%s12498_s17 + $0x378] sm:$0xff] }
 0xc03   :  { %v1935_v3 = vrot.slane %v10339_v8, %v10541_v39  ;;  %v2795_v8 = vld [vmem:[%s12498_s17 + $0x488] sm:$0xff] }
 0xc05   :  { %8655 = vmatpush3.bf16.msra.mxu0 %v8654_v38  ;;  %8687 = vmatpush3.bf16.msra.mxu1 %v8686_v57  ;;  %v10508_v14 = vpop.f32.mrb[22].mxu0  ;;  %v10510_v15 = vpop.f32.mrb[26].mxu1  ;;  %v8696_v38 = vpack.c.bf16 %v2775_v32, %v2774_v34  ;;  %v2758_v57 = vld [vmem:[%s12498_s17 + $0x360] sm:$0xff]  ;;  %v2827_v34 = vld [vmem:[%s12498_s17 + $0x588] sm:$0xff] }
 0xc06   :  { %v10518_v23 = vpop.f32.mrb[23].mxu0  ;;  %v10520_v25 = vpop.f32.mrb[27].mxu1  ;;  %8657 = vmatprep.subr.bf16.mxu0 %v8656_v1  ;;  %8689 = vmatprep.subr.bf16.mxu1 %v8688_v2  ;;  %v2776_v1 = vld [vmem:[%s12498_s17 + $0x3f0] sm:$0xff]  ;;  %v2777_v2 = vld [vmem:[%s12498_s17 + $0x3f8] sm:$0xff]  ;;  %v8698_v12 = vpack.c.bf16 %v2759_v61, %v2758_v57  ;;  %v10617_v32 = vld [vmem:[%s12497_s16 + $0x8] sm:$0xff] }
 0xc07   :  { %v8700_v28 = vpack.c.bf16 %v2777_v2, %v2776_v1  ;;  %v2811_v57 = vld [vmem:[%s12498_s17 + $0x508] sm:$0xff]  ;;  %v2796_v61 = vld [vmem:[%s12498_s17 + $0x490] sm:$0xff]  ;;  %v8736_v1 = vpack.c.bf16 %v2827_v34, %v2826_v33  ;;  %v2797_v2 = vld [vmem:[%s12498_s17 + $0x498] sm:$0xff] }
 0xc09   :  { %8659 = vmatpush3.bf16.msra.mxu0 %v8658_v19  ;;  %8691 = vmatpush3.bf16.msra.mxu1 %v8690_v20  ;;  %v10543_v41 = vpop.f32.mrb[24].mxu0  ;;  %v10545_v59 = vpop.f32.mrb[28].mxu1  ;;  %v2729_v19 = vld [vmem:[%s12498_s17 + $0x278] sm:$0xff]  ;;  %v2760_v20 = vld [vmem:[%s12498_s17 + $0x370] sm:$0xff] }
 0xc0a   :  { %v10556_v49 = vpop.f32.mrb[25].mxu0  ;;  %v10558_v50 = vpop.f32.mrb[29].mxu1  ;;  %8661 = vmatprep.subr.bf16.mxu0 %v8660_v26  ;;  %8693 = vmatprep.subr.bf16.mxu1 %v8692_v16  ;;  %v8668_v16 = vpack.c.bf16 %v2745_v62, %v2744_v54  ;;  %v8670_v46 = vpack.c.bf16 %v2729_v19, %v2728_v13  ;;  %v8702_v47 = vpack.c.bf16 %v2761_v29, %v2760_v20 }
 0xc0b   :  { %v2223_v54 = vadd.f32 %v10417_v5, %v1935_v3  ;;  %v2300_v62 = vadd.f32 %v10419_v6, %v1943_v21  ;;  %v2231_v5 = vadd.f32 %v10454_v42, %v10384_v40  ;;  %v2308_v6 = vadd.f32 %v10456_v58, %v10403_v63  ;;  %v2780_v42 = vld [vmem:[%s12498_s17 + $0x410] sm:$0xff]  ;;  %v2781_v58 = vld [vmem:[%s12498_s17 + $0x418] sm:$0xff] }
 0xc0c   :  { %v10651_v13 = vrot.slane %v10617_v32, %v9864_v60  ;;  %v10655_v19 = vrot.slane %v10617_v32, %v10342_v9  ;;  %v2229_v40 = vadd.f32 %v10444_v36, %v1935_v3  ;;  %v2306_v63 = vadd.f32 %v10446_v31, %v1943_v21  ;;  %v2812_v31 = vld [vmem:[%s12498_s17 + $0x510] sm:$0xff]  ;;  %v2813_v3 = vld [vmem:[%s12498_s17 + $0x518] sm:$0xff]  ;;  %v2798_v21 = vld [vmem:[%s12498_s17 + $0x4a0] sm:$0xff] }
 0xc0d   :  { %8663 = vmatpush3.bf16.msra.mxu0 %v8662_v43  ;;  %8695 = vmatpush3.bf16.msra.mxu1 %v8694_v44  ;;  %v10580_v4 = vpop.f32.mrb[26].mxu0  ;;  %v10582_v10 = vpop.f32.mrb[30].mxu1  ;;  %v2778_v43 = vld [vmem:[%s12498_s17 + $0x400] sm:$0xff]  ;;  %v2779_v44 = vld [vmem:[%s12498_s17 + $0x408] sm:$0xff]  ;;  %v2639_v33 = vmax.f32 %v2231_v5, 0.0  ;;  %v2641_v34 = vmax.f32 %v2308_v6, 0.0 }
 0xc0e   :  { %v10595_v22 = vpop.f32.mrb[27].mxu0  ;;  %v10597_v26 = vpop.f32.mrb[31].mxu1  ;;  %8665 = vmatprep.subr.bf16.mxu0 %v8664_v51  ;;  %8697 = vmatprep.subr.bf16.mxu1 %v8696_v38  ;;  %v8704_v51 = vpack.c.bf16 %v2795_v8, %v2794_v30  ;;  %v2810_v38 = vld [vmem:[%s12498_s17 + $0x500] sm:$0xff]  ;;  %v8706_v20 = vpack.c.bf16 %v2779_v44, %v2778_v43  ;;  %v2622_v30 = vmax.f32 %v2223_v54, 0.0  ;;  %v2624_v8 = vmax.f32 %v2300_v62, 0.0  ;;  %v2831_v44 = vld [vmem:[%s12498_s17 + $0x5a8] sm:$0xff] }
 0xc0f   :  { %v2379_v43 = vadd.f32 %v10486_v0, %v10651_v13  ;;  %v2456_v36 = vadd.f32 %v10488_v24, %v10655_v19  ;;  %v2799_v0 = vld [vmem:[%s12498_s17 + $0x4a8] sm:$0xff]  ;;  %v2830_v24 = vld [vmem:[%s12498_s17 + $0x5a0] sm:$0xff]  ;;  %v2800_v5 = vld [vmem:[%s12498_s17 + $0x4b0] sm:$0xff] }
 0xc10   :  { %v2801_v6 = vld [vmem:[%s12498_s17 + $0x4b8] sm:$0xff] }
 0xc11   :  { %8667 = vmatpush3.bf16.msra.mxu0 %v8666_v11  ;;  %8699 = vmatpush3.bf16.msra.mxu1 %v8698_v12  ;;  %v2828_v11 = vld [vmem:[%s12498_s17 + $0x590] sm:$0xff]  ;;  %v2829_v12 = vld [vmem:[%s12498_s17 + $0x598] sm:$0xff]  ;;  %v2627_v54 = vmax.f32 %v2379_v43, 0.0  ;;  %v2629_v62 = vmax.f32 %v2456_v36, 0.0  ;;  %v2834_v43 = vld [vmem:[%s12498_s17 + $0x5c0] sm:$0xff] }
 0xc12   :  { %8669 = vmatprep.subr.bf16.mxu0 %v8668_v16  ;;  %8701 = vmatprep.subr.bf16.mxu1 %v8700_v28  ;;  %v8738_v16 = vpack.c.bf16 %v2811_v57, %v2810_v38  ;;  %v8708_v28 = vpack.c.bf16 %v2797_v2, %v2796_v61  ;;  %v8740_v29 = vpack.c.bf16 %v2829_v12, %v2828_v11  ;;  %v2782_v57 = vld [vmem:[%s12498_s17 + $0x420] sm:$0xff]  ;;  %v2783_v61 = vld [vmem:[%s12498_s17 + $0x428] sm:$0xff] }
 0xc13   :  { %v8742_v38 = vpack.c.bf16 %v2813_v3, %v2812_v31  ;;  %v8744_v2 = vpack.c.bf16 %v2831_v44, %v2830_v24  ;;  %v2814_v11 = vld [vmem:[%s12498_s17 + $0x520] sm:$0xff]  ;;  %v2815_v12 = vld [vmem:[%s12498_s17 + $0x528] sm:$0xff] }
 0xc14   :  { %v2835_v36 = vld [vmem:[%s12498_s17 + $0x5c8] sm:$0xff] }
 0xc15   :  { %8671 = vmatpush3.bf16.msra.mxu0 %v8670_v46  ;;  %8703 = vmatpush3.bf16.msra.mxu1 %v8702_v47  ;;  %v2638_v46 = vmax.f32 %v2229_v40, 0.0  ;;  %v2640_v47 = vmax.f32 %v2306_v63, 0.0  ;;  %v8716_v40 = vpack.c.bf16 %v2801_v6, %v2800_v5  ;;  %v8752_v44 = vpack.c.bf16 %v2835_v36, %v2834_v43  ;;  %v2820_v5 = vld [vmem:[%s12498_s17 + $0x550] sm:$0xff]  ;;  %v2821_v6 = vld [vmem:[%s12498_s17 + $0x558] sm:$0xff] }
 0xc16   :  { %8705 = vmatprep.subr.bf16.mxu0 %v8704_v51  ;;  %8737 = vmatprep.subr.bf16.mxu1 %v8736_v1  ;;  %v8710_v51 = vpack.c.bf16 %v2781_v58, %v2780_v42  ;;  %v8712_v1 = vpack.c.bf16 %v2799_v0, %v2798_v21  ;;  %v2816_v42 = vld [vmem:[%s12498_s17 + $0x530] sm:$0xff]  ;;  %v2817_v58 = vld [vmem:[%s12498_s17 + $0x538] sm:$0xff]  ;;  %v2786_v21 = vld [vmem:[%s12498_s17 + $0x440] sm:$0xff] }
 0xc17   :  { %v8750_v3 = vpack.c.bf16 %v2817_v58, %v2816_v42  ;;  %v2787_v0 = vld [vmem:[%s12498_s17 + $0x448] sm:$0xff]  ;;  %v2808_v43 = vld [vmem:[%s12498_s17 + $0x4f0] sm:$0xff]  ;;  %v2809_v36 = vld [vmem:[%s12498_s17 + $0x4f8] sm:$0xff] }
 0xc18   :  { %3128 = vmatmul.mubr.f32.vlgmr.msra.gmra.mrb[32].mxu0 %v2622_v30  ;;  %3203 = vmatmul.mubr.f32.vlgmr.msra.gmra.mrb[36].mxu1 %v2624_v8  ;;  %v2784_v30 = vld [vmem:[%s12498_s17 + $0x430] sm:$0xff]  ;;  %v2785_v8 = vld [vmem:[%s12498_s17 + $0x438] sm:$0xff] }
 0xc19   :  { %3132 = vmatprep.mubr.f32.mxu0 %v2639_v33  ;;  %3207 = vmatprep.mubr.f32.mxu1 %v2641_v34  ;;  %v2802_v33 = vld [vmem:[%s12498_s17 + $0x4c0] sm:$0xff]  ;;  %v2803_v34 = vld [vmem:[%s12498_s17 + $0x4c8] sm:$0xff]  ;;  %v8718_v31 = vpack.c.bf16 %v2785_v8, %v2784_v30  ;;  %v8758_v8 = vpack.c.bf16 %v2821_v6, %v2820_v5 }
 0xc1a   :  { %8707 = vmatpush3.bf16.msra.mxu0 %v8706_v20  ;;  %8739 = vmatpush3.bf16.msra.mxu1 %v8738_v16  ;;  %v2832_v20 = vld [vmem:[%s12498_s17 + $0x5b0] sm:$0xff]  ;;  %v2833_v16 = vld [vmem:[%s12498_s17 + $0x5b8] sm:$0xff]  ;;  %v8720_v24 = vpack.c.bf16 %v2803_v34, %v2802_v33  ;;  %v2822_v33 = vld [vmem:[%s12498_s17 + $0x560] sm:$0xff] }
 0xc1b   :  { %8709 = vmatprep.subr.bf16.mxu0 %v8708_v28  ;;  %8741 = vmatprep.subr.bf16.mxu1 %v8740_v29  ;;  %v8714_v28 = vpack.c.bf16 %v2783_v61, %v2782_v57  ;;  %v8746_v29 = vpack.c.bf16 %v2815_v12, %v2814_v11  ;;  %v8748_v63 = vpack.c.bf16 %v2833_v16, %v2832_v20  ;;  %v2836_v57 = vld [vmem:[%s12498_s17 + $0x5d0] sm:$0xff]  ;;  %v2837_v61 = vld [vmem:[%s12498_s17 + $0x5d8] sm:$0xff]  ;;  %v2806_v20 = vld [vmem:[%s12498_s17 + $0x4e0] sm:$0xff] }
 0xc1c   :  { %3133 = vmatmul.mubr.f32.gmra.mrb[34].mxu0 %v2638_v46  ;;  %3208 = vmatmul.mubr.f32.gmra.mrb[38].mxu1 %v2640_v47  ;;  %v2818_v46 = vld [vmem:[%s12498_s17 + $0x540] sm:$0xff]  ;;  %v2819_v47 = vld [vmem:[%s12498_s17 + $0x548] sm:$0xff]  ;;  %v8756_v12 = vpack.c.bf16 %v2837_v61, %v2836_v57  ;;  %v2825_v61 = vld [vmem:[%s12498_s17 + $0x578] sm:$0xff] }
 0xc1d   :  { %3277 = vmatprep.mubr.f32.mxu0 %v2627_v54  ;;  %3352 = vmatprep.mubr.f32.mxu1 %v2629_v62  ;;  %v8722_v54 = vpack.c.bf16 %v2787_v0, %v2786_v21  ;;  %v8754_v62 = vpack.c.bf16 %v2819_v47, %v2818_v46  ;;  %v2807_v16 = vld [vmem:[%s12498_s17 + $0x4e8] sm:$0xff]  ;;  %v1951_v21 = vrot.slane %v10617_v32, %v9858_v55  ;;  %v2793_v46 = vld [vmem:[%s12498_s17 + $0x478] sm:$0xff]  ;;  %v2824_v47 = vld [vmem:[%s12498_s17 + $0x570] sm:$0xff] }
 0xc1e   :  { %8711 = vmatpush3.bf16.msra.mxu0 %v8710_v51  ;;  %8743 = vmatpush3.bf16.msra.mxu1 %v8742_v38  ;;  %v2804_v51 = vld [vmem:[%s12498_s17 + $0x4d0] sm:$0xff]  ;;  %v2805_v38 = vld [vmem:[%s12498_s17 + $0x4d8] sm:$0xff]  ;;  %v8728_v42 = vpack.c.bf16 %v2807_v16, %v2806_v20  ;;  %v2823_v34 = vld [vmem:[%s12498_s17 + $0x568] sm:$0xff]  ;;  %v8766_v6 = vpack.c.bf16 %v2825_v61, %v2824_v47 }
 0xc1f   :  { %8713 = vmatprep.subr.bf16.mxu0 %v8712_v1  ;;  %8745 = vmatprep.subr.bf16.mxu1 %v8744_v2  ;;  %v2788_v1 = vld [vmem:[%s12498_s17 + $0x450] sm:$0xff]  ;;  %v2789_v2 = vld [vmem:[%s12498_s17 + $0x458] sm:$0xff]  ;;  %v8724_v11 = vpack.c.bf16 %v2805_v38, %v2804_v51  ;;  %v1959_v51 = vrot.slane %v10617_v32, %v10334_v7  ;;  %v8732_v38 = vpack.c.bf16 %v2809_v36, %v2808_v43  ;;  %v2874_v16 = vld [vmem:[%s12498_s17 + $0x700] sm:$0xff] }
 0xc20   :  { %v8726_v30 = vpack.c.bf16 %v2789_v2, %v2788_v1  ;;  %v2890_v1 = vld [vmem:[%s12498_s17 + $0x780] sm:$0xff]  ;;  %v2891_v2 = vld [vmem:[%s12498_s17 + $0x788] sm:$0xff] }
 0xc22   :  { %8715 = vmatpush3.bf16.msra.mxu0 %v8714_v28  ;;  %8747 = vmatpush3.bf16.msra.mxu1 %v8746_v29  ;;  %v2838_v28 = vld [vmem:[%s12498_s17 + $0x5e0] sm:$0xff]  ;;  %v2839_v29 = vld [vmem:[%s12498_s17 + $0x5e8] sm:$0xff] }
 0xc23   :  { %8717 = vmatprep.subr.bf16.mxu0 %v8716_v40  ;;  %8749 = vmatprep.subr.bf16.mxu1 %v8748_v63  ;;  %v2790_v40 = vld [vmem:[%s12498_s17 + $0x460] sm:$0xff]  ;;  %v2791_v63 = vld [vmem:[%s12498_s17 + $0x468] sm:$0xff]  ;;  %v8760_v58 = vpack.c.bf16 %v2839_v29, %v2838_v28  ;;  %v2860_v29 = vld [vmem:[%s12498_s17 + $0x690] sm:$0xff] }
 0xc24   :  { %v8730_v0 = vpack.c.bf16 %v2791_v63, %v2790_v40  ;;  %v2875_v28 = vld [vmem:[%s12498_s17 + $0x708] sm:$0xff]  ;;  %v8800_v40 = vpack.c.bf16 %v2891_v2, %v2890_v1  ;;  %v2861_v63 = vld [vmem:[%s12498_s17 + $0x698] sm:$0xff]  ;;  %v2846_v1 = vld [vmem:[%s12498_s17 + $0x620] sm:$0xff] }
 0xc25   :  { %v8802_v36 = vpack.c.bf16 %v2875_v28, %v2874_v16  ;;  %v2847_v2 = vld [vmem:[%s12498_s17 + $0x628] sm:$0xff]  ;;  %v2864_v28 = vld [vmem:[%s12498_s17 + $0x6b0] sm:$0xff] }
 0xc26   :  { %8719 = vmatpush3.bf16.msra.mxu0 %v8718_v31  ;;  %8751 = vmatpush3.bf16.msra.mxu1 %v8750_v3  ;;  %v2840_v31 = vld [vmem:[%s12498_s17 + $0x5f0] sm:$0xff]  ;;  %v2841_v3 = vld [vmem:[%s12498_s17 + $0x5f8] sm:$0xff]  ;;  %v2879_v16 = vld [vmem:[%s12498_s17 + $0x728] sm:$0xff] }
 0xc27   :  { %8721 = vmatprep.subr.bf16.mxu0 %v8720_v24  ;;  %8753 = vmatprep.subr.bf16.mxu1 %v8752_v44  ;;  %v8762_v24 = vpack.c.bf16 %v2823_v34, %v2822_v33  ;;  %v2792_v44 = vld [vmem:[%s12498_s17 + $0x470] sm:$0xff]  ;;  %v8764_v57 = vpack.c.bf16 %v2841_v3, %v2840_v31  ;;  %v10867_v33 = vrot.slane %v10617_v32, %v10359_v18 }
 0xc28   :  { %v8734_v5 = vpack.c.bf16 %v2793_v46, %v2792_v44  ;;  %v10871_v34 = vrot.slane %v10617_v32, %v10380_v37  ;;  %v8772_v31 = vpack.c.bf16 %v2861_v63, %v2860_v29  ;;  %v2865_v29 = vld [vmem:[%s12498_s17 + $0x6b8] sm:$0xff] }
 0xc29   :  { %v2533_v47 = vadd.f32 %v10556_v49, %v10867_v33  ;;  %v2863_v49 = vld [vmem:[%s12498_s17 + $0x6a8] sm:$0xff] }
 0xc2a   :  { %8723 = vmatpush3.bf16.msra.mxu0 %v8722_v54  ;;  %8755 = vmatpush3.bf16.msra.mxu1 %v8754_v62  ;;  %v2858_v54 = vld [vmem:[%s12498_s17 + $0x680] sm:$0xff]  ;;  %v2859_v62 = vld [vmem:[%s12498_s17 + $0x688] sm:$0xff] }
 0xc2b   :  { %8725 = vmatprep.subr.bf16.mxu0 %v8724_v11  ;;  %8757 = vmatprep.subr.bf16.mxu1 %v8756_v12  ;;  %v2842_v11 = vld [vmem:[%s12498_s17 + $0x600] sm:$0xff]  ;;  %v2843_v12 = vld [vmem:[%s12498_s17 + $0x608] sm:$0xff]  ;;  %v8768_v20 = vpack.c.bf16 %v2859_v62, %v2858_v54 }
 0xc2c   :  { %v8770_v43 = vpack.c.bf16 %v2843_v12, %v2842_v11  ;;  %v2631_v11 = vmax.f32 %v2533_v47, 0.0  ;;  %v2882_v47 = vld [vmem:[%s12498_s17 + $0x740] sm:$0xff] }
 0xc2e   :  { %8727 = vmatpush3.bf16.msra.mxu0 %v8726_v30  ;;  %8759 = vmatpush3.bf16.msra.mxu1 %v8758_v8  ;;  %v2377_v30 = vadd.f32 %v10476_v52, %v1951_v21  ;;  %v2454_v8 = vadd.f32 %v10478_v53, %v1959_v51  ;;  %v2385_v52 = vadd.f32 %v10518_v23, %v10651_v13  ;;  %v2844_v13 = vld [vmem:[%s12498_s17 + $0x610] sm:$0xff] }
 0xc2f   :  { %8729 = vmatprep.subr.bf16.mxu0 %v8728_v42  ;;  %8761 = vmatprep.subr.bf16.mxu1 %v8760_v58  ;;  %v2892_v42 = vld [vmem:[%s12498_s17 + $0x790] sm:$0xff]  ;;  %v2893_v58 = vld [vmem:[%s12498_s17 + $0x798] sm:$0xff]  ;;  %v2462_v53 = vadd.f32 %v10520_v25, %v10655_v19  ;;  %v2383_v23 = vadd.f32 %v10508_v14, %v1951_v21  ;;  %v2460_v25 = vadd.f32 %v10510_v15, %v1959_v51  ;;  %v2862_v51 = vld [vmem:[%s12498_s17 + $0x6a0] sm:$0xff] }
 0xc30   :  { %v8804_v3 = vpack.c.bf16 %v2893_v58, %v2892_v42  ;;  %v2845_v19 = vld [vmem:[%s12498_s17 + $0x618] sm:$0xff]  ;;  %v2643_v44 = vmax.f32 %v2385_v52, 0.0  ;;  %v2610_v14 = vadd.f32 %v10558_v50, %v10871_v34  ;;  %v2876_v15 = vld [vmem:[%s12498_s17 + $0x710] sm:$0xff]  ;;  %v2894_v50 = vld [vmem:[%s12498_s17 + $0x7a0] sm:$0xff]  ;;  %v8780_v52 = vpack.c.bf16 %v2865_v29, %v2864_v28 }
 0xc31   :  { %v2645_v46 = vmax.f32 %v2462_v53, 0.0  ;;  %v2877_v21 = vld [vmem:[%s12498_s17 + $0x718] sm:$0xff]  ;;  %v2644_v61 = vmax.f32 %v2460_v25, 0.0  ;;  %v8774_v54 = vpack.c.bf16 %v2845_v19, %v2844_v13  ;;  %v2848_v42 = vld [vmem:[%s12498_s17 + $0x630] sm:$0xff]  ;;  %v2850_v13 = vld [vmem:[%s12498_s17 + $0x640] sm:$0xff] }
 0xc32   :  { %8731 = vmatpush3.bf16.msra.mxu0 %v8730_v0  ;;  %8763 = vmatpush3.bf16.msra.mxu1 %v8762_v24  ;;  %v2626_v0 = vmax.f32 %v2377_v30, 0.0  ;;  %v2628_v24 = vmax.f32 %v2454_v8, 0.0  ;;  %v8806_v62 = vpack.c.bf16 %v2877_v21, %v2876_v15  ;;  %v2633_v12 = vmax.f32 %v2610_v14, 0.0  ;;  %v2896_v30 = vld [vmem:[%s12498_s17 + $0x7b0] sm:$0xff]  ;;  %v2897_v8 = vld [vmem:[%s12498_s17 + $0x7b8] sm:$0xff]  ;;  %v2851_v19 = vld [vmem:[%s12498_s17 + $0x648] sm:$0xff] }
 0xc33   :  { %8733 = vmatprep.subr.bf16.mxu0 %v8732_v38  ;;  %8765 = vmatprep.subr.bf16.mxu1 %v8764_v57  ;;  %v2895_v38 = vld [vmem:[%s12498_s17 + $0x7a8] sm:$0xff]  ;;  %v2642_v57 = vmax.f32 %v2383_v23, 0.0  ;;  %v2849_v58 = vld [vmem:[%s12498_s17 + $0x638] sm:$0xff]  ;;  %v8812_v53 = vpack.c.bf16 %v2897_v8, %v2896_v30  ;;  %v2868_v15 = vld [vmem:[%s12498_s17 + $0x6d0] sm:$0xff] }
 0xc34   :  { %v8782_v23 = vpack.c.bf16 %v2849_v58, %v2848_v42  ;;  %v2883_v14 = vld [vmem:[%s12498_s17 + $0x748] sm:$0xff]  ;;  %v2869_v21 = vld [vmem:[%s12498_s17 + $0x6d8] sm:$0xff]  ;;  %v2854_v28 = vld [vmem:[%s12498_s17 + $0x660] sm:$0xff] }
 0xc35   :  { %v2855_v29 = vld [vmem:[%s12498_s17 + $0x668] sm:$0xff]  ;;  %v2872_v42 = vld [vmem:[%s12498_s17 + $0x6f0] sm:$0xff]  ;;  %v2873_v58 = vld [vmem:[%s12498_s17 + $0x6f8] sm:$0xff] }
 0xc36   :  { %8735 = vmatpush3.bf16.msra.mxu0 %v8734_v5  ;;  %8767 = vmatpush3.bf16.msra.mxu1 %v8766_v6  ;;  %v8776_v5 = vpack.c.bf16 %v2863_v49, %v2862_v51  ;;  %v8808_v6 = vpack.c.bf16 %v2895_v38, %v2894_v50  ;;  %v2900_v51 = vld [vmem:[%s12498_s17 + $0x7d0] sm:$0xff]  ;;  %v2901_v49 = vld [vmem:[%s12498_s17 + $0x7d8] sm:$0xff]  ;;  %v8786_v50 = vpack.c.bf16 %v2851_v19, %v2850_v13 }
 0xc37   :  { %8769 = vmatprep.subr.bf16.mxu0 %v8768_v20  ;;  %8801 = vmatprep.subr.bf16.mxu1 %v8800_v40  ;;  %v2878_v20 = vld [vmem:[%s12498_s17 + $0x720] sm:$0xff]  ;;  %v8778_v40 = vpack.c.bf16 %v2847_v2, %v2846_v1  ;;  %v8818_v38 = vpack.c.bf16 %v2883_v14, %v2882_v47  ;;  %v2884_v1 = vld [vmem:[%s12498_s17 + $0x750] sm:$0xff]  ;;  %v2885_v2 = vld [vmem:[%s12498_s17 + $0x758] sm:$0xff]  ;;  %v2539_v14 = vadd.f32 %v10595_v22, %v10867_v33 }
 0xc38   :  { %v8810_v63 = vpack.c.bf16 %v2879_v16, %v2878_v20  ;;  %v8822_v16 = vpack.c.bf16 %v2885_v2, %v2884_v1  ;;  %v2888_v13 = vld [vmem:[%s12498_s17 + $0x770] sm:$0xff]  ;;  %v2889_v19 = vld [vmem:[%s12498_s17 + $0x778] sm:$0xff]  ;;  %v7010_v33 = vld [vmem:[%s12552_s27] ss:$0 sm:$0xff] }
 0xc39   :  { %3278 = vmatmul.mubr.f32.vlgmr.msra.gmra.mrb[36].mxu0 %v2626_v0  ;;  %3353 = vmatmul.mubr.f32.vlgmr.msra.gmra.mrb[40].mxu1 %v2628_v24  ;;  %v2898_v0 = vld [vmem:[%s12498_s17 + $0x7c0] sm:$0xff]  ;;  %v2899_v24 = vld [vmem:[%s12498_s17 + $0x7c8] sm:$0xff] }
 0xc3a   :  { %3282 = vmatprep.mubr.f32.mxu0 %v2643_v44  ;;  %3357 = vmatprep.mubr.f32.mxu1 %v2645_v46  ;;  %v8816_v46 = vpack.c.bf16 %v2899_v24, %v2898_v0  ;;  %v1975_v0 = vrot.slane %v10617_v32, %v10554_v48  ;;  %v8796_v24 = vpack.c.bf16 %v2873_v58, %v2872_v42 }
 0xc3b   :  { %8771 = vmatpush3.bf16.msra.mxu0 %v8770_v43  ;;  %8803 = vmatpush3.bf16.msra.mxu1 %v8802_v36  ;;  %v2880_v43 = vld [vmem:[%s12498_s17 + $0x730] sm:$0xff]  ;;  %v2881_v36 = vld [vmem:[%s12498_s17 + $0x738] sm:$0xff] }
 0xc3c   :  { %8773 = vmatprep.subr.bf16.mxu0 %v8772_v31  ;;  %8805 = vmatprep.subr.bf16.mxu1 %v8804_v3  ;;  %v2866_v31 = vld [vmem:[%s12498_s17 + $0x6c0] sm:$0xff]  ;;  %v2867_v3 = vld [vmem:[%s12498_s17 + $0x6c8] sm:$0xff]  ;;  %v8814_v25 = vpack.c.bf16 %v2881_v36, %v2880_v43  ;;  %v1967_v43 = vrot.slane %v10617_v32, %v10541_v39  ;;  %v8794_v36 = vpack.c.bf16 %v2855_v29, %v2854_v28 }
 0xc3d   :  { %3283 = vmatmul.mubr.f32.gmra.mrb[38].mxu0 %v2642_v57  ;;  %3358 = vmatmul.mubr.f32.gmra.mrb[42].mxu1 %v2644_v61  ;;  %v8784_v44 = vpack.c.bf16 %v2867_v3, %v2866_v31  ;;  %v2852_v57 = vld [vmem:[%s12498_s17 + $0x650] sm:$0xff]  ;;  %v2853_v61 = vld [vmem:[%s12498_s17 + $0x658] sm:$0xff]  ;;  %v8830_v32 = vpack.c.bf16 %v2889_v19, %v2888_v13  ;;  %v2608_v47 = vadd.f32 %v10545_v59, %v1975_v0 }
 0xc3e   :  { %3427 = vmatprep.mubr.f32.mxu0 %v2631_v11  ;;  %3502 = vmatprep.mubr.f32.mxu1 %v2633_v12  ;;  %v2870_v11 = vld [vmem:[%s12498_s17 + $0x6e0] sm:$0xff]  ;;  %v2871_v12 = vld [vmem:[%s12498_s17 + $0x6e8] sm:$0xff]  ;;  %v8790_v20 = vpack.c.bf16 %v2853_v61, %v2852_v57  ;;  %v2856_v3 = vld [vmem:[%s12498_s17 + $0x670] sm:$0xff] }
 0xc3f   :  { %8775 = vmatpush3.bf16.msra.mxu0 %v8774_v54  ;;  %8807 = vmatpush3.bf16.msra.mxu1 %v8806_v62  ;;  %v8788_v54 = vpack.c.bf16 %v2869_v21, %v2868_v15  ;;  %v8820_v62 = vpack.c.bf16 %v2901_v49, %v2900_v51  ;;  %v8792_v30 = vpack.c.bf16 %v2871_v12, %v2870_v11  ;;  %v2632_v51 = vmax.f32 %v2608_v47, 0.0 }
 0xc40   :  { %8777 = vmatprep.subr.bf16.mxu0 %v8776_v5  ;;  %8809 = vmatprep.subr.bf16.mxu1 %v8808_v6  ;;  %v2902_v5 = vld [vmem:[%s12498_s17 + $0x7e0] sm:$0xff]  ;;  %v2903_v6 = vld [vmem:[%s12498_s17 + $0x7e8] sm:$0xff]  ;;  %v2616_v15 = vadd.f32 %v10597_v26, %v10871_v34  ;;  %v2537_v49 = vadd.f32 %v10580_v4, %v1967_v43 }
 0xc41   :  { %v8824_v8 = vpack.c.bf16 %v2903_v6, %v2902_v5 }
 0xc42   :  { %v2646_v59 = vmax.f32 %v2537_v49, 0.0 }
 0xc43   :  { %8779 = vmatpush3.bf16.msra.mxu0 %v8778_v40  ;;  %8811 = vmatpush3.bf16.msra.mxu1 %v8810_v63  ;;  %v2886_v40 = vld [vmem:[%s12498_s17 + $0x760] sm:$0xff]  ;;  %v2887_v63 = vld [vmem:[%s12498_s17 + $0x768] sm:$0xff] }
 0xc44   :  { %8781 = vmatprep.subr.bf16.mxu0 %v8780_v52  ;;  %8813 = vmatprep.subr.bf16.mxu1 %v8812_v53  ;;  %v2904_v52 = vld [vmem:[%s12498_s17 + $0x7f0] sm:$0xff]  ;;  %v2905_v53 = vld [vmem:[%s12498_s17 + $0x7f8] sm:$0xff]  ;;  %v8826_v31 = vpack.c.bf16 %v2887_v63, %v2886_v40 }
 0xc47   :  { %8783 = vmatpush3.bf16.msra.mxu0 %v8782_v23  ;;  %8815 = vmatpush3.bf16.msra.mxu1 %v8814_v25  ;;  %v8828_v23 = vpack.c.bf16 %v2905_v53, %v2904_v52  ;;  %v2857_v25 = vld [vmem:[%s12498_s17 + $0x678] sm:$0xff] }
 0xc48   :  { %8785 = vmatprep.subr.bf16.mxu0 %v8784_v44  ;;  %8817 = vmatprep.subr.bf16.mxu1 %v8816_v46  ;;  %v8798_v44 = vpack.c.bf16 %v2857_v25, %v2856_v3  ;;  %v2531_v46 = vadd.f32 %v10543_v41, %v1967_v43  ;;  %v2649_v41 = vmax.f32 %v2616_v15, 0.0 }
 0xc4a   :  { %v2630_v21 = vmax.f32 %v2531_v46, 0.0 }
 0xc4b   :  { %8787 = vmatpush3.bf16.msra.mxu0 %v8786_v50  ;;  %8819 = vmatpush3.bf16.msra.mxu1 %v8818_v38  ;;  %v2614_v50 = vadd.f32 %v10582_v10, %v1975_v0  ;;  %v2647_v38 = vmax.f32 %v2539_v14, 0.0 }
 0xc4c   :  { %8789 = vmatprep.subr.bf16.mxu0 %v8788_v54  ;;  %8821 = vmatprep.subr.bf16.mxu1 %v8820_v62 }
 0xc4d   :  { %v2648_v57 = vmax.f32 %v2614_v50, 0.0 }
 0xc4f   :  { %8791 = vmatpush3.bf16.msra.mxu0 %v8790_v20  ;;  %8823 = vmatpush3.bf16.msra.mxu1 %v8822_v16 }
 0xc50   :  { %8793 = vmatprep.subr.bf16.mxu0 %v8792_v30  ;;  %8825 = vmatprep.subr.bf16.mxu1 %v8824_v8 }
 0xc53   :  { %8795 = vmatpush3.bf16.msra.mxu0 %v8794_v36  ;;  %8827 = vmatpush3.bf16.msra.mxu1 %v8826_v31 }
 0xc54   :  { %8797 = vmatprep.subr.bf16.mxu0 %v8796_v24  ;;  %8829 = vmatprep.subr.bf16.mxu1 %v8828_v23 }
 0xc57   :  { %8799 = vmatpush3.bf16.msra.mxu0 %v8798_v44  ;;  %8831 = vmatpush3.bf16.msra.mxu1 %v8830_v32 }
 0xc5a   :  { %3428 = vmatmul.mubr.f32.vlgmr.msra.gmra.mrb[40].mxu0 %v2630_v21  ;;  %3503 = vmatmul.mubr.f32.vlgmr.msra.gmra.mrb[44].mxu1 %v2632_v51 }
 0xc5b   :  { %3432 = vmatprep.mubr.f32.mxu0 %v2647_v38  ;;  %3507 = vmatprep.mubr.f32.mxu1 %v2649_v41 }
 0xc5e   :  { %3433 = vmatmul.mubr.f32.gmra.mrb[42].mxu0 %v2646_v59  ;;  %3508 = vmatmul.mubr.f32.gmra.mrb[46].mxu1 %v2648_v57 }
 0xccb   :  { %v7528_v22 = vpop.f32.mrb[28].mxu0  ;;  %v7566_v26 = vpop.f32.mrb[32].mxu1 }
 0xccc   :  { %v7529_v34 = vpop.f32.mrb[29].mxu0  ;;  %v7567_v4 = vpop.f32.mrb[33].mxu1 }
 0xccd   :  { %v7530_v61 = vadd.f32 %v7529_v34, %v7528_v22  ;;  %v7568_v10 = vadd.f32 %v7567_v4, %v7566_v26 }
 0xccf   :  { %v2980_v54 = vadd.f32 %v7530_v61, %v7010_v33  ;;  %v7531_v62 = vpop.f32.mrb[30].mxu0  ;;  %v7569_v1 = vpop.f32.mrb[34].mxu1 }
 0xcd0   :  { %v7532_v2 = vpop.f32.mrb[31].mxu0  ;;  %v7570_v11 = vpop.f32.mrb[35].mxu1 }
 0xcd1   :  { %v3055_v12 = vadd.f32 %v7568_v10, %v2980_v54  ;;  %v7533_v5 = vadd.f32 %v7532_v2, %v7531_v62  ;;  %v7571_v6 = vadd.f32 %v7570_v11, %v7569_v1 }
 0xcd3   :  { %v2985_v20 = vadd.f32 %v7533_v5, %v7010_v33 }
 0xcd5   :  { %v3060_v16 = vadd.f32 %v7571_v6, %v2985_v20 }
 0xceb   :  { %v7604_v28 = vpop.f32.mrb[32].mxu0  ;;  %v7642_v29 = vpop.f32.mrb[36].mxu1 }
 0xcec   :  { %v7605_v30 = vpop.f32.mrb[33].mxu0  ;;  %v7643_v8 = vpop.f32.mrb[37].mxu1 }
 0xced   :  { %v7606_v40 = vadd.f32 %v7605_v30, %v7604_v28  ;;  %v7644_v63 = vadd.f32 %v7643_v8, %v7642_v29 }
 0xcef   :  { %v3130_v42 = vadd.f32 %v7606_v40, %v3055_v12  ;;  %v7607_v58 = vpop.f32.mrb[34].mxu0  ;;  %v7645_v52 = vpop.f32.mrb[38].mxu1 }
 0xcf0   :  { %v7608_v53 = vpop.f32.mrb[35].mxu0  ;;  %v7646_v43 = vpop.f32.mrb[39].mxu1 }
 0xcf1   :  { %v3205_v36 = vadd.f32 %v7644_v63, %v3130_v42  ;;  %v7609_v31 = vadd.f32 %v7608_v53, %v7607_v58  ;;  %v7647_v3 = vadd.f32 %v7646_v43, %v7645_v52  ;;  %v7012_v43 = vld [vmem:[%s12545_s5 + $0x28] sm:$0xff] }
 0xcf3   :  { %v3135_v0 = vadd.f32 %v7609_v31, %v3060_v16  ;;  %v7013_v31 = vld [vmem:[%s12545_s5 + $0x30] sm:$0xff] }
 0xcf5   :  { %v3210_v24 = vadd.f32 %v7647_v3, %v3135_v0  ;;  %v7014_v3 = vld [vmem:[%s12545_s5 + $0x38] sm:$0xff] }
 0xcf6   :  { %v8836_v0 = vpack.c.bf16 %v7014_v3, %v7013_v31 }
 0xd0c   :  { %v7680_v23 = vpop.f32.mrb[36].mxu0  ;;  %v7718_v25 = vpop.f32.mrb[40].mxu1 }
 0xd0d   :  { %v7681_v13 = vpop.f32.mrb[37].mxu0  ;;  %v7719_v19 = vpop.f32.mrb[41].mxu1 }
 0xd0e   :  { %v7682_v44 = vadd.f32 %v7681_v13, %v7680_v23  ;;  %v7720_v32 = vadd.f32 %v7719_v19, %v7718_v25 }
 0xd10   :  { %v3280_v46 = vadd.f32 %v7682_v44, %v3205_v36  ;;  %v7683_v47 = vpop.f32.mrb[38].mxu0  ;;  %v7721_v14 = vpop.f32.mrb[42].mxu1 }
 0xd11   :  { %v7684_v15 = vpop.f32.mrb[39].mxu0  ;;  %v7722_v21 = vpop.f32.mrb[43].mxu1 }
 0xd12   :  { %v3355_v51 = vadd.f32 %v7720_v32, %v3280_v46  ;;  %v7685_v49 = vadd.f32 %v7684_v15, %v7683_v47  ;;  %v7723_v50 = vadd.f32 %v7722_v21, %v7721_v14  ;;  %v3515_v32 = vld [vmem:[%s12502_s21] sm:$0x3] }
 0xd13   :  { %v3545_v46 = vrot.slane %v3515_v32, %v9858_v55  ;;  %v3551_v15 = vrot.slane %v3515_v32, %v9864_v60 }
 0xd14   :  { %v3285_v38 = vadd.f32 %v7685_v49, %v3210_v24 }
 0xd16   :  { %v3360_v41 = vadd.f32 %v7723_v50, %v3285_v38 }
 0xd2d   :  { %v7756_v59 = vpop.f32.mrb[40].mxu0  ;;  %v7794_v57 = vpop.f32.mrb[44].mxu1 }
 0xd2e   :  { %v7757_v22 = vpop.f32.mrb[41].mxu0  ;;  %v7795_v26 = vpop.f32.mrb[45].mxu1 }
 0xd2f   :  { %v7758_v33 = vadd.f32 %v7757_v22, %v7756_v59  ;;  %v7796_v34 = vadd.f32 %v7795_v26, %v7794_v57  ;;  %v7016_v59 = vld [vmem:[%s12546_s30 + $0x1] ss:$0 sm:$0xff]  ;;  %s12555_s30 = smov 120  }
 0xd31   :  { %v3430_v4 = vadd.f32 %v7758_v33, %v3355_v51  ;;  %v7759_v61 = vpop.f32.mrb[42].mxu0  ;;  %v7797_v10 = vpop.f32.mrb[46].mxu1 }
 0xd32   :  { %v7760_v54 = vpop.f32.mrb[43].mxu0  ;;  %v7798_v62 = vpop.f32.mrb[47].mxu1 }
 0xd33   :  { %v3505_v1 = vadd.f32 %v7796_v34, %v3430_v4  ;;  %v7761_v2 = vadd.f32 %v7760_v54, %v7759_v61  ;;  %v7799_v11 = vadd.f32 %v7798_v62, %v7797_v10 }
 0xd35   :  { %v3435_v12 = vadd.f32 %v7761_v2, %v3360_v41  ;;  %v3513_v5 = vadd.f32 %v3505_v1, %v9973_v17 }
 0xd37   :  { %v3510_v6 = vadd.f32 %v7799_v11, %v3435_v12  ;;  %v3516_v20 = vsel %vm285_vm4, %v3513_v5, 0.0 }
 0xd38   :  { %3517 = vadd.xlane.f32.xlu0 %v3516_v20 }
 0xd39   :  { %v3514_v16 = vadd.f32 %v3510_v6, %v10004_v35  ;;  %v7011_v35 = vld [vmem:[%s12545_s5 + $0x20] sm:$0xff]  ;;  %s12561_s5 = smov 56  }
 0xd3a   :  { %v8832_v36 = vpack.c.bf16 %v7012_v43, %v7011_v35 }
 0xd3b   :  { %v3519_v28 = vsel %vm285_vm4, %v3514_v16, 0.0 }
 0xd3c   :  { %3520 = vadd.xlane.f32.xlu0 %v3519_v28  ;;  %8833 = vmatprep.subr.bf16.mxu0 %v8832_v36 }
 0xd3d   :  { %8835 = vmatpush3.bf16.msra.mxu0 %v8832_v36 }
 0xd3e   :  { %8837 = vmatprep.subr.bf16.mxu0 %v8836_v0 }
 0xd41   :  { %8839 = vmatpush3.bf16.msra.mxu0 %v8836_v0 }
 0xdc5   :  { %v3518_v29 = vpop.xlane.xlu0 %3517 }
 0xdc6   :  { %v3522_v30 = vmul.f32 0.03125, %v3518_v29 }
 0xdc8   :  { %v3524_v8 = vsub.f32 %v3513_v5, %v3522_v30 }
 0xdc9   :  { %v3521_v40 = vpop.xlane.xlu0 %3520 }
 0xdca   :  { %v3523_v63 = vmul.f32 0.03125, %v3521_v40  ;;  %v3526_v42 = vmul.f32 %v3524_v8, %v3524_v8 }
 0xdcc   :  { %v3525_v58 = vsub.f32 %v3514_v16, %v3523_v63  ;;  %v3528_v52 = vsel %vm285_vm4, %v3526_v42, 0.0  ;;  %v11127_v42 = vld [vmem:[%s12549_s28 + $0x8] sm:$0xff] }
 0xdcd   :  { %3529 = vadd.xlane.f32.xlu0 %v3528_v52 }
 0xdce   :  { %v3527_v17 = vmul.f32 %v3525_v58, %v3525_v58 }
 0xdd0   :  { %v3531_v53 = vsel %vm285_vm4, %v3527_v17, 0.0  ;;  %v11133_v17 = vld [vmem:[%s12549_s28] sm:$0xff]  ;;  %s12558_s28 = smov 64  }
 0xdd1   :  { %3532 = vadd.xlane.f32.xlu1 %v3531_v53 }
 0xe5a   :  { %v3530_v24 = vpop.xlane.xlu0 %3529 }
 0xe5b   :  { %v3534_v23 = vmul.f32 0.03125, %v3530_v24 }
 0xe5d   :  { %v3536_v25 = vadd.f32 1e-05, %v3534_v23 }
 0xe5e   :  { %v3533_v13 = vpop.xlane.xlu1 %3532 }
 0xe5f   :  { %9373 = vrsqrt.f32 %v3536_v25  ;;  %v3535_v19 = vmul.f32 0.03125, %v3533_v13 }
 0xe61   :  { %v3537_v44 = vadd.f32 1e-05, %v3535_v19 }
 0xe63   :  { %9375 = vrsqrt.f32 %v3537_v44 }
 0xe69   :  { %v9374_v47 = vpop.eup %9373 }
 0xe6a   :  { %v3540_v14 = vmul.f32 %v9374_v47, %v3524_v8 }
 0xe6c   :  { %v3546_v21 = vmul.f32 %v3545_v46, %v3540_v14 }
 0xe6d   :  { %v9376_v51 = vpop.eup %9375 }
 0xe6e   :  { %v3541_v49 = vmul.f32 %v9376_v51, %v3525_v58  ;;  %v11073_v50 = vadd.f32 %v3551_v15, %v3546_v21 }
 0xe70   :  { %v3547_v38 = vmul.f32 %v3545_v46, %v3541_v49  ;;  %8319 = vmatprep.mubr.msk.f32.mxu0 %vm285_vm4, %v11073_v50 }
 0xe72   :  { %v11077_v41 = vadd.f32 %v3551_v15, %v3547_v38 }
 0xe74   :  { %8320 = vmatmul.mubr.msk.f32.vlgmr.msra.gmra.mrb[44].mxu0 %vm285_vm4, %v11077_v41 }
 0xf47   :  { %v8321_v57 = vpop.f32.mrb[44].mxu0 }
 0xf48   :  { %v3645_v22 = vadd.f32 %v8321_v57, %v7016_v59  ;;  %v3639_v26 = vpop.f32.mrb[45].mxu0 }
 0xf49   :  { %v3640_v33 = vadd.f32 %v7016_v59, %v3639_v26 }
 0xf4a   :  { %v11094_v61 = vmul.f32 0.35355338, %v3645_v22 }
 0xf4b   :  { %v11084_v34 = vpack.i.bf16 %v3645_v22, %v3640_v33  ;;  %v11086_v4 = vmul.f32 0.35355338, %v3640_v33 }
 0xf4d   :  { %9299 = vrot.lane.b32.xlu1 %v11084_v34, %s12553_s25  ;;  %9294 = vrot.lane.b32.xlu0 %v11084_v34, %s12554_s8 }
 0xf4e   :  { %8326 = vmatprep.mubr.msk.f32.mxu1 %vm105_vm0, %v11086_v4 }
 0xf51   :  { %3857 = vrot.lane.b32.xlu0 %v11094_v61, %s12555_s30  ;;  %3855 = vrot.lane.b32.xlu1 %v11086_v4, %s12555_s30 }
 0xf55   :  { %4217 = vrot.lane.b32.xlu0 %v11086_v4, %s12556_s4  ;;  %9304 = vrot.lane.b32.xlu1 %v11084_v34, %s12557_s24 }
 0xf59   :  { %4219 = vrot.lane.b32.xlu1 %v11094_v61, %s12556_s4 }
 0xfbf   :  { %v9300_v10 = vpop.permute.xlu1 %9299  ;;  %v9295_v54 = vpop.permute.xlu0 %9294 }
 0xfc0   :  { %v9302_v62 = vunpack.i.h.bf16 %v9300_v10  ;;  %v9301_v1 = vunpack.i.l.bf16 %v9300_v10  ;;  %v9297_v2 = vunpack.i.h.bf16 %v9295_v54  ;;  %v9296_v11 = vunpack.i.l.bf16 %v9295_v54 }
 0xfc2   :  { %v8840_v12 = vpack.c.bf16 %v9297_v2, %v9296_v11  ;;  %v8850_v6 = vpack.c.bf16 %v9302_v62, %v9301_v1 }
 0xfc3   :  { %v3856_v5 = vpop.permute.xlu1 %3855  ;;  %v3858_v30 = vpop.permute.xlu0 %3857 }
 0xfc4   :  { %8842 = vmatprep.subr.msk.bf16.mxu1 %vm9687_vm5, %v8840_v12 }
 0xfc5   :  { %8845 = vmatpush3.bf16.xpose.msk.msra.mxu1 %vm9687_vm5, %v8840_v12 }
 0xfc6   :  { %8852 = vmatprep.subr.msk.bf16.mxu1 %vm9687_vm5, %v8850_v6 }
 0xfc7   :  { %v9305_v20 = vpop.permute.xlu1 %9304  ;;  %v4218_v8 = vpop.permute.xlu0 %4217 }
 0xfc8   :  { %v9307_v16 = vunpack.i.h.bf16 %v9305_v20  ;;  %v9306_v28 = vunpack.i.l.bf16 %v9305_v20 }
 0xfca   :  { %v8860_v29 = vpack.c.bf16 %v9307_v16, %v9306_v28 }
 0xfcb   :  { %v4220_v40 = vpop.permute.xlu1 %4219 }
 0xfcc   :  { %8327 = vmatmul.mubr.msk.f32.vlgmr.msra.gmra.mrb[48].mxu1 %vm105_vm0, %v11094_v61 }
 0xfcd   :  { %8855 = vmatpush3.bf16.xpose.msk.msra.mxu1 %vm9687_vm5, %v8850_v6  ;;  %8340 = vmatprep.mubr.msk.f32.mxu1 %vm105_vm0, %v3856_v5 }
 0xfce   :  { %8862 = vmatprep.subr.msk.bf16.mxu1 %vm9687_vm5, %v8860_v29 }
 0xfd4   :  { %8341 = vmatmul.mubr.msk.f32.vlgmr.msra.gmra.mrb[50].mxu1 %vm105_vm0, %v3858_v30 }
 0xfd5   :  { %8865 = vmatpush3.bf16.xpose.msk.msra.mxu1 %vm9687_vm5, %v8860_v29  ;;  %8364 = vmatprep.mubr.msk.f32.mxu1 %vm105_vm0, %v4218_v8 }
 0xfdc   :  { %8365 = vmatmul.mubr.msk.f32.vlgmr.msra.gmra.mrb[52].mxu1 %vm105_vm0, %v4220_v40 }
0x109f   :  { %v8328_v63 = vpop.f32.mrb[48].mxu1 }
0x10a0   :  { %v3743_v58 = vadd.f32 %v11127_v42, %v8328_v63  ;;  %v3737_v52 = vpop.f32.mrb[49].mxu1 }
0x10a1   :  { %v3738_v53 = vadd.f32 %v11133_v17, %v3737_v52 }
0x10a2   :  { %v3749_v35 = vsel %vm464_vm6, %v3743_v58, -inf }
0x10a3   :  { %3750 = vmax.xlane.f32.xlu1 %v3749_v35  ;;  %v3746_v43 = vsel %vm464_vm6, %v3738_v53, -inf }
0x10a4   :  { %3747 = vmax.xlane.f32.xlu0 %v3746_v43 }
0x10a7   :  { %v8342_v36 = vpop.f32.mrb[50].mxu1 }
0x10a8   :  { %v3937_v31 = vpop.f32.mrb[51].mxu1  ;;  %v3943_v0 = vadd.f32 %v11127_v42, %v8342_v36 }
0x10a9   :  { %v3938_v3 = vadd.f32 %v11133_v17, %v3937_v31 }
0x10aa   :  { %v3949_v25 = vsel %vm464_vm6, %v3943_v0, -inf }
0x10ab   :  { %v3946_v24 = vsel %vm464_vm6, %v3938_v3, -inf }
0x10ac   :  { %3947 = vmax.xlane.f32.xlu0 %v3946_v24 }
0x10af   :  { %v8366_v23 = vpop.f32.mrb[52].mxu1 }
0x10b0   :  { %v4299_v13 = vpop.f32.mrb[53].mxu1  ;;  %3950 = vmax.xlane.f32.xlu0 %v3949_v25  ;;  %v4305_v2 = vadd.f32 %v11127_v42, %v8366_v23 }
0x10b1   :  { %v4300_v11 = vadd.f32 %v11133_v17, %v4299_v13 }
0x10b2   :  { %v4311_v5 = vsel %vm464_vm6, %v4305_v2, -inf }
0x10b3   :  { %v4308_v12 = vsel %vm464_vm6, %v4300_v11, -inf }
0x1130   :  { %v3751_v19 = vpop.xlane.xlu1 %3750 }
0x1131   :  { %v3753_v44 = vsub.f32 %v3743_v58, %v3751_v19  ;;  %v3748_v32 = vpop.xlane.xlu0 %3747 }
0x1132   :  { %v3752_v46 = vsub.f32 %v3738_v53, %v3748_v32 }
0x1133   :  { %v3756_v47 = vmul.f32 1.442695, %v3753_v44 }
0x1134   :  { %v3754_v14 = vmul.f32 1.442695, %v3752_v46 }
0x1135   :  { %9377 = vpow2.f32 %v3756_v47 }
0x1136   :  { %9379 = vpow2.f32 %v3754_v14 }
0x1139   :  { %v3948_v15 = vpop.xlane.xlu0 %3947 }
0x113a   :  { %v3952_v21 = vsub.f32 %v3938_v3, %v3948_v15 }
0x113c   :  { %v3954_v51 = vmul.f32 1.442695, %v3952_v21 }
0x113d   :  { %v3951_v49 = vpop.xlane.xlu0 %3950 }
0x113e   :  { %9381 = vpow2.f32 %v3954_v51  ;;  %v3953_v38 = vsub.f32 %v3943_v0, %v3951_v49 }
0x113f   :  { %v9378_v59 = vpop.eup %9377 }
0x1140   :  { %v9380_v57 = vpop.eup %9379  ;;  %v3956_v22 = vmul.f32 1.442695, %v3953_v38  ;;  %v3761_v26 = vsel %vm464_vm6, %v9378_v59, 0.0 }
0x1141   :  { %3762 = vadd.xlane.f32.xlu0 %v3761_v26  ;;  %v3758_v33 = vsel %vm464_vm6, %v9380_v57, 0.0 }
0x1142   :  { %9383 = vpow2.f32 %v3956_v22  ;;  %3759 = vadd.xlane.f32.xlu1 %v3758_v33 }
0x1148   :  { %v9382_v10 = vpop.eup %9381 }
0x1149   :  { %v3958_v54 = vsel %vm464_vm6, %v9382_v10, 0.0 }
0x114a   :  { %3959 = vadd.xlane.f32.xlu1 %v3958_v54 }
0x114c   :  { %v9384_v62 = vpop.eup %9383 }
0x114d   :  { %v3961_v1 = vsel %vm464_vm6, %v9384_v62, 0.0 }
0x114e   :  { %3962 = vadd.xlane.f32.xlu0 %v3961_v1 }
0x115b   :  { %9309 = vrot.lane.b32.xlu1 %v11084_v34, %s12558_s28 }
0x115f   :  { %9319 = vrot.lane.b32.xlu1 %v11084_v34, %s12559_s2 }
0x1163   :  { %4500 = vrot.lane.b32.xlu1 %v11086_v4, %s12560_s1 }
0x1164   :  { %9314 = vrot.lane.b32.xlu0 %v11084_v34, %s12561_s5 }
0x1168   :  { %4502 = vrot.lane.b32.xlu0 %v11094_v61, %s12560_s1 }
0x1187   :  { %4309 = vmax.xlane.f32.xlu1 %v4308_v12  ;;  %4312 = vmax.xlane.f32.xlu0 %v4311_v5 }
0x11ce   :  { %v3763_v20 = vpop.xlane.xlu0 %3762 }
0x11cf   :  { %v3760_v6 = vpop.xlane.xlu1 %3759 }
0x11d0   :  { %9385 = vrcp.f32 %v3760_v6 }
0x11d1   :  { %9387 = vrcp.f32 %v3763_v20 }
0x11d7   :  { %v3960_v4 = vpop.xlane.xlu1 %3959 }
0x11d8   :  { %9389 = vrcp.f32 %v3960_v4 }
0x11da   :  { %v9386_v16 = vpop.eup %9385 }
0x11db   :  { %v9310_v28 = vpop.permute.xlu1 %9309  ;;  %v3963_v29 = vpop.xlane.xlu0 %3962  ;;  %v3766_v61 = vmul.f32 %v9386_v16, %v9380_v57  ;;  %v7019_v57 = vld [vmem:[%s12490_s9 + $0x20] sm:$0xff] }
0x11dc   :  { %v9312_v30 = vunpack.i.h.bf16 %v9310_v28  ;;  %v9311_v8 = vunpack.i.l.bf16 %v9310_v28  ;;  %9391 = vrcp.f32 %v3963_v29  ;;  %v9388_v63 = vpop.eup %9387 }
0x11dd   :  { %8333 = vmatprep.mubr.msk.f32.mxu0 %vm464_vm6, %v3766_v61  ;;  %v3767_v3 = vmul.f32 %v9388_v63, %v9378_v59  ;;  %v7020_v59 = vld [vmem:[%s12490_s9 + $0x28] sm:$0xff] }
0x11de   :  { %v8846_v40 = vpack.c.bf16 %v9312_v30, %v9311_v8 }
0x11df   :  { %v9320_v58 = vpop.permute.xlu1 %9319  ;;  %v9315_v52 = vpop.permute.xlu0 %9314 }
0x11e0   :  { %v9322_v53 = vunpack.i.h.bf16 %v9320_v58  ;;  %v9321_v35 = vunpack.i.l.bf16 %v9320_v58  ;;  %v9317_v43 = vunpack.i.h.bf16 %v9315_v52  ;;  %v9316_v36 = vunpack.i.l.bf16 %v9315_v52  ;;  %8847 = vmatprep.subr.bf16.mxu0 %v8846_v40 }
0x11e1   :  { %8849 = vmatpush3.bf16.msra.mxu0 %v8846_v40 }
0x11e2   :  { %v9390_v31 = vpop.eup %9389  ;;  %v8870_v0 = vpack.c.bf16 %v9322_v53, %v9321_v35  ;;  %v8856_v24 = vpack.c.bf16 %v9317_v43, %v9316_v36 }
0x11e3   :  { %v4501_v23 = vpop.permute.xlu1 %4500  ;;  %v3966_v25 = vmul.f32 %v9390_v31, %v9382_v10  ;;  %v4503_v44 = vpop.permute.xlu0 %4502 }
0x11e4   :  { %8334 = vmatmul.mubr.msk.f32.vlgmr.msra.gmra.mrb[46].mxu0 %vm464_vm6, %v3767_v3  ;;  %8857 = vmatprep.subr.bf16.mxu0 %v8856_v24  ;;  %v7058_v3 = vld [vmem:[%s12492_s11 + $0x20] sm:$0xff] }
0x11e5   :  { %8872 = vmatprep.subr.msk.bf16.mxu1 %vm9687_vm5, %v8870_v0  ;;  %8383 = vmatprep.mubr.msk.f32.mxu1 %vm105_vm0, %v4501_v23 }
0x11e6   :  { %v9392_v13 = vpop.eup %9391  ;;  %8859 = vmatpush3.bf16.msra.mxu0 %v8856_v24  ;;  %8347 = vmatprep.mubr.msk.f32.mxu0 %vm464_vm6, %v3966_v25  ;;  %v7060_v24 = vld [vmem:[%s12492_s11 + $0x30] sm:$0xff]  ;;  %v7061_v25 = vld [vmem:[%s12492_s11 + $0x38] sm:$0xff] }
0x11e7   :  { %v3967_v19 = vmul.f32 %v9392_v13, %v9384_v62  ;;  %8875 = vmatpush3.bf16.xpose.msk.msra.mxu1 %vm9687_vm5, %v8870_v0  ;;  %8350 = vmatprep.subr.mxu0 %v7020_v59  ;;  %v7059_v0 = vld [vmem:[%s12492_s11 + $0x28] sm:$0xff]  ;;  %v8884_v13 = vpack.c.bf16 %v7061_v25, %v7060_v24 }
0x11e8   :  { %8880 = vmatprep.subr.bf16.mxu1 %v9463_v56  ;;  %v8881_v23 = vpack.c.bf16 %v7059_v0, %v7058_v3 }
0x11e9   :  { %8348 = vmatmul.mubr.msk.f32.vlgmr.msra.gmra.mrb[48].mxu0 %vm464_vm6, %v3967_v19  ;;  %v9424_v19 = vld [vmem:[%s12551_s6] sm:$0xff] }
0x11ea   :  { %8351 = vmatpush3.msra.mxu0 %v7020_v59 }
0x11eb   :  { %8355 = vmatprep.subr.mxu0 %v7019_v57 }
0x11ee   :  { %8384 = vmatmul.mubr.msk.f32.vlgmr.msra.gmra.mrb[54].mxu1 %vm105_vm0, %v4503_v44 }
0x11ef   :  { %8406 = vmatprep.mubr.msk.f32.mxu1 %vm9464_vm7, %v9451_v27  ;;  %8882 = vmatpush3.bf16.msra.mxu1 %v8881_v23 }
0x11f0   :  { %8883 = vmatprep.subr.bf16.mxu1 %v9463_v56 }
0x11f3   :  { %8885 = vmatpush3.bf16.msra.mxu1 %v8884_v13 }
0x1214   :  { %v4310_v32 = vpop.xlane.xlu1 %4309  ;;  %v4313_v46 = vpop.xlane.xlu0 %4312 }
0x1215   :  { %v4314_v47 = vsub.f32 %v4300_v11, %v4310_v32  ;;  %v4315_v14 = vsub.f32 %v4305_v2, %v4313_v46 }
0x1217   :  { %v4316_v15 = vmul.f32 1.442695, %v4314_v47  ;;  %v4318_v21 = vmul.f32 1.442695, %v4315_v14 }
0x1219   :  { %9393 = vpow2.f32 %v4316_v15 }
0x121a   :  { %9395 = vpow2.f32 %v4318_v21 }
0x1223   :  { %v9394_v45 = vpop.eup %9393 }
0x1224   :  { %v9396_v51 = vpop.eup %9395  ;;  %v4320_v49 = vsel %vm464_vm6, %v9394_v45, 0.0 }
0x1225   :  { %4321 = vadd.xlane.f32.xlu0 %v4320_v49  ;;  %v4323_v38 = vsel %vm464_vm6, %v9396_v51, 0.0 }
0x1226   :  { %4324 = vadd.xlane.f32.xlu1 %v4323_v38 }
0x123b   :  { %9324 = vrot.lane.b32.xlu0 %v11084_v34, %s12562_s18 }
0x12b2   :  { %v4322_v22 = vpop.xlane.xlu0 %4321 }
0x12b3   :  { %v4325_v54 = vpop.xlane.xlu1 %4324  ;;  %9397 = vrcp.f32 %v4322_v22 }
0x12b4   :  { %9399 = vrcp.f32 %v4325_v54 }
0x12b6   :  { %v9325_v33 = vpop.permute.xlu0 %9324 }
0x12b7   :  { %v8335_v26 = vpop.f32.mrb[46].mxu0  ;;  %v9327_v62 = vunpack.i.h.bf16 %v9325_v33  ;;  %v9326_v1 = vunpack.i.l.bf16 %v9325_v33  ;;  %v7065_v33 = vld [vmem:[%s12494_s13 + $0x20] sm:$0xff] }
0x12b8   :  { %v3846_v10 = vpop.f32.mrb[47].mxu0 }
0x12b9   :  { %v8866_v12 = vpack.c.bf16 %v9327_v62, %v9326_v1 }
0x12bc   :  { %v8349_v2 = vpop.f32.mrb[48].mxu0 }
0x12bd   :  { %v4046_v11 = vpop.f32.mrb[49].mxu0  ;;  %v9398_v20 = vpop.eup %9397 }
0x12be   :  { %8352 = vmatprep.mubr.msk.f32.mxu0 %vm105_vm0, %v4046_v11  ;;  %v9400_v29 = vpop.eup %9399  ;;  %v4328_v61 = vmul.f32 %v9398_v20, %v9394_v45  ;;  %v7068_v11 = vld [vmem:[%s12494_s13 + $0x38] sm:$0xff]  ;;  %v7056_v20 = vld [vmem:[%s12491_s10 + $0x1] ss:$0 sm:$0xff] }
0x12bf   :  { %8353 = vmatmul.mubr.msk.f32.vlgmr.msra.gmra.mrb[50].mxu0 %vm105_vm0, %v8349_v2  ;;  %v4329_v30 = vmul.f32 %v9400_v29, %v9396_v51  ;;  %v7022_v51 = vld [vmem:[%s12490_s9 + $0x38] sm:$0xff]  ;;  %v7067_v2 = vld [vmem:[%s12494_s13 + $0x30] sm:$0xff] }
0x12c0   :  { %8356 = vmatpush3.msra.mxu0 %v7019_v57  ;;  %8357 = vmatprep.mubr.msk.f32.mxu0 %vm105_vm0, %v3846_v10  ;;  %v7066_v10 = vld [vmem:[%s12494_s13 + $0x28] sm:$0xff] }
0x12c1   :  { %v8385_v5 = vpop.f32.mrb[54].mxu1  ;;  %8867 = vmatprep.subr.bf16.mxu0 %v8866_v12  ;;  %v8887_v62 = vpack.c.bf16 %v7066_v10, %v7065_v33 }
0x12c2   :  { %v4582_v6 = vpop.f32.mrb[55].mxu1  ;;  %v4588_v16 = vadd.f32 %v11127_v42, %v8385_v5  ;;  %v7021_v42 = vld [vmem:[%s12490_s9 + $0x30] sm:$0xff]  ;;  %v8890_v5 = vpack.c.bf16 %v7068_v11, %v7067_v2 }
0x12c3   :  { %v4583_v4 = vadd.f32 %v11133_v17, %v4582_v6 }
0x12c4   :  { %v4594_v8 = vsel %vm464_vm6, %v4588_v16, -inf }
0x12c5   :  { %v4591_v28 = vsel %vm464_vm6, %v4583_v4, -inf }
0x12c6   :  { %4592 = vmax.xlane.f32.xlu1 %v4591_v28 }
0x12c7   :  { %8358 = vmatmul.mubr.msk.f32.vlgmr.msra.gmra.mrb[50].mxu0 %vm105_vm0, %v8335_v26 }
0x12c8   :  { %8869 = vmatpush3.bf16.msra.mxu0 %v8866_v12  ;;  %8371 = vmatprep.mubr.msk.f32.mxu0 %vm464_vm6, %v4328_v61  ;;  %v7063_v12 = vld [vmem:[%s12493_s12 + $0x1] ss:$0 sm:$0xff] }
0x12c9   :  { %8374 = vmatprep.subr.mxu0 %v7021_v42 }
0x12ca   :  { %4595 = vmax.xlane.f32.xlu1 %v4594_v8 }
0x12cb   :  { %8372 = vmatmul.mubr.msk.f32.vlgmr.msra.gmra.mrb[52].mxu0 %vm464_vm6, %v4329_v30 }
0x12cc   :  { %8375 = vmatpush3.msra.mxu0 %v7021_v42  ;;  %v7070_v42 = vld [vmem:[%s12495_s14 + $0x1] ss:$0 sm:$0xff] }
0x1353   :  { %v4593_v17 = vpop.xlane.xlu1 %4592 }
0x1354   :  { %v4597_v40 = vsub.f32 %v4583_v4, %v4593_v17 }
0x1356   :  { %v4599_v52 = vmul.f32 1.442695, %v4597_v40 }
0x1357   :  { %v4596_v63 = vpop.xlane.xlu1 %4595 }
0x1358   :  { %v4598_v58 = vsub.f32 %v4588_v16, %v4596_v63 }
0x135a   :  { %v4601_v53 = vmul.f32 1.442695, %v4598_v58 }
0x135c   :  { %9401 = vpow2.f32 %v4601_v53 }
0x135d   :  { %9403 = vpow2.f32 %v4599_v52 }
0x1366   :  { %v9402_v35 = vpop.eup %9401 }
0x1367   :  { %v4606_v43 = vsel %vm464_vm6, %v9402_v35, 0.0  ;;  %v9404_v36 = vpop.eup %9403 }
0x1368   :  { %4607 = vadd.xlane.f32.xlu1 %v4606_v43  ;;  %v4603_v31 = vsel %vm464_vm6, %v9404_v36, 0.0 }
0x136c   :  { %4604 = vadd.xlane.f32.xlu1 %v4603_v31 }
0x137d   :  { %9329 = vrot.lane.b32.xlu1 %v11084_v34, %s12563_s29  ;;  %v9423_v34 = vld [vmem:[%s12550_s0] sm:$0x3] }
0x137e   :  { %8407 = vmatmul.mubr.msk.f32.vlgmr.msra.gmra.mrb[56].mxu1 %vm285_vm4, %v9423_v34 }
0x137f   :  { %8422 = vmatprep.mubr.msk.f32.mxu1 %vm1721_vm8, %v9424_v19 }
0x139e   :  { %v8373_v44 = vpop.f32.mrb[52].mxu0 }
0x139f   :  { %v4408_v32 = vpop.f32.mrb[53].mxu0 }
0x13a0   :  { %8376 = vmatprep.mubr.msk.f32.mxu0 %vm105_vm0, %v4408_v32 }
0x13a1   :  { %8377 = vmatmul.mubr.msk.f32.vlgmr.msra.gmra.mrb[50].mxu0 %vm105_vm0, %v8373_v44 }
0x13f5   :  { %v4608_v46 = vpop.xlane.xlu1 %4607 }
0x13f6   :  { %9405 = vrcp.f32 %v4608_v46  ;;  %v7057_v46 = vld [vmem:[%s12500_s19 + $0x2] sm:$0x3] }
0x13f9   :  { %v4605_v47 = vpop.xlane.xlu1 %4604 }
0x13fa   :  { %9407 = vrcp.f32 %v4605_v47  ;;  %v4826_v47 = vrot.slane %v7057_v46, %v9858_v55 }
0x13fd   :  { %v9330_v14 = vpop.permute.xlu1 %9329 }
0x13fe   :  { %v9332_v15 = vunpack.i.h.bf16 %v9330_v14  ;;  %v9331_v21 = vunpack.i.l.bf16 %v9330_v14 }
0x1400   :  { %v8876_v45 = vpack.c.bf16 %v9332_v15, %v9331_v21  ;;  %v9406_v49 = vpop.eup %9405  ;;  %v4832_v15 = vrot.slane %v7057_v46, %v9864_v60 }
0x1401   :  { %v4612_v57 = vmul.f32 %v9406_v49, %v9402_v35 }
0x1402   :  { %8877 = vmatprep.subr.bf16.mxu0 %v8876_v45 }
0x1403   :  { %8879 = vmatpush3.bf16.msra.mxu0 %v8876_v45 }
0x1404   :  { %v9408_v38 = vpop.eup %9407  ;;  %8393 = vmatprep.subr.mxu0 %v7022_v51 }
0x1405   :  { %v4611_v59 = vmul.f32 %v9408_v38, %v9404_v36 }
0x1407   :  { %8390 = vmatprep.mubr.msk.f32.mxu0 %vm464_vm6, %v4611_v59 }
0x1408   :  { %8391 = vmatmul.mubr.msk.f32.vlgmr.msra.gmra.mrb[54].mxu0 %vm464_vm6, %v4612_v57 }
0x1409   :  { %8394 = vmatpush3.msra.mxu0 %v7022_v51 }
0x140a   :  { %8886 = vmatprep.subr.bf16.mxu0 %v9463_v56 }
0x1451   :  { %v4914_v22 = vpop.f32.mrb[56].mxu1 }
0x1452   :  { %v8408_v26 = vpop.f32.mrb[57].mxu1  ;;  %v4915_v6 = vadd.f32 %v7063_v12, %v4914_v22 }
0x14db   :  { %v8392_v54 = vpop.f32.mrb[54].mxu0 }
0x14dc   :  { %v4691_v1 = vpop.f32.mrb[55].mxu0 }
0x14dd   :  { %8395 = vmatprep.mubr.msk.f32.mxu0 %vm105_vm0, %v4691_v1 }
0x14de   :  { %8396 = vmatmul.mubr.msk.f32.vlgmr.msra.gmra.mrb[50].mxu0 %vm105_vm0, %v8392_v54 }
0x14df   :  { %8888 = vmatpush3.bf16.msra.mxu0 %v8887_v62  ;;  %8417 = vmatprep.mubr.msk.f32.mxu0 %vm9464_vm7, %v9451_v27 }
0x14e0   :  { %8889 = vmatprep.subr.bf16.mxu0 %v9463_v56 }
0x14e3   :  { %8891 = vmatpush3.bf16.msra.mxu0 %v8890_v5 }
0x14e6   :  { %8418 = vmatmul.mubr.msk.f32.vlgmr.msra.gmra.mrb[56].mxu0 %vm285_vm4, %v4915_v6 }
0x14e7   :  { %5421 = vmatprep.mubr.f32.mxu0 %v9451_v27 }
0x15b1   :  { %v8397_v4 = vpop.f32.mrb[50].mxu0 }
0x15b2   :  { %v4792_v16 = vadd.f32 %v8397_v4, %v7056_v20  ;;  %v4772_v28 = vpop.f32.mrb[51].mxu0 }
0x15b3   :  { %v4791_v29 = vadd.f32 %v7056_v20, %v4772_v28  ;;  %v7093_v28 = vld [vmem:[%s12496_s15 + $0x288] sm:$0xff] }
0x15b4   :  { %v4794_v61 = vadd.f32 %v4792_v16, %v11077_v41  ;;  %v7077_v16 = vld [vmem:[%s12496_s15 + $0x208] sm:$0xff] }
0x15b5   :  { %v4793_v30 = vadd.f32 %v4791_v29, %v11073_v50  ;;  %v9425_v50 = vld [vmem:[%s12551_s6 + $0x8] sm:$0xff]  ;;  %v7079_v29 = vld [vmem:[%s12496_s15 + $0x218] sm:$0xff] }
0x15b6   :  { %v4800_v56 = vsel %vm285_vm4, %v4794_v61, 0.0 }
0x15b7   :  { %4801 = vadd.xlane.f32.xlu1 %v4800_v56  ;;  %v4797_v8 = vsel %vm285_vm4, %v4793_v30, 0.0  ;;  %v7076_v56 = vld [vmem:[%s12496_s15 + $0x200] sm:$0xff] }
0x15b8   :  { %4798 = vadd.xlane.f32.xlu0 %v4797_v8  ;;  %v7092_v8 = vld [vmem:[%s12496_s15 + $0x280] sm:$0xff] }
0x15b9   :  { %v5000_v17 = vpop.f32.mrb[56].mxu0 }
0x15ba   :  { %v5001_v40 = vadd.f32 %v7070_v42, %v5000_v17  ;;  %v8419_v63 = vpop.f32.mrb[57].mxu0  ;;  %v8894_v17 = vpack.c.bf16 %v7092_v8, %v7076_v56 }
0x15bb   :  { %v7094_v63 = vld [vmem:[%s12496_s15 + $0x290] sm:$0xff] }
0x15bc   :  { %8420 = vmatprep.subr.msk.mxu1 %vm1728_vm9, %v5001_v40 }
0x15bd   :  { %8421 = vmatpush3.msk.msra.mxu1 %vm1728_vm9, %v5001_v40  ;;  %v7078_v40 = vld [vmem:[%s12496_s15 + $0x210] sm:$0xff] }
0x15be   :  { %8423 = vmatmul.mubr.msk.f32.vlgmr.msra.gmra.mrb[58].mxu1 %vm1721_vm8, %v9425_v50  ;;  %v8902_v50 = vpack.c.bf16 %v7094_v63, %v7078_v40  ;;  %v7087_v40 = vld [vmem:[%s12496_s15 + $0x258] sm:$0xff] }
0x15bf   :  { %5344 = vmatprep.mubr.f32.mxu1 %v9451_v27  ;;  %v7103_v63 = vld [vmem:[%s12496_s15 + $0x2d8] sm:$0xff] }
0x1644   :  { %v4802_v41 = vpop.xlane.xlu1 %4801 }
0x1645   :  { %v4804_v58 = vmul.f32 0.03125, %v4802_v41  ;;  %v4799_v52 = vpop.xlane.xlu0 %4798  ;;  %v7109_v41 = vld [vmem:[%s12496_s15 + $0x308] sm:$0xff] }
0x1646   :  { %v4803_v53 = vmul.f32 0.03125, %v4799_v52  ;;  %v7111_v52 = vld [vmem:[%s12496_s15 + $0x318] sm:$0xff] }
0x1647   :  { %v4806_v35 = vsub.f32 %v4794_v61, %v4804_v58  ;;  %v8892_v61 = vpack.c.bf16 %v7093_v28, %v7077_v16  ;;  %v7125_v58 = vld [vmem:[%s12496_s15 + $0x388] sm:$0xff] }
0x1648   :  { %v4805_v43 = vsub.f32 %v4793_v30, %v4803_v53  ;;  %v7095_v30 = vld [vmem:[%s12496_s15 + $0x298] sm:$0xff]  ;;  %v8896_v53 = vpack.c.bf16 %v7125_v58, %v7109_v41  ;;  %v7084_v58 = vld [vmem:[%s12496_s15 + $0x240] sm:$0xff] }
0x1649   :  { %v4808_v3 = vmul.f32 %v4806_v35, %v4806_v35  ;;  %v8900_v42 = vpack.c.bf16 %v7095_v30, %v7079_v29  ;;  %8893 = vmatprep.subr.bf16.mxu1 %v8892_v61  ;;  %v7128_v29 = vld [vmem:[%s12496_s15 + $0x3a0] sm:$0xff]  ;;  %v7114_v61 = vld [vmem:[%s12496_s15 + $0x330] sm:$0xff] }
0x164a   :  { %v4807_v36 = vmul.f32 %v4805_v43, %v4805_v43  ;;  %8895 = vmatpush1.bf16.msra.mxu1 %v8894_v17  ;;  %v7130_v30 = vld [vmem:[%s12496_s15 + $0x3b0] sm:$0xff] }
0x164b   :  { %v4812_v0 = vsel %vm285_vm4, %v4808_v3, 0.0  ;;  %8901 = vmatprep.subr.bf16.mxu0 %v8900_v42  ;;  %8897 = vmatprep.subr.bf16.mxu1 %v8896_v53  ;;  %v7085_v42 = vld [vmem:[%s12496_s15 + $0x248] sm:$0xff]  ;;  %v8922_v41 = vpack.c.bf16 %v7130_v30, %v7114_v61  ;;  %v7100_v53 = vld [vmem:[%s12496_s15 + $0x2c0] sm:$0xff] }
0x164c   :  { %v4809_v31 = vsel %vm285_vm4, %v4807_v36, 0.0  ;;  %8903 = vmatpush1.bf16.msra.mxu0 %v8902_v50  ;;  %v7124_v36 = vld [vmem:[%s12496_s15 + $0x380] sm:$0xff]  ;;  %v7175_v30 = vld [vmem:[%s12498_s17 + $0x888] sm:$0xff] }
0x164d   :  { %4810 = vadd.xlane.f32.xlu0 %v4809_v31  ;;  %v7174_v61 = vld [vmem:[%s12498_s17 + $0x880] sm:$0xff] }
0x1651   :  { %4813 = vadd.xlane.f32.xlu0 %v4812_v0  ;;  %v7110_v0 = vld [vmem:[%s12496_s15 + $0x310] sm:$0xff] }
0x1691   :  { %v8424_v24 = vpop.f32.mrb[58].mxu1 }
0x1692   :  { %v5073_v23 = vpop.f32.mrb[59].mxu1 }
0x16da   :  { %v4811_v25 = vpop.xlane.xlu0 %4810 }
0x16db   :  { %v4815_v13 = vmul.f32 0.03125, %v4811_v25  ;;  %v7081_v25 = vld [vmem:[%s12496_s15 + $0x228] sm:$0xff] }
0x16dd   :  { %v4817_v34 = vadd.f32 1e-05, %v4815_v13  ;;  %v7097_v13 = vld [vmem:[%s12496_s15 + $0x2a8] sm:$0xff] }
0x16de   :  { %v4814_v19 = vpop.xlane.xlu0 %4813 }
0x16df   :  { %9409 = vrsqrt.f32 %v4817_v34  ;;  %v4816_v44 = vmul.f32 0.03125, %v4814_v19  ;;  %v7083_v34 = vld [vmem:[%s12496_s15 + $0x238] sm:$0xff]  ;;  %v8908_v19 = vpack.c.bf16 %v7097_v13, %v7081_v25  ;;  %v8926_v25 = vpack.c.bf16 %v7100_v53, %v7084_v58  ;;  %v7191_v58 = vld [vmem:[%s12498_s17 + $0x908] sm:$0xff]  ;;  %v7176_v53 = vld [vmem:[%s12498_s17 + $0x890] sm:$0xff] }
0x16e1   :  { %v4818_v32 = vadd.f32 1e-05, %v4816_v44  ;;  %v7099_v44 = vld [vmem:[%s12496_s15 + $0x2b8] sm:$0xff] }
0x16e3   :  { %9411 = vrsqrt.f32 %v4818_v32  ;;  %v8916_v32 = vpack.c.bf16 %v7099_v44, %v7083_v34  ;;  %v7116_v34 = vld [vmem:[%s12496_s15 + $0x340] sm:$0xff]  ;;  %v7118_v44 = vld [vmem:[%s12496_s15 + $0x350] sm:$0xff] }
0x16e9   :  { %v9410_v14 = vpop.eup %9409 }
0x16ea   :  { %v4821_v21 = vmul.f32 %v9410_v14, %v4805_v43  ;;  %v7108_v43 = vld [vmem:[%s12496_s15 + $0x300] sm:$0xff] }
0x16eb   :  { %v8898_v3 = vpack.c.bf16 %v7124_v36, %v7108_v43  ;;  %v7102_v43 = vld [vmem:[%s12496_s15 + $0x2d0] sm:$0xff] }
0x16ec   :  { %v4827_v45 = vmul.f32 %v4826_v47, %v4821_v21 }
0x16ed   :  { %v9412_v51 = vpop.eup %9411  ;;  %8899 = vmatpush1.bf16.msra.mxu1 %v8898_v3  ;;  %v7117_v3 = vld [vmem:[%s12496_s15 + $0x348] sm:$0xff] }
0x16ee   :  { %v4822_v49 = vmul.f32 %v9412_v51, %v4806_v35  ;;  %v4833_v38 = vadd.f32 %v4832_v15, %v4827_v45  ;;  %v7127_v35 = vld [vmem:[%s12496_s15 + $0x398] sm:$0xff]  ;;  %8909 = vmatprep.subr.bf16.mxu1 %v8908_v19  ;;  %v7075_v51 = vld [vmem:[%s12501_s20 + $0x2] sm:$0x3] }
0x16ef   :  { %v8904_v31 = vpack.c.bf16 %v7127_v35, %v7111_v52  ;;  %v7086_v35 = vld [vmem:[%s12496_s15 + $0x250] sm:$0xff]  ;;  %v7132_v19 = vld [vmem:[%s12496_s15 + $0x3c0] sm:$0xff] }
0x16f0   :  { %v4828_v59 = vmul.f32 %v4826_v47, %v4822_v49  ;;  %v5082_v57 = vadd.f32 %v5073_v23, %v4833_v38  ;;  %v5115_v49 = vrot.slane %v7075_v51, %v9858_v55  ;;  %v8934_v13 = vpack.c.bf16 %v7102_v43, %v7086_v35  ;;  %v7177_v35 = vld [vmem:[%s12498_s17 + $0x898] sm:$0xff]  ;;  %v7208_v43 = vld [vmem:[%s12498_s17 + $0x990] sm:$0xff] }
0x16f1   :  { %8905 = vmatprep.subr.bf16.mxu0 %v8904_v31  ;;  %v8932_v31 = vpack.c.bf16 %v7103_v63, %v7087_v40  ;;  %v7159_v40 = vld [vmem:[%s12498_s17 + $0x808] sm:$0xff]  ;;  %v8956_v63 = vpack.c.bf16 %v7175_v30, %v7174_v61  ;;  %v7166_v61 = vld [vmem:[%s12498_s17 + $0x840] sm:$0xff] }
0x16f2   :  { %v4834_v22 = vadd.f32 %v4832_v15, %v4828_v59  ;;  %v5086_v26 = vsel %vm285_vm4, %v5082_v57, 0.0  ;;  %v7080_v59 = vld [vmem:[%s12496_s15 + $0x220] sm:$0xff]  ;;  %v7167_v30 = vld [vmem:[%s12498_s17 + $0x848] sm:$0xff] }
0x16f3   :  { %5087 = vadd.xlane.f32.xlu0 %v5086_v26  ;;  %v7096_v26 = vld [vmem:[%s12496_s15 + $0x2a0] sm:$0xff] }
0x16f4   :  { %v5083_v33 = vadd.f32 %v8424_v24, %v4834_v22  ;;  %v7126_v24 = vld [vmem:[%s12496_s15 + $0x390] sm:$0xff] }
0x16f5   :  { %v8906_v23 = vpack.c.bf16 %v7126_v24, %v7110_v0  ;;  %v7133_v0 = vld [vmem:[%s12496_s15 + $0x3c8] sm:$0xff]  ;;  %v7119_v24 = vld [vmem:[%s12496_s15 + $0x358] sm:$0xff] }
0x16f6   :  { %v5089_v10 = vsel %vm285_vm4, %v5083_v33, 0.0 }
0x16f7   :  { %5090 = vadd.xlane.f32.xlu0 %v5089_v10  ;;  %8907 = vmatpush1.bf16.msra.mxu0 %v8906_v23  ;;  %v7098_v10 = vld [vmem:[%s12496_s15 + $0x2b0] sm:$0xff]  ;;  %v7135_v23 = vld [vmem:[%s12496_s15 + $0x3d8] sm:$0xff] }
0x16f8   :  { %8917 = vmatprep.subr.bf16.mxu0 %v8916_v32  ;;  %v7134_v32 = vld [vmem:[%s12496_s15 + $0x3d0] sm:$0xff] }
0x1780   :  { %v5088_v54 = vpop.xlane.xlu0 %5087 }
0x1781   :  { %v5092_v62 = vmul.f32 0.03125, %v5088_v54  ;;  %v7113_v54 = vld [vmem:[%s12496_s15 + $0x328] sm:$0xff] }
0x1783   :  { %v11277_v1 = vsub.f32 %v5082_v57, %v5092_v62  ;;  %v5121_v57 = vrot.slane %v7075_v51, %v9864_v60  ;;  %v8930_v51 = vpack.c.bf16 %v7132_v19, %v7116_v34  ;;  %v7193_v34 = vld [vmem:[%s12498_s17 + $0x918] sm:$0xff]  ;;  %v7178_v19 = vld [vmem:[%s12498_s17 + $0x8a0] sm:$0xff] }
0x1784   :  { %v5091_v2 = vpop.xlane.xlu0 %5090 }
0x1785   :  { %v5093_v11 = vmul.f32 0.03125, %v5091_v2  ;;  %v5096_v12 = vmul.f32 %v11277_v1, %v11277_v1  ;;  %v7115_v2 = vld [vmem:[%s12496_s15 + $0x338] sm:$0xff] }
0x1787   :  { %v11281_v5 = vsub.f32 %v5083_v33, %v5093_v11  ;;  %v5098_v6 = vsel %vm285_vm4, %v5096_v12, 0.0  ;;  %v7082_v33 = vld [vmem:[%s12496_s15 + $0x230] sm:$0xff]  ;;  %v7131_v11 = vld [vmem:[%s12496_s15 + $0x3b8] sm:$0xff] }
0x1788   :  { %5099 = vadd.xlane.f32.xlu0 %v5098_v6  ;;  %v8910_v6 = vpack.c.bf16 %v7096_v26, %v7080_v59  ;;  %v8920_v8 = vpack.c.bf16 %v7131_v11, %v7115_v2  ;;  %v7104_v59 = vld [vmem:[%s12496_s15 + $0x2e0] sm:$0xff] }
0x1789   :  { %v5097_v20 = vmul.f32 %v11281_v5, %v11281_v5 }
0x178b   :  { %v5101_v4 = vsel %vm285_vm4, %v5097_v20, 0.0  ;;  %v8918_v20 = vpack.c.bf16 %v7098_v10, %v7082_v33  ;;  %v7121_v10 = vld [vmem:[%s12496_s15 + $0x368] sm:$0xff] }
0x178c   :  { %5102 = vadd.xlane.f32.xlu1 %v5101_v4  ;;  %v7112_v4 = vld [vmem:[%s12496_s15 + $0x320] sm:$0xff] }
0x178d   :  { %v8914_v50 = vpack.c.bf16 %v7128_v29, %v7112_v4  ;;  %v7138_v4 = vld [vmem:[%s12496_s15 + $0x3f0] sm:$0xff] }
0x1815   :  { %v5100_v46 = vpop.xlane.xlu0 %5099 }
0x1816   :  { %v5104_v47 = vmul.f32 0.03125, %v5100_v46  ;;  %v8928_v46 = vpack.c.bf16 %v7133_v0, %v7117_v3  ;;  %v7160_v0 = vld [vmem:[%s12498_s17 + $0x810] sm:$0xff] }
0x1818   :  { %v5106_v14 = vadd.f32 1e-05, %v5104_v47  ;;  %v8936_v47 = vpack.c.bf16 %v7135_v23, %v7119_v24  ;;  %v7161_v24 = vld [vmem:[%s12498_s17 + $0x818] sm:$0xff]  ;;  %v8960_v23 = vpack.c.bf16 %v7177_v35, %v7176_v53  ;;  %v7168_v53 = vld [vmem:[%s12498_s17 + $0x850] sm:$0xff] }
0x1819   :  { %v5103_v15 = vpop.xlane.xlu1 %5102  ;;  %v7169_v35 = vld [vmem:[%s12498_s17 + $0x858] sm:$0xff] }
0x181a   :  { %9413 = vrsqrt.f32 %v5106_v14  ;;  %v5105_v21 = vmul.f32 0.03125, %v5103_v15  ;;  %v7089_v14 = vld [vmem:[%s12496_s15 + $0x268] sm:$0xff] }
0x181b   :  { %v7105_v15 = vld [vmem:[%s12496_s15 + $0x2e8] sm:$0xff] }
0x181c   :  { %v5107_v45 = vadd.f32 1e-05, %v5105_v21  ;;  %v7091_v21 = vld [vmem:[%s12496_s15 + $0x278] sm:$0xff]  ;;  %v8940_v26 = vpack.c.bf16 %v7105_v15, %v7089_v14  ;;  %v7162_v15 = vld [vmem:[%s12498_s17 + $0x820] sm:$0xff] }
0x181e   :  { %9415 = vrsqrt.f32 %v5107_v45  ;;  %v7107_v45 = vld [vmem:[%s12496_s15 + $0x2f8] sm:$0xff] }
0x181f   :  { %v8948_v33 = vpack.c.bf16 %v7107_v45, %v7091_v21  ;;  %v7163_v21 = vld [vmem:[%s12498_s17 + $0x828] sm:$0xff] }
0x1824   :  { %v9414_v38 = vpop.eup %9413 }
0x1825   :  { %v5110_v22 = vmul.f32 %v9414_v38, %v11277_v1  ;;  %v7129_v1 = vld [vmem:[%s12496_s15 + $0x3a8] sm:$0xff]  ;;  %v7088_v38 = vld [vmem:[%s12496_s15 + $0x260] sm:$0xff] }
0x1826   :  { %v8912_v56 = vpack.c.bf16 %v7129_v1, %v7113_v54  ;;  %v7137_v54 = vld [vmem:[%s12496_s15 + $0x3e8] sm:$0xff]  ;;  %v7139_v1 = vld [vmem:[%s12496_s15 + $0x3f8] sm:$0xff]  ;;  %v8942_v2 = vpack.c.bf16 %v7104_v59, %v7088_v38  ;;  %v7180_v38 = vld [vmem:[%s12498_s17 + $0x8b0] sm:$0xff] }
0x1827   :  { %v5116_v62 = vmul.f32 %v5115_v49, %v5110_v22  ;;  %v7106_v22 = vld [vmem:[%s12496_s15 + $0x2f0] sm:$0xff]  ;;  %v7181_v59 = vld [vmem:[%s12498_s17 + $0x8b8] sm:$0xff] }
0x1828   :  { %v9416_v12 = vpop.eup %9415 }
0x1829   :  { %v11380_v16 = vadd.f32 %v5121_v57, %v5116_v62  ;;  %v5111_v28 = vmul.f32 %v9416_v12, %v11281_v5  ;;  %v7101_v5 = vld [vmem:[%s12496_s15 + $0x2c8] sm:$0xff]  ;;  %v7123_v62 = vld [vmem:[%s12496_s15 + $0x378] sm:$0xff]  ;;  %v7120_v12 = vld [vmem:[%s12496_s15 + $0x360] sm:$0xff] }
0x182a   :  { %v8924_v36 = vpack.c.bf16 %v7101_v5, %v7085_v42  ;;  %v8952_v29 = vpack.c.bf16 %v7139_v1, %v7123_v62  ;;  %v7158_v5 = vld [vmem:[%s12498_s17 + $0x800] sm:$0xff]  ;;  %v8968_v62 = vpack.c.bf16 %v7181_v59, %v7180_v38  ;;  %v7221_v38 = vld [vmem:[%s12498_s17 + $0x9f8] sm:$0xff]  ;;  %v7172_v59 = vld [vmem:[%s12498_s17 + $0x870] sm:$0xff] }
0x182b   :  { %v5117_v17 = vmul.f32 %v5115_v49, %v5111_v28  ;;  %7142 = vmatmul.mubr.msk.f32.vlgmr.msra.gmra.mrb[60].mxu1 %vm285_vm4, %v11380_v16  ;;  %7144 = vmatmul.mubr.msk.f32.vlgmr.msra.gmra.mrb[58].mxu0 %vm285_vm4, %v11380_v16  ;;  %v8938_v49 = vpack.c.bf16 %v7134_v32, %v7118_v44  ;;  %v8944_v28 = vpack.c.bf16 %v7137_v54, %v7121_v10  ;;  %v7179_v44 = vld [vmem:[%s12498_s17 + $0x8a8] sm:$0xff]  ;;  %v7210_v32 = vld [vmem:[%s12498_s17 + $0x9a0] sm:$0xff]  ;;  %v7164_v10 = vld [vmem:[%s12498_s17 + $0x830] sm:$0xff] }
0x182c   :  { %8911 = vmatpush1.bf16.msra.mxu1 %v8910_v6  ;;  %8919 = vmatpush1.bf16.msra.mxu0 %v8918_v20  ;;  %v7136_v6 = vld [vmem:[%s12496_s15 + $0x3e0] sm:$0xff]  ;;  %v7122_v20 = vld [vmem:[%s12496_s15 + $0x370] sm:$0xff]  ;;  %v8964_v45 = vpack.c.bf16 %v7179_v44, %v7178_v19  ;;  %v7165_v54 = vld [vmem:[%s12498_s17 + $0x838] sm:$0xff] }
0x182d   :  { %v11411_v52 = vadd.f32 %v5121_v57, %v5117_v17  ;;  %5350 = vmatprep.mubr.f32.mxu1 %v9451_v27  ;;  %5427 = vmatprep.mubr.f32.mxu0 %v9451_v27  ;;  %v7090_v57 = vld [vmem:[%s12496_s15 + $0x270] sm:$0xff]  ;;  %v8946_v42 = vpack.c.bf16 %v7136_v6, %v7120_v12  ;;  %v8954_v17 = vpack.c.bf16 %v7138_v4, %v7122_v20  ;;  %v7182_v12 = vld [vmem:[%s12498_s17 + $0x8c0] sm:$0xff]  ;;  %v7183_v6 = vld [vmem:[%s12498_s17 + $0x8c8] sm:$0xff] }
0x182e   :  { %8913 = vmatprep.subr.bf16.mxu1 %v8912_v56  ;;  %8921 = vmatprep.subr.bf16.mxu0 %v8920_v8  ;;  %v8950_v11 = vpack.c.bf16 %v7106_v22, %v7090_v57  ;;  %v7206_v56 = vld [vmem:[%s12498_s17 + $0x980] sm:$0xff]  ;;  %v7207_v8 = vld [vmem:[%s12498_s17 + $0x988] sm:$0xff]  ;;  %v7212_v57 = vld [vmem:[%s12498_s17 + $0x9b0] sm:$0xff] }
0x182f   :  { %7143 = vmatmul.mubr.msk.f32.gmra.mrb[62].mxu1 %vm285_vm4, %v11411_v52  ;;  %7145 = vmatmul.mubr.msk.f32.gmra.mrb[60].mxu0 %vm285_vm4, %v11411_v52  ;;  %v7213_v22 = vld [vmem:[%s12498_s17 + $0x9b8] sm:$0xff]  ;;  %v7214_v20 = vld [vmem:[%s12498_s17 + $0x9c0] sm:$0xff]  ;;  %v7215_v4 = vld [vmem:[%s12498_s17 + $0x9c8] sm:$0xff] }
0x1830   :  { %8915 = vmatpush1.bf16.msra.mxu1 %v8914_v50  ;;  %8923 = vmatpush1.bf16.msra.mxu0 %v8922_v41  ;;  %v8988_v50 = vpack.c.bf16 %v7207_v8, %v7206_v56  ;;  %v7190_v41 = vld [vmem:[%s12498_s17 + $0x900] sm:$0xff]  ;;  %v9000_v1 = vpack.c.bf16 %v7213_v22, %v7212_v57  ;;  %v8972_v56 = vpack.c.bf16 %v7183_v6, %v7182_v12  ;;  %v7173_v57 = vld [vmem:[%s12498_s17 + $0x878] sm:$0xff]  ;;  %v7271_v12 = vld [vmem:[%s12498_s17 + $0xb88] sm:$0xff] }
0x1831   :  { %5498 = vmatprep.mubr.f32.mxu1 %v9451_v27  ;;  %5575 = vmatprep.mubr.f32.mxu0 %v9451_v27  ;;  %v8990_v3 = vpack.c.bf16 %v7191_v58, %v7190_v41  ;;  %v9004_v8 = vpack.c.bf16 %v7215_v4, %v7214_v20  ;;  %v8974_v41 = vpack.c.bf16 %v7167_v30, %v7166_v61  ;;  %v7170_v19 = vld [vmem:[%s12498_s17 + $0x860] sm:$0xff]  ;;  %v11743_v20 = vld [vmem:[%s12497_s16 + $0x10] sm:$0xff] }
0x1832   :  { %8925 = vmatprep.subr.bf16.mxu1 %v8924_v36  ;;  %8933 = vmatprep.subr.bf16.mxu0 %v8932_v31  ;;  %v7209_v36 = vld [vmem:[%s12498_s17 + $0x998] sm:$0xff]  ;;  %v8958_v31 = vpack.c.bf16 %v7159_v40, %v7158_v5  ;;  %v7184_v5 = vld [vmem:[%s12498_s17 + $0x8d0] sm:$0xff]  ;;  %v5197_v4 = vrot.slane %v11743_v20, %v9858_v55  ;;  %v5209_v61 = vrot.slane %v11743_v20, %v10342_v9  ;;  %v7222_v30 = vld [vmem:[%s12498_s17 + $0xa00] sm:$0xff] }
0x1833   :  { %7146 = vmatmul.mubr.msk.f32.vlgmr.msra.gmra.mrb[64].mxu1 %vm285_vm4, %v11380_v16  ;;  %7148 = vmatmul.mubr.msk.f32.vlgmr.msra.gmra.mrb[62].mxu0 %vm285_vm4, %v11380_v16  ;;  %v7185_v40 = vld [vmem:[%s12498_s17 + $0x8d8] sm:$0xff] }
0x1834   :  { %8927 = vmatpush1.bf16.msra.mxu1 %v8926_v25  ;;  %8935 = vmatpush1.bf16.msra.mxu0 %v8934_v13  ;;  %v8992_v25 = vpack.c.bf16 %v7209_v36, %v7208_v43  ;;  %v7192_v13 = vld [vmem:[%s12498_s17 + $0x910] sm:$0xff]  ;;  %v8976_v43 = vpack.c.bf16 %v7185_v40, %v7184_v5  ;;  %v7255_v5 = vld [vmem:[%s12498_s17 + $0xb08] sm:$0xff] }
0x1835   :  { %5504 = vmatprep.mubr.f32.mxu1 %v9451_v27  ;;  %5581 = vmatprep.mubr.f32.mxu0 %v9451_v27  ;;  %v8994_v14 = vpack.c.bf16 %v7193_v34, %v7192_v13  ;;  %v8978_v13 = vpack.c.bf16 %v7169_v35, %v7168_v53  ;;  %v7240_v40 = vld [vmem:[%s12498_s17 + $0xa90] sm:$0xff]  ;;  %v7241_v53 = vld [vmem:[%s12498_s17 + $0xa98] sm:$0xff] }
0x1836   :  { %8929 = vmatprep.subr.bf16.mxu1 %v8928_v46  ;;  %8937 = vmatprep.subr.bf16.mxu0 %v8936_v47  ;;  %v7211_v46 = vld [vmem:[%s12498_s17 + $0x9a8] sm:$0xff]  ;;  %v8962_v47 = vpack.c.bf16 %v7161_v24, %v7160_v0  ;;  %v7186_v0 = vld [vmem:[%s12498_s17 + $0x8e0] sm:$0xff]  ;;  %v7272_v35 = vld [vmem:[%s12498_s17 + $0xb90] sm:$0xff] }
0x1837   :  { %7147 = vmatmul.mubr.msk.f32.gmra.mrb[66].mxu1 %vm285_vm4, %v11411_v52  ;;  %7149 = vmatmul.mubr.msk.f32.gmra.mrb[64].mxu0 %vm285_vm4, %v11411_v52  ;;  %v7187_v24 = vld [vmem:[%s12498_s17 + $0x8e8] sm:$0xff] }
0x1838   :  { %8931 = vmatpush1.bf16.msra.mxu1 %v8930_v51  ;;  %8939 = vmatpush1.bf16.msra.mxu0 %v8938_v49  ;;  %v8996_v51 = vpack.c.bf16 %v7211_v46, %v7210_v32  ;;  %v7195_v49 = vld [vmem:[%s12498_s17 + $0x928] sm:$0xff]  ;;  %v8980_v44 = vpack.c.bf16 %v7187_v24, %v7186_v0  ;;  %v11779_v24 = vrot.slane %v11743_v20, %v10359_v18 }
0x1839   :  { %5652 = vmatprep.mubr.f32.mxu1 %v9451_v27  ;;  %5729 = vmatprep.mubr.f32.mxu0 %v9451_v27  ;;  %v7171_v46 = vld [vmem:[%s12498_s17 + $0x868] sm:$0xff] }
0x183a   :  { %8941 = vmatprep.subr.bf16.mxu1 %v8940_v26  ;;  %8949 = vmatprep.subr.bf16.mxu0 %v8948_v33  ;;  %v8966_v26 = vpack.c.bf16 %v7163_v21, %v7162_v15  ;;  %v8982_v15 = vpack.c.bf16 %v7171_v46, %v7170_v19  ;;  %v7225_v46 = vld [vmem:[%s12498_s17 + $0xa18] sm:$0xff] }
0x183b   :  { %7150 = vmatmul.mubr.msk.f32.vlgmr.msra.gmra.mrb[68].mxu1 %vm285_vm4, %v11380_v16  ;;  %7152 = vmatmul.mubr.msk.f32.vlgmr.msra.gmra.mrb[66].mxu0 %vm285_vm4, %v11380_v16 }
0x183c   :  { %8943 = vmatpush1.bf16.msra.mxu1 %v8942_v2  ;;  %8951 = vmatpush1.bf16.msra.mxu0 %v8950_v11  ;;  %v7196_v2 = vld [vmem:[%s12498_s17 + $0x930] sm:$0xff]  ;;  %v7197_v11 = vld [vmem:[%s12498_s17 + $0x938] sm:$0xff] }
0x183d   :  { %5658 = vmatprep.mubr.f32.mxu1 %v9451_v27  ;;  %5735 = vmatprep.mubr.f32.mxu0 %v9451_v27 }
0x183e   :  { %8945 = vmatprep.subr.bf16.mxu1 %v8944_v28  ;;  %8953 = vmatprep.subr.bf16.mxu0 %v8952_v29  ;;  %v8970_v28 = vpack.c.bf16 %v7165_v54, %v7164_v10  ;;  %v9002_v29 = vpack.c.bf16 %v7197_v11, %v7196_v2  ;;  %v7205_v10 = vld [vmem:[%s12498_s17 + $0x978] sm:$0xff]  ;;  %v7270_v2 = vld [vmem:[%s12498_s17 + $0xb80] sm:$0xff] }
0x183f   :  { %7151 = vmatmul.mubr.msk.f32.gmra.mrb[70].mxu1 %vm285_vm4, %v11411_v52  ;;  %7153 = vmatmul.mubr.msk.f32.gmra.mrb[68].mxu0 %vm285_vm4, %v11411_v52  ;;  %v9052_v6 = vpack.c.bf16 %v7271_v12, %v7270_v2 }
0x1840   :  { %8947 = vmatpush1.bf16.msra.mxu1 %v8946_v42  ;;  %8955 = vmatpush1.bf16.msra.mxu0 %v8954_v17  ;;  %v7198_v42 = vld [vmem:[%s12498_s17 + $0x940] sm:$0xff]  ;;  %v7199_v17 = vld [vmem:[%s12498_s17 + $0x948] sm:$0xff] }
0x1841   :  { %5806 = vmatprep.mubr.f32.mxu1 %v9451_v27  ;;  %5883 = vmatprep.mubr.f32.mxu0 %v9451_v27  ;;  %v9006_v58 = vpack.c.bf16 %v7199_v17, %v7198_v42  ;;  %v7254_v17 = vld [vmem:[%s12498_s17 + $0xb00] sm:$0xff] }
0x1842   :  { %8957 = vmatprep.subr.bf16.mxu1 %v8956_v63  ;;  %8989 = vmatprep.subr.bf16.mxu0 %v8988_v50  ;;  %v7216_v63 = vld [vmem:[%s12498_s17 + $0x9d0] sm:$0xff]  ;;  %v7217_v50 = vld [vmem:[%s12498_s17 + $0x9d8] sm:$0xff]  ;;  %v9054_v0 = vpack.c.bf16 %v7255_v5, %v7254_v17  ;;  %v7259_v17 = vld [vmem:[%s12498_s17 + $0xb28] sm:$0xff] }
0x1843   :  { %7154 = vmatmul.mubr.msk.f32.vlgmr.msra.gmra.mrb[72].mxu1 %vm285_vm4, %v11380_v16  ;;  %7156 = vmatmul.mubr.msk.f32.vlgmr.msra.gmra.mrb[70].mxu0 %vm285_vm4, %v11380_v16  ;;  %v9008_v36 = vpack.c.bf16 %v7217_v50, %v7216_v63  ;;  %v7244_v5 = vld [vmem:[%s12498_s17 + $0xab0] sm:$0xff] }
0x1844   :  { %5812 = vmatprep.mubr.f32.mxu1 %v9451_v27  ;;  %5889 = vmatprep.mubr.f32.mxu0 %v9451_v27  ;;  %v7194_v27 = vld [vmem:[%s12498_s17 + $0x920] sm:$0xff] }
0x1845   :  { %8959 = vmatpush3.bf16.msra.mxu1 %v8958_v31  ;;  %8991 = vmatpush3.bf16.msra.mxu0 %v8990_v3  ;;  %v8998_v33 = vpack.c.bf16 %v7195_v49, %v7194_v27  ;;  %v7200_v31 = vld [vmem:[%s12498_s17 + $0x950] sm:$0xff]  ;;  %v7201_v3 = vld [vmem:[%s12498_s17 + $0x958] sm:$0xff] }
0x1846   :  { %8961 = vmatprep.subr.bf16.mxu1 %v8960_v23  ;;  %8993 = vmatprep.subr.bf16.mxu0 %v8992_v25  ;;  %v7218_v23 = vld [vmem:[%s12498_s17 + $0x9e0] sm:$0xff]  ;;  %v7219_v25 = vld [vmem:[%s12498_s17 + $0x9e8] sm:$0xff]  ;;  %v9010_v34 = vpack.c.bf16 %v7201_v3, %v7200_v31  ;;  %v7220_v27 = vld [vmem:[%s12498_s17 + $0x9f0] sm:$0xff] }
0x1847   :  { %7155 = vmatmul.mubr.msk.f32.gmra.mrb[74].mxu1 %vm285_vm4, %v11411_v52  ;;  %7157 = vmatmul.mubr.msk.f32.gmra.mrb[72].mxu0 %vm285_vm4, %v11411_v52  ;;  %v9012_v32 = vpack.c.bf16 %v7219_v25, %v7218_v23  ;;  %v9016_v22 = vpack.c.bf16 %v7221_v38, %v7220_v27  ;;  %v7224_v23 = vld [vmem:[%s12498_s17 + $0xa10] sm:$0xff]  ;;  %v7242_v38 = vld [vmem:[%s12498_s17 + $0xaa0] sm:$0xff] }
0x1848   :  { %v9026_v12 = vpack.c.bf16 %v7225_v46, %v7224_v23  ;;  %v7229_v23 = vld [vmem:[%s12498_s17 + $0xa38] sm:$0xff]  ;;  %v7246_v46 = vld [vmem:[%s12498_s17 + $0xac0] sm:$0xff] }
0x1849   :  { %8963 = vmatpush3.bf16.msra.mxu1 %v8962_v47  ;;  %8995 = vmatpush3.bf16.msra.mxu0 %v8994_v14  ;;  %v7202_v47 = vld [vmem:[%s12498_s17 + $0x960] sm:$0xff]  ;;  %v7203_v14 = vld [vmem:[%s12498_s17 + $0x968] sm:$0xff] }
0x184a   :  { %8965 = vmatprep.subr.bf16.mxu1 %v8964_v45  ;;  %8997 = vmatprep.subr.bf16.mxu0 %v8996_v51  ;;  %v9014_v21 = vpack.c.bf16 %v7203_v14, %v7202_v47  ;;  %v7188_v45 = vld [vmem:[%s12498_s17 + $0x8f0] sm:$0xff]  ;;  %v7189_v51 = vld [vmem:[%s12498_s17 + $0x8f8] sm:$0xff] }
0x184b   :  { %v8984_v49 = vpack.c.bf16 %v7189_v51, %v7188_v45  ;;  %v7256_v47 = vld [vmem:[%s12498_s17 + $0xb10] sm:$0xff] }
0x184d   :  { %8967 = vmatpush3.bf16.msra.mxu1 %v8966_v26  ;;  %8999 = vmatpush3.bf16.msra.mxu0 %v8998_v33  ;;  %v8986_v26 = vpack.c.bf16 %v7173_v57, %v7172_v59  ;;  %v7204_v33 = vld [vmem:[%s12498_s17 + $0x970] sm:$0xff] }
0x184e   :  { %8969 = vmatprep.subr.bf16.mxu1 %v8968_v62  ;;  %9001 = vmatprep.subr.bf16.mxu0 %v9000_v1  ;;  %v9018_v54 = vpack.c.bf16 %v7205_v10, %v7204_v33  ;;  %v7238_v62 = vld [vmem:[%s12498_s17 + $0xa80] sm:$0xff]  ;;  %v7239_v1 = vld [vmem:[%s12498_s17 + $0xa88] sm:$0xff] }
0x184f   :  { %v9020_v11 = vpack.c.bf16 %v7239_v1, %v7238_v62  ;;  %v7274_v33 = vld [vmem:[%s12498_s17 + $0xba0] sm:$0xff]  ;;  %v7275_v10 = vld [vmem:[%s12498_s17 + $0xba8] sm:$0xff] }
0x1851   :  { %8971 = vmatpush3.bf16.msra.mxu1 %v8970_v28  ;;  %9003 = vmatpush3.bf16.msra.mxu0 %v9002_v29  ;;  %v5205_v28 = vrot.slane %v11743_v20, %v10334_v7  ;;  %v5201_v29 = vrot.slane %v11743_v20, %v9864_v60 }
0x1852   :  { %8973 = vmatprep.subr.bf16.mxu1 %v8972_v56  ;;  %9005 = vmatprep.subr.bf16.mxu0 %v9004_v8  ;;  %v7223_v56 = vld [vmem:[%s12498_s17 + $0xa08] sm:$0xff] }
0x1853   :  { %v9022_v3 = vpack.c.bf16 %v7223_v56, %v7222_v30 }
0x1855   :  { %8975 = vmatpush3.bf16.msra.mxu1 %v8974_v41  ;;  %9007 = vmatpush3.bf16.msra.mxu0 %v9006_v58 }
0x1856   :  { %8977 = vmatprep.subr.bf16.mxu1 %v8976_v43  ;;  %9009 = vmatprep.subr.bf16.mxu0 %v9008_v36  ;;  %v7273_v43 = vld [vmem:[%s12498_s17 + $0xb98] sm:$0xff] }
0x1859   :  { %8979 = vmatpush3.bf16.msra.mxu1 %v8978_v13  ;;  %9011 = vmatpush3.bf16.msra.mxu0 %v9010_v34 }
0x185a   :  { %8981 = vmatprep.subr.bf16.mxu1 %v8980_v44  ;;  %9013 = vmatprep.subr.bf16.mxu0 %v9012_v32  ;;  %v9024_v44 = vpack.c.bf16 %v7241_v53, %v7240_v40  ;;  %v9056_v32 = vpack.c.bf16 %v7273_v43, %v7272_v35 }
0x185d   :  { %8983 = vmatpush3.bf16.msra.mxu1 %v8982_v15  ;;  %9015 = vmatpush3.bf16.msra.mxu0 %v9014_v21 }
0x185e   :  { %8985 = vmatprep.subr.bf16.mxu1 %v8984_v49  ;;  %9017 = vmatprep.subr.bf16.mxu0 %v9016_v22  ;;  %v7257_v49 = vld [vmem:[%s12498_s17 + $0xb18] sm:$0xff]  ;;  %v11798_v22 = vrot.slane %v11743_v20, %v10380_v37 }
0x1861   :  { %8987 = vmatpush3.bf16.msra.mxu1 %v8986_v26  ;;  %9019 = vmatpush3.bf16.msra.mxu0 %v9018_v54  ;;  %v7243_v26 = vld [vmem:[%s12498_s17 + $0xaa8] sm:$0xff]  ;;  %v7226_v54 = vld [vmem:[%s12498_s17 + $0xa20] sm:$0xff] }
0x1862   :  { %9021 = vmatprep.subr.bf16.mxu1 %v9020_v11  ;;  %9053 = vmatprep.subr.bf16.mxu0 %v9052_v6  ;;  %v9058_v6 = vpack.c.bf16 %v7257_v49, %v7256_v47  ;;  %v7247_v47 = vld [vmem:[%s12498_s17 + $0xac8] sm:$0xff]  ;;  %v7230_v49 = vld [vmem:[%s12498_s17 + $0xa40] sm:$0xff] }
0x18fe   :  { %v5346_v8 = vpop.f32.mrb[60].mxu1  ;;  %v5423_v42 = vpop.f32.mrb[58].mxu0 }
0x18ff   :  { %v5347_v63 = vadd.f32 %v5346_v8, %v5197_v4  ;;  %v5424_v50 = vadd.f32 %v5423_v42, %v5205_v28  ;;  %v5348_v41 = vpop.f32.mrb[61].mxu1  ;;  %v5425_v58 = vpop.f32.mrb[59].mxu0  ;;  %v9028_v8 = vpack.c.bf16 %v7243_v26, %v7242_v38  ;;  %v9060_v42 = vpack.c.bf16 %v7275_v10, %v7274_v33  ;;  %v7231_v38 = vld [vmem:[%s12498_s17 + $0xa48] sm:$0xff]  ;;  %v7262_v10 = vld [vmem:[%s12498_s17 + $0xb40] sm:$0xff] }
0x1900   :  { %v5349_v36 = vadd.f32 %v5348_v41, %v5201_v29  ;;  %v5426_v31 = vadd.f32 %v5425_v58, %v5209_v61  ;;  %v7276_v41 = vld [vmem:[%s12498_s17 + $0xbb0] sm:$0xff]  ;;  %v7277_v58 = vld [vmem:[%s12498_s17 + $0xbb8] sm:$0xff]  ;;  %v9036_v26 = vpack.c.bf16 %v7247_v47, %v7246_v46  ;;  %v7266_v47 = vld [vmem:[%s12498_s17 + $0xb60] sm:$0xff] }
0x1901   :  { %v5896_v14 = vmax.f32 %v5347_v63, 0.0  ;;  %v5898_v15 = vmax.f32 %v5424_v50, 0.0  ;;  %v7245_v50 = vld [vmem:[%s12498_s17 + $0xab8] sm:$0xff] }
0x1902   :  { %v5897_v25 = vmax.f32 %v5349_v36, 0.0  ;;  %v5899_v13 = vmax.f32 %v5426_v31, 0.0  ;;  %v5352_v34 = vpop.f32.mrb[62].mxu1  ;;  %v5429_v19 = vpop.f32.mrb[60].mxu0 }
0x1903   :  { %v5353_v21 = vadd.f32 %v5352_v34, %v5197_v4  ;;  %v5430_v45 = vadd.f32 %v5429_v19, %v5205_v28  ;;  %v5354_v51 = vpop.f32.mrb[63].mxu1  ;;  %v5431_v27 = vpop.f32.mrb[61].mxu0  ;;  %v7227_v4 = vld [vmem:[%s12498_s17 + $0xa28] sm:$0xff]  ;;  %v7258_v28 = vld [vmem:[%s12498_s17 + $0xb20] sm:$0xff]  ;;  %v9032_v34 = vpack.c.bf16 %v7245_v50, %v7244_v5  ;;  %v9064_v19 = vpack.c.bf16 %v7277_v58, %v7276_v41 }
0x1904   :  { %v5355_v59 = vadd.f32 %v5354_v51, %v5201_v29  ;;  %v5432_v57 = vadd.f32 %v5431_v27, %v5209_v61  ;;  %6257 = vmatprep.mubr.f32.mxu1 %v5897_v25  ;;  %6332 = vmatprep.mubr.f32.mxu0 %v5899_v13  ;;  %v9030_v31 = vpack.c.bf16 %v7227_v4, %v7226_v54  ;;  %v7263_v54 = vld [vmem:[%s12498_s17 + $0xb48] sm:$0xff]  ;;  %v7250_v50 = vld [vmem:[%s12498_s17 + $0xae0] sm:$0xff] }
0x1905   :  { %6258 = vmatmul.mubr.f32.vlgmr.msra.gmra.mrb[76].mxu1 %v5896_v14  ;;  %6333 = vmatmul.mubr.f32.vlgmr.msra.gmra.mrb[74].mxu0 %v5898_v15  ;;  %v5912_v29 = vmax.f32 %v5353_v21, 0.0  ;;  %v5914_v61 = vmax.f32 %v5430_v45, 0.0  ;;  %v7278_v14 = vld [vmem:[%s12498_s17 + $0xbc0] sm:$0xff]  ;;  %v7279_v15 = vld [vmem:[%s12498_s17 + $0xbc8] sm:$0xff] }
0x1906   :  { %v5913_v62 = vmax.f32 %v5355_v59, 0.0  ;;  %v5915_v1 = vmax.f32 %v5432_v57, 0.0  ;;  %9023 = vmatpush3.bf16.msra.mxu1 %v9022_v3  ;;  %9055 = vmatpush3.bf16.msra.mxu0 %v9054_v0  ;;  %v11812_v2 = vpop.f32.mrb[64].mxu1  ;;  %v11814_v11 = vpop.f32.mrb[62].mxu0  ;;  %v9062_v3 = vpack.c.bf16 %v7259_v17, %v7258_v28  ;;  %v7228_v0 = vld [vmem:[%s12498_s17 + $0xa30] sm:$0xff]  ;;  %v9068_v33 = vpack.c.bf16 %v7279_v15, %v7278_v14  ;;  %v7251_v41 = vld [vmem:[%s12498_s17 + $0xae8] sm:$0xff] }
0x1907   :  { %v5502_v30 = vpop.f32.mrb[65].mxu1  ;;  %v5579_v56 = vpop.f32.mrb[63].mxu0  ;;  %9025 = vmatprep.subr.bf16.mxu1 %v9024_v44  ;;  %9057 = vmatprep.subr.bf16.mxu0 %v9056_v32  ;;  %v7260_v44 = vld [vmem:[%s12498_s17 + $0xb30] sm:$0xff]  ;;  %v7261_v32 = vld [vmem:[%s12498_s17 + $0xb38] sm:$0xff]  ;;  %v9034_v51 = vpack.c.bf16 %v7229_v23, %v7228_v0  ;;  %v7282_v58 = vld [vmem:[%s12498_s17 + $0xbe0] sm:$0xff] }
0x1908   :  { %v5503_v40 = vadd.f32 %v5502_v30, %v11779_v24  ;;  %v5580_v63 = vadd.f32 %v5579_v56, %v11798_v22  ;;  %6262 = vmatprep.mubr.f32.mxu1 %v5913_v62  ;;  %6337 = vmatprep.mubr.f32.mxu0 %v5915_v1  ;;  %v9066_v27 = vpack.c.bf16 %v7261_v32, %v7260_v44  ;;  %v7248_v62 = vld [vmem:[%s12498_s17 + $0xad0] sm:$0xff]  ;;  %v7249_v1 = vld [vmem:[%s12498_s17 + $0xad8] sm:$0xff]  ;;  %v7234_v23 = vld [vmem:[%s12498_s17 + $0xa60] sm:$0xff] }
0x1909   :  { %6263 = vmatmul.mubr.f32.gmra.mrb[78].mxu1 %v5912_v29  ;;  %6338 = vmatmul.mubr.f32.gmra.mrb[76].mxu0 %v5914_v61  ;;  %v9038_v29 = vpack.c.bf16 %v7231_v38, %v7230_v49  ;;  %v9070_v61 = vpack.c.bf16 %v7263_v54, %v7262_v10  ;;  %v7232_v30 = vld [vmem:[%s12498_s17 + $0xa50] sm:$0xff]  ;;  %v7233_v56 = vld [vmem:[%s12498_s17 + $0xa58] sm:$0xff]  ;;  %v9040_v17 = vpack.c.bf16 %v7249_v1, %v7248_v62  ;;  %v7267_v14 = vld [vmem:[%s12498_s17 + $0xb68] sm:$0xff] }
0x190a   :  { %v5901_v53 = vmax.f32 %v5503_v40, 0.0  ;;  %v5903_v35 = vmax.f32 %v5580_v63, 0.0  ;;  %9027 = vmatpush3.bf16.msra.mxu1 %v9026_v12  ;;  %9059 = vmatpush3.bf16.msra.mxu0 %v9058_v6  ;;  %v11839_v43 = vpop.f32.mrb[66].mxu1  ;;  %v11841_v36 = vpop.f32.mrb[64].mxu0  ;;  %v7280_v12 = vld [vmem:[%s12498_s17 + $0xbd0] sm:$0xff]  ;;  %v7281_v6 = vld [vmem:[%s12498_s17 + $0xbd8] sm:$0xff]  ;;  %v9044_v32 = vpack.c.bf16 %v7251_v41, %v7250_v50  ;;  %v5213_v38 = vrot.slane %v11743_v20, %v10541_v39 }
0x190b   :  { %v11849_v25 = vpop.f32.mrb[67].mxu1  ;;  %v11851_v13 = vpop.f32.mrb[65].mxu0  ;;  %9029 = vmatprep.subr.bf16.mxu1 %v9028_v8  ;;  %9061 = vmatprep.subr.bf16.mxu0 %v9060_v42  ;;  %v9072_v5 = vpack.c.bf16 %v7281_v6, %v7280_v12  ;;  %v7264_v40 = vld [vmem:[%s12498_s17 + $0xb50] sm:$0xff]  ;;  %v7265_v63 = vld [vmem:[%s12498_s17 + $0xb58] sm:$0xff]  ;;  %v9078_v54 = vpack.c.bf16 %v7267_v14, %v7266_v47  ;;  %v5221_v6 = vrot.slane %v11743_v20, %v10554_v48  ;;  %v7303_v20 = vld [vmem:[%s12498_s17 + $0xc88] sm:$0xff] }
0x190c   :  { %6407 = vmatprep.mubr.f32.mxu1 %v5901_v53  ;;  %6482 = vmatprep.mubr.f32.mxu0 %v5903_v35  ;;  %v7283_v53 = vld [vmem:[%s12498_s17 + $0xbe8] sm:$0xff]  ;;  %v9074_v0 = vpack.c.bf16 %v7265_v63, %v7264_v40  ;;  %v7252_v15 = vld [vmem:[%s12498_s17 + $0xaf0] sm:$0xff]  ;;  %v7285_v49 = vld [vmem:[%s12498_s17 + $0xbf8] sm:$0xff] }
0x190d   :  { %v9076_v46 = vpack.c.bf16 %v7283_v53, %v7282_v58  ;;  %v7236_v62 = vld [vmem:[%s12498_s17 + $0xa70] sm:$0xff]  ;;  %v7237_v1 = vld [vmem:[%s12498_s17 + $0xa78] sm:$0xff]  ;;  %v7334_v40 = vld [vmem:[%s12498_s17 + $0xd80] sm:$0xff]  ;;  %v5578_v47 = vadd.f32 %v11814_v11, %v5221_v6  ;;  %v5586_v11 = vadd.f32 %v11851_v13, %v11798_v22  ;;  %v5584_v22 = vadd.f32 %v11841_v36, %v5221_v6 }
0x190e   :  { %9031 = vmatpush3.bf16.msra.mxu1 %v9030_v31  ;;  %9063 = vmatpush3.bf16.msra.mxu0 %v9062_v3  ;;  %v11871_v21 = vpop.f32.mrb[68].mxu1  ;;  %v11873_v45 = vpop.f32.mrb[66].mxu0  ;;  %v9042_v3 = vpack.c.bf16 %v7233_v56, %v7232_v30  ;;  %v7268_v12 = vld [vmem:[%s12498_s17 + $0xb70] sm:$0xff]  ;;  %v7335_v63 = vld [vmem:[%s12498_s17 + $0xd88] sm:$0xff]  ;;  %v12006_v50 = vld [vmem:[%s12497_s16 + $0x18] sm:$0xff]  ;;  %v9050_v53 = vpack.c.bf16 %v7237_v1, %v7236_v62 }
0x190f   :  { %v11881_v59 = vpop.f32.mrb[69].mxu1  ;;  %v11883_v57 = vpop.f32.mrb[67].mxu0  ;;  %9033 = vmatprep.subr.bf16.mxu1 %v9032_v34  ;;  %9065 = vmatprep.subr.bf16.mxu0 %v9064_v19  ;;  %v7235_v34 = vld [vmem:[%s12498_s17 + $0xa68] sm:$0xff]  ;;  %v7286_v41 = vld [vmem:[%s12498_s17 + $0xc00] sm:$0xff]  ;;  %v9116_v14 = vpack.c.bf16 %v7335_v63, %v7334_v40  ;;  %v7320_v36 = vld [vmem:[%s12498_s17 + $0xd10] sm:$0xff]  ;;  %v5918_v63 = vmax.f32 %v5584_v22, 0.0 }
0x1910   :  { %v9046_v10 = vpack.c.bf16 %v7235_v34, %v7234_v23  ;;  %v7287_v58 = vld [vmem:[%s12498_s17 + $0xc08] sm:$0xff]  ;;  %v7318_v23 = vld [vmem:[%s12498_s17 + $0xd00] sm:$0xff] }
0x1911   :  { %v7319_v34 = vld [vmem:[%s12498_s17 + $0xd08] sm:$0xff]  ;;  %v7306_v6 = vld [vmem:[%s12498_s17 + $0xca0] sm:$0xff] }
0x1912   :  { %9035 = vmatpush3.bf16.msra.mxu1 %v9034_v51  ;;  %9067 = vmatpush3.bf16.msra.mxu0 %v9066_v27  ;;  %v11903_v4 = vpop.f32.mrb[70].mxu1  ;;  %v11905_v28 = vpop.f32.mrb[68].mxu0  ;;  %v7253_v51 = vld [vmem:[%s12498_s17 + $0xaf8] sm:$0xff]  ;;  %v7284_v27 = vld [vmem:[%s12498_s17 + $0xbf0] sm:$0xff]  ;;  %v9118_v62 = vpack.c.bf16 %v7319_v34, %v7318_v23  ;;  %v7311_v22 = vld [vmem:[%s12498_s17 + $0xcc8] sm:$0xff] }
0x1913   :  { %v11913_v8 = vpop.f32.mrb[71].mxu1  ;;  %v11915_v42 = vpop.f32.mrb[69].mxu0  ;;  %9037 = vmatprep.subr.bf16.mxu1 %v9036_v26  ;;  %9069 = vmatprep.subr.bf16.mxu0 %v9068_v33  ;;  %v9048_v30 = vpack.c.bf16 %v7253_v51, %v7252_v15  ;;  %v9080_v56 = vpack.c.bf16 %v7285_v49, %v7284_v27  ;;  %v7305_v15 = vld [vmem:[%s12498_s17 + $0xc98] sm:$0xff]  ;;  %v7336_v51 = vld [vmem:[%s12498_s17 + $0xd90] sm:$0xff]  ;;  %v12040_v49 = vrot.slane %v12006_v50, %v9864_v60 }
0x1914   :  { %v7337_v27 = vld [vmem:[%s12498_s17 + $0xd98] sm:$0xff] }
0x1916   :  { %9039 = vmatpush3.bf16.msra.mxu1 %v9038_v29  ;;  %9071 = vmatpush3.bf16.msra.mxu0 %v9070_v61  ;;  %v11935_v35 = vpop.f32.mrb[72].mxu1  ;;  %v11937_v31 = vpop.f32.mrb[70].mxu0 }
0x1917   :  { %v11945_v19 = vpop.f32.mrb[73].mxu1  ;;  %v11947_v44 = vpop.f32.mrb[71].mxu0  ;;  %9041 = vmatprep.subr.bf16.mxu1 %v9040_v17  ;;  %9073 = vmatprep.subr.bf16.mxu0 %v9072_v5  ;;  %v7269_v17 = vld [vmem:[%s12498_s17 + $0xb78] sm:$0xff]  ;;  %v7302_v5 = vld [vmem:[%s12498_s17 + $0xc80] sm:$0xff] }
0x191a   :  { %9043 = vmatpush3.bf16.msra.mxu1 %v9042_v3  ;;  %9075 = vmatpush3.bf16.msra.mxu0 %v9074_v0  ;;  %v11969_v26 = vpop.f32.mrb[74].mxu1  ;;  %v11971_v33 = vpop.f32.mrb[72].mxu0  ;;  %v9082_v3 = vpack.c.bf16 %v7269_v17, %v7268_v12  ;;  %v9084_v0 = vpack.c.bf16 %v7303_v20, %v7302_v5  ;;  %v9120_v12 = vpack.c.bf16 %v7337_v27, %v7336_v51  ;;  %v5919_v17 = vmax.f32 %v5586_v11, 0.0  ;;  %v7339_v20 = vld [vmem:[%s12498_s17 + $0xda8] sm:$0xff]  ;;  %v7340_v51 = vld [vmem:[%s12498_s17 + $0xdb0] sm:$0xff]  ;;  %v7341_v27 = vld [vmem:[%s12498_s17 + $0xdb8] sm:$0xff] }
0x191b   :  { %v11984_v29 = vpop.f32.mrb[75].mxu1  ;;  %v11986_v61 = vpop.f32.mrb[73].mxu0  ;;  %9045 = vmatprep.subr.bf16.mxu1 %v9044_v32  ;;  %9077 = vmatprep.subr.bf16.mxu0 %v9076_v46  ;;  %v7304_v32 = vld [vmem:[%s12498_s17 + $0xc90] sm:$0xff]  ;;  %v5501_v46 = vadd.f32 %v11812_v2, %v5213_v38  ;;  %v5509_v2 = vadd.f32 %v11849_v25, %v11779_v24  ;;  %v5507_v24 = vadd.f32 %v11839_v43, %v5213_v38  ;;  %v7321_v38 = vld [vmem:[%s12498_s17 + $0xd18] sm:$0xff] }
0x191c   :  { %v9088_v1 = vpack.c.bf16 %v7305_v15, %v7304_v32  ;;  %v7288_v25 = vld [vmem:[%s12498_s17 + $0xc10] sm:$0xff]  ;;  %v5657_v5 = vadd.f32 %v11881_v59, %v12040_v49  ;;  %v7307_v59 = vld [vmem:[%s12498_s17 + $0xca8] sm:$0xff]  ;;  %v7309_v15 = vld [vmem:[%s12498_s17 + $0xcb8] sm:$0xff] }
0x191d   :  { %v5917_v13 = vmax.f32 %v5509_v2, 0.0  ;;  %v5916_v40 = vmax.f32 %v5507_v24, 0.0  ;;  %v9092_v34 = vpack.c.bf16 %v7307_v59, %v7306_v6  ;;  %v7310_v24 = vld [vmem:[%s12498_s17 + $0xcc0] sm:$0xff]  ;;  %v7327_v59 = vld [vmem:[%s12498_s17 + $0xd48] sm:$0xff] }
0x191e   :  { %9047 = vmatpush3.bf16.msra.mxu1 %v9046_v10  ;;  %9079 = vmatpush3.bf16.msra.mxu0 %v9078_v54  ;;  %v12044_v10 = vrot.slane %v12006_v50, %v10342_v9  ;;  %v9086_v54 = vpack.c.bf16 %v7287_v58, %v7286_v41  ;;  %v7289_v9 = vld [vmem:[%s12498_s17 + $0xc18] sm:$0xff]  ;;  %v9122_v58 = vpack.c.bf16 %v7321_v38, %v7320_v36  ;;  %v7326_v6 = vld [vmem:[%s12498_s17 + $0xd40] sm:$0xff] }
0x191f   :  { %9049 = vmatprep.subr.bf16.mxu1 %v9048_v30  ;;  %9081 = vmatprep.subr.bf16.mxu0 %v9080_v56  ;;  %v5900_v30 = vmax.f32 %v5501_v46, 0.0  ;;  %v5902_v56 = vmax.f32 %v5578_v47, 0.0  ;;  %v9090_v41 = vpack.c.bf16 %v7289_v9, %v7288_v25  ;;  %v7322_v46 = vld [vmem:[%s12498_s17 + $0xd20] sm:$0xff]  ;;  %v7323_v47 = vld [vmem:[%s12498_s17 + $0xd28] sm:$0xff]  ;;  %v9100_v36 = vpack.c.bf16 %v7311_v22, %v7310_v24  ;;  %v7348_v24 = vld [vmem:[%s12498_s17 + $0xdf0] sm:$0xff] }
0x1920   :  { %v5734_v43 = vadd.f32 %v11883_v57, %v12044_v10  ;;  %v7338_v57 = vld [vmem:[%s12498_s17 + $0xda0] sm:$0xff]  ;;  %v9126_v11 = vpack.c.bf16 %v7323_v47, %v7322_v46  ;;  %v7343_v9 = vld [vmem:[%s12498_s17 + $0xdc8] sm:$0xff]  ;;  %v7349_v22 = vld [vmem:[%s12498_s17 + $0xdf8] sm:$0xff] }
0x1921   :  { %v9124_v32 = vpack.c.bf16 %v7339_v20, %v7338_v57  ;;  %v7342_v25 = vld [vmem:[%s12498_s17 + $0xdc0] sm:$0xff]  ;;  %v7312_v57 = vld [vmem:[%s12498_s17 + $0xcd0] sm:$0xff]  ;;  %v7313_v20 = vld [vmem:[%s12498_s17 + $0xcd8] sm:$0xff] }
0x1922   :  { %9051 = vmatpush3.bf16.msra.mxu1 %v9050_v53  ;;  %9083 = vmatpush3.bf16.msra.mxu0 %v9082_v3  ;;  %v7290_v53 = vld [vmem:[%s12498_s17 + $0xc20] sm:$0xff]  ;;  %v7291_v3 = vld [vmem:[%s12498_s17 + $0xc28] sm:$0xff]  ;;  %v5907_v23 = vmax.f32 %v5734_v43, 0.0  ;;  %v9132_v38 = vpack.c.bf16 %v7343_v9, %v7342_v25  ;;  %v5229_v25 = vrot.slane %v12006_v50, %v9858_v55 }
0x1923   :  { %9085 = vmatprep.subr.bf16.mxu1 %v9084_v0  ;;  %9117 = vmatprep.subr.bf16.mxu0 %v9116_v14  ;;  %v5905_v0 = vmax.f32 %v5657_v5, 0.0  ;;  %v7308_v14 = vld [vmem:[%s12498_s17 + $0xcb0] sm:$0xff]  ;;  %v9094_v2 = vpack.c.bf16 %v7291_v3, %v7290_v53  ;;  %v7294_v5 = vld [vmem:[%s12498_s17 + $0xc40] sm:$0xff]  ;;  %v7295_v43 = vld [vmem:[%s12498_s17 + $0xc48] sm:$0xff] }
0x1924   :  { %v7296_v53 = vld [vmem:[%s12498_s17 + $0xc50] sm:$0xff]  ;;  %v7297_v3 = vld [vmem:[%s12498_s17 + $0xc58] sm:$0xff]  ;;  %v7314_v46 = vld [vmem:[%s12498_s17 + $0xce0] sm:$0xff] }
0x1925   :  { %6408 = vmatmul.mubr.f32.vlgmr.msra.gmra.mrb[80].mxu1 %v5900_v30  ;;  %6483 = vmatmul.mubr.f32.vlgmr.msra.gmra.mrb[78].mxu0 %v5902_v56  ;;  %v7324_v30 = vld [vmem:[%s12498_s17 + $0xd30] sm:$0xff]  ;;  %v7325_v56 = vld [vmem:[%s12498_s17 + $0xd38] sm:$0xff]  ;;  %v7315_v47 = vld [vmem:[%s12498_s17 + $0xce8] sm:$0xff] }
0x1926   :  { %6412 = vmatprep.mubr.f32.mxu1 %v5917_v13  ;;  %6487 = vmatprep.mubr.f32.mxu0 %v5919_v17  ;;  %v9130_v17 = vpack.c.bf16 %v7325_v56, %v7324_v30  ;;  %v7316_v30 = vld [vmem:[%s12498_s17 + $0xcf0] sm:$0xff]  ;;  %v7317_v56 = vld [vmem:[%s12498_s17 + $0xcf8] sm:$0xff] }
0x1927   :  { %9087 = vmatpush3.bf16.msra.mxu1 %v9086_v54  ;;  %9119 = vmatpush3.bf16.msra.mxu0 %v9118_v62  ;;  %v7292_v54 = vld [vmem:[%s12498_s17 + $0xc30] sm:$0xff]  ;;  %v7293_v62 = vld [vmem:[%s12498_s17 + $0xc38] sm:$0xff] }
0x1928   :  { %9089 = vmatprep.subr.bf16.mxu1 %v9088_v1  ;;  %9121 = vmatprep.subr.bf16.mxu0 %v9120_v12  ;;  %v9096_v1 = vpack.c.bf16 %v7309_v15, %v7308_v14  ;;  %v9128_v12 = vpack.c.bf16 %v7341_v27, %v7340_v51  ;;  %v9098_v13 = vpack.c.bf16 %v7293_v62, %v7292_v54  ;;  %v7346_v14 = vld [vmem:[%s12498_s17 + $0xde0] sm:$0xff]  ;;  %v7347_v15 = vld [vmem:[%s12498_s17 + $0xde8] sm:$0xff] }
0x1929   :  { %6413 = vmatmul.mubr.f32.gmra.mrb[82].mxu1 %v5916_v40  ;;  %6488 = vmatmul.mubr.f32.gmra.mrb[80].mxu0 %v5918_v63  ;;  %v7344_v40 = vld [vmem:[%s12498_s17 + $0xdd0] sm:$0xff]  ;;  %v7345_v63 = vld [vmem:[%s12498_s17 + $0xdd8] sm:$0xff]  ;;  %v9106_v51 = vpack.c.bf16 %v7297_v3, %v7296_v53  ;;  %v9108_v54 = vpack.c.bf16 %v7315_v47, %v7314_v46  ;;  %v9140_v62 = vpack.c.bf16 %v7347_v15, %v7346_v14 }
0x192a   :  { %6557 = vmatprep.mubr.f32.mxu1 %v5905_v0  ;;  %6632 = vmatprep.mubr.f32.mxu0 %v5907_v23  ;;  %v9104_v0 = vpack.c.bf16 %v7313_v20, %v7312_v57  ;;  %v9136_v23 = vpack.c.bf16 %v7345_v63, %v7344_v40  ;;  %v7366_v57 = vld [vmem:[%s12498_s17 + $0xe80] sm:$0xff]  ;;  %v7367_v20 = vld [vmem:[%s12498_s17 + $0xe88] sm:$0xff]  ;;  %v7369_v14 = vld [vmem:[%s12498_s17 + $0xe98] sm:$0xff] }
0x192b   :  { %9091 = vmatpush3.bf16.msra.mxu1 %v9090_v41  ;;  %9123 = vmatpush3.bf16.msra.mxu0 %v9122_v58  ;;  %v9102_v41 = vpack.c.bf16 %v7295_v43, %v7294_v5  ;;  %v9134_v58 = vpack.c.bf16 %v7327_v59, %v7326_v6  ;;  %v7301_v5 = vld [vmem:[%s12498_s17 + $0xc78] sm:$0xff]  ;;  %v7332_v43 = vld [vmem:[%s12498_s17 + $0xd70] sm:$0xff]  ;;  %v9144_v6 = vpack.c.bf16 %v7349_v22, %v7348_v24  ;;  %v7399_v40 = vld [vmem:[%s12498_s17 + $0xf88] sm:$0xff] }
0x192c   :  { %9093 = vmatprep.subr.bf16.mxu1 %v9092_v34  ;;  %9125 = vmatprep.subr.bf16.mxu0 %v9124_v32  ;;  %v7328_v34 = vld [vmem:[%s12498_s17 + $0xd50] sm:$0xff]  ;;  %v7329_v32 = vld [vmem:[%s12498_s17 + $0xd58] sm:$0xff]  ;;  %v7350_v63 = vld [vmem:[%s12498_s17 + $0xe00] sm:$0xff]  ;;  %v9148_v3 = vpack.c.bf16 %v7367_v20, %v7366_v57 }
0x192d   :  { %v9138_v27 = vpack.c.bf16 %v7329_v32, %v7328_v34  ;;  %v7333_v59 = vld [vmem:[%s12498_s17 + $0xd78] sm:$0xff]  ;;  %v7368_v34 = vld [vmem:[%s12498_s17 + $0xe90] sm:$0xff]  ;;  %v5655_v32 = vadd.f32 %v11871_v21, %v5229_v25  ;;  %v5663_v21 = vadd.f32 %v11913_v8, %v12040_v49  ;;  %v5661_v8 = vadd.f32 %v11903_v4, %v5229_v25  ;;  %v7370_v22 = vld [vmem:[%s12498_s17 + $0xea0] sm:$0xff] }
0x192e   :  { %v9146_v53 = vpack.c.bf16 %v7333_v59, %v7332_v43  ;;  %v7400_v15 = vld [vmem:[%s12498_s17 + $0xf90] sm:$0xff]  ;;  %v7385_v24 = vld [vmem:[%s12498_s17 + $0xf18] sm:$0xff]  ;;  %v7403_v25 = vld [vmem:[%s12498_s17 + $0xfa8] sm:$0xff] }
0x192f   :  { %9095 = vmatpush3.bf16.msra.mxu1 %v9094_v2  ;;  %9127 = vmatpush3.bf16.msra.mxu0 %v9126_v11  ;;  %v7298_v2 = vld [vmem:[%s12498_s17 + $0xc60] sm:$0xff]  ;;  %v7299_v11 = vld [vmem:[%s12498_s17 + $0xc68] sm:$0xff]  ;;  %v5921_v49 = vmax.f32 %v5663_v21, 0.0 }
0x1930   :  { %9097 = vmatprep.subr.bf16.mxu1 %v9096_v1  ;;  %9129 = vmatprep.subr.bf16.mxu0 %v9128_v12  ;;  %v7330_v1 = vld [vmem:[%s12498_s17 + $0xd60] sm:$0xff]  ;;  %v7331_v12 = vld [vmem:[%s12498_s17 + $0xd68] sm:$0xff]  ;;  %v9110_v9 = vpack.c.bf16 %v7299_v11, %v7298_v2  ;;  %v12260_v2 = vrot.slane %v12006_v50, %v10380_v37  ;;  %v7353_v37 = vld [vmem:[%s12498_s17 + $0xe18] sm:$0xff] }
0x1931   :  { %v7354_v43 = vld [vmem:[%s12498_s17 + $0xe20] sm:$0xff]  ;;  %v7407_v21 = vld [vmem:[%s12498_s17 + $0xfc8] sm:$0xff] }
0x1932   :  { %v5888_v4 = vadd.f32 %v11947_v44, %v12260_v2  ;;  %v7402_v44 = vld [vmem:[%s12498_s17 + $0xfa0] sm:$0xff] }
0x1933   :  { %9099 = vmatpush3.bf16.msra.mxu1 %v9098_v13  ;;  %9131 = vmatpush3.bf16.msra.mxu0 %v9130_v17  ;;  %v9142_v13 = vpack.c.bf16 %v7331_v12, %v7330_v1  ;;  %v7300_v17 = vld [vmem:[%s12498_s17 + $0xc70] sm:$0xff]  ;;  %v5904_v12 = vmax.f32 %v5655_v32, 0.0  ;;  %v9188_v57 = vpack.c.bf16 %v7403_v25, %v7402_v44  ;;  %v7386_v20 = vld [vmem:[%s12498_s17 + $0xf20] sm:$0xff]  ;;  %v7393_v44 = vld [vmem:[%s12498_s17 + $0xf58] sm:$0xff] }
0x1934   :  { %9101 = vmatprep.subr.bf16.mxu1 %v9100_v36  ;;  %9133 = vmatprep.subr.bf16.mxu0 %v9132_v38  ;;  %v5237_v36 = vrot.slane %v12006_v50, %v10334_v7  ;;  %v9112_v38 = vpack.c.bf16 %v7317_v56, %v7316_v30  ;;  %v7398_v7 = vld [vmem:[%s12498_s17 + $0xf80] sm:$0xff] }
0x1935   :  { %v9180_v47 = vpack.c.bf16 %v7399_v40, %v7398_v7  ;;  %v7387_v7 = vld [vmem:[%s12498_s17 + $0xf28] sm:$0xff]  ;;  %v7372_v40 = vld [vmem:[%s12498_s17 + $0xeb0] sm:$0xff]  ;;  %v7378_v25 = vld [vmem:[%s12498_s17 + $0xee0] sm:$0xff] }
0x1936   :  { %v5732_v46 = vadd.f32 %v11873_v45, %v5237_v36  ;;  %v5740_v45 = vadd.f32 %v11915_v42, %v12044_v10  ;;  %v5738_v42 = vadd.f32 %v11905_v28, %v5237_v36  ;;  %v7384_v28 = vld [vmem:[%s12498_s17 + $0xf10] sm:$0xff]  ;;  %v7355_v36 = vld [vmem:[%s12498_s17 + $0xe28] sm:$0xff] }
0x1937   :  { %9103 = vmatpush3.bf16.msra.mxu1 %v9102_v41  ;;  %9135 = vmatpush3.bf16.msra.mxu0 %v9134_v58  ;;  %v7351_v41 = vld [vmem:[%s12498_s17 + $0xe08] sm:$0xff]  ;;  %v9114_v58 = vpack.c.bf16 %v7301_v5, %v7300_v17  ;;  %v9186_v5 = vpack.c.bf16 %v7385_v24, %v7384_v28  ;;  %v7361_v28 = vld [vmem:[%s12498_s17 + $0xe58] sm:$0xff] }
0x1938   :  { %9105 = vmatprep.subr.bf16.mxu1 %v9104_v0  ;;  %9137 = vmatprep.subr.bf16.mxu0 %v9136_v23  ;;  %v7382_v0 = vld [vmem:[%s12498_s17 + $0xf00] sm:$0xff]  ;;  %v7383_v23 = vld [vmem:[%s12498_s17 + $0xf08] sm:$0xff]  ;;  %v9150_v11 = vpack.c.bf16 %v7351_v41, %v7350_v63  ;;  %v5906_v30 = vmax.f32 %v5732_v46, 0.0  ;;  %v5923_v10 = vmax.f32 %v5740_v45, 0.0  ;;  %v7373_v63 = vld [vmem:[%s12498_s17 + $0xeb8] sm:$0xff] }
0x1939   :  { %v7404_v41 = vld [vmem:[%s12498_s17 + $0xfb0] sm:$0xff] }
0x193a   :  { %v7388_v46 = vld [vmem:[%s12498_s17 + $0xf30] sm:$0xff] }
0x193b   :  { %9107 = vmatpush3.bf16.msra.mxu1 %v9106_v51  ;;  %9139 = vmatpush3.bf16.msra.mxu0 %v9138_v27  ;;  %v7401_v51 = vld [vmem:[%s12498_s17 + $0xf98] sm:$0xff]  ;;  %v12256_v27 = vrot.slane %v12006_v50, %v10359_v18  ;;  %v7352_v18 = vld [vmem:[%s12498_s17 + $0xe10] sm:$0xff] }
0x193c   :  { %9109 = vmatprep.subr.bf16.mxu1 %v9108_v54  ;;  %9141 = vmatprep.subr.bf16.mxu0 %v9140_v62  ;;  %v9182_v54 = vpack.c.bf16 %v7383_v23, %v7382_v0  ;;  %v9152_v62 = vpack.c.bf16 %v7369_v14, %v7368_v34  ;;  %v9184_v1 = vpack.c.bf16 %v7401_v51, %v7400_v15  ;;  %v7356_v0 = vld [vmem:[%s12498_s17 + $0xe30] sm:$0xff]  ;;  %v7357_v23 = vld [vmem:[%s12498_s17 + $0xe38] sm:$0xff]  ;;  %v7374_v14 = vld [vmem:[%s12498_s17 + $0xec0] sm:$0xff] }
0x193d   :  { %v5811_v56 = vadd.f32 %v11945_v19, %v12256_v27  ;;  %v7371_v19 = vld [vmem:[%s12498_s17 + $0xea8] sm:$0xff]  ;;  %v9154_v17 = vpack.c.bf16 %v7353_v37, %v7352_v18  ;;  %v9160_v34 = vpack.c.bf16 %v7373_v63, %v7372_v40  ;;  %v7406_v51 = vld [vmem:[%s12498_s17 + $0xfc0] sm:$0xff]  ;;  %v9162_v45 = vpack.c.bf16 %v7357_v23, %v7356_v0  ;;  %v7377_v18 = vld [vmem:[%s12498_s17 + $0xed8] sm:$0xff] }
0x193e   :  { %v9156_v59 = vpack.c.bf16 %v7371_v19, %v7370_v22  ;;  %v7375_v15 = vld [vmem:[%s12498_s17 + $0xec8] sm:$0xff]  ;;  %v7408_v37 = vld [vmem:[%s12498_s17 + $0xfd0] sm:$0xff]  ;;  %v7381_v40 = vld [vmem:[%s12498_s17 + $0xef8] sm:$0xff]  ;;  %v5253_v23 = vrot.slane %v12006_v50, %v10554_v48 }
0x193f   :  { %9111 = vmatpush3.bf16.msra.mxu1 %v9110_v9  ;;  %9143 = vmatpush3.bf16.msra.mxu0 %v9142_v13  ;;  %v5920_v9 = vmax.f32 %v5661_v8, 0.0  ;;  %v5922_v13 = vmax.f32 %v5738_v42, 0.0  ;;  %v7391_v8 = vld [vmem:[%s12498_s17 + $0xf48] sm:$0xff]  ;;  %v7376_v42 = vld [vmem:[%s12498_s17 + $0xed0] sm:$0xff] }
0x1940   :  { %9113 = vmatprep.subr.bf16.mxu1 %v9112_v38  ;;  %9145 = vmatprep.subr.bf16.mxu0 %v9144_v6  ;;  %v5909_v38 = vmax.f32 %v5811_v56, 0.0  ;;  %v5911_v6 = vmax.f32 %v5888_v4, 0.0  ;;  %v7360_v4 = vld [vmem:[%s12498_s17 + $0xe50] sm:$0xff]  ;;  %v9168_v24 = vpack.c.bf16 %v7377_v18, %v7376_v42 }
0x1941   :  { %v7392_v19 = vld [vmem:[%s12498_s17 + $0xf50] sm:$0xff] }
0x1942   :  { %v7412_v63 = vld [vmem:[%s12498_s17 + $0xff0] sm:$0xff] }
0x1943   :  { %9115 = vmatpush3.bf16.msra.mxu1 %v9114_v58  ;;  %9147 = vmatpush3.bf16.msra.mxu0 %v9146_v53  ;;  %v7405_v58 = vld [vmem:[%s12498_s17 + $0xfb8] sm:$0xff]  ;;  %v9158_v53 = vpack.c.bf16 %v7355_v36, %v7354_v43  ;;  %v9202_v43 = vpack.c.bf16 %v7393_v44, %v7392_v19  ;;  %v7362_v36 = vld [vmem:[%s12498_s17 + $0xe60] sm:$0xff]  ;;  %v7364_v0 = vld [vmem:[%s12498_s17 + $0xe70] sm:$0xff] }
0x1944   :  { %9149 = vmatprep.subr.bf16.mxu1 %v9148_v3  ;;  %9181 = vmatprep.subr.bf16.mxu0 %v9180_v47  ;;  %v9190_v3 = vpack.c.bf16 %v7387_v7, %v7386_v20  ;;  %v9192_v32 = vpack.c.bf16 %v7405_v58, %v7404_v41  ;;  %v7389_v47 = vld [vmem:[%s12498_s17 + $0xf38] sm:$0xff]  ;;  %v7395_v20 = vld [vmem:[%s12498_s17 + $0xf68] sm:$0xff]  ;;  %v7380_v7 = vld [vmem:[%s12498_s17 + $0xef0] sm:$0xff]  ;;  %v5245_v58 = vrot.slane %v12006_v50, %v10541_v39 }
0x1945   :  { %v7413_v41 = vld [vmem:[%s12498_s17 + $0xff8] sm:$0xff]  ;;  %v7396_v39 = vld [vmem:[%s12498_s17 + $0xf70] sm:$0xff] }
0x1946   :  { %6558 = vmatmul.mubr.f32.vlgmr.msra.gmra.mrb[84].mxu1 %v5904_v12  ;;  %6633 = vmatmul.mubr.f32.vlgmr.msra.gmra.mrb[82].mxu0 %v5906_v30  ;;  %v9196_v12 = vpack.c.bf16 %v7407_v21, %v7406_v51  ;;  %v7390_v30 = vld [vmem:[%s12498_s17 + $0xf40] sm:$0xff]  ;;  %v5809_v50 = vadd.f32 %v11935_v35, %v5245_v58  ;;  %v5817_v51 = vadd.f32 %v11984_v29, %v12256_v27 }
0x1947   :  { %6562 = vmatprep.mubr.f32.mxu1 %v5921_v49  ;;  %6637 = vmatprep.mubr.f32.mxu0 %v5923_v10  ;;  %v7409_v49 = vld [vmem:[%s12498_s17 + $0xfd8] sm:$0xff]  ;;  %v9198_v56 = vpack.c.bf16 %v7391_v8, %v7390_v30  ;;  %v5894_v21 = vadd.f32 %v11986_v61, %v12260_v2  ;;  %v7415_v27 = vld [vmem:[%s12552_s27 + $0x1] ss:$0 sm:$0xff] }
0x1948   :  { %9151 = vmatpush3.bf16.msra.mxu1 %v9150_v11  ;;  %9183 = vmatpush3.bf16.msra.mxu0 %v9182_v54  ;;  %v9194_v11 = vpack.c.bf16 %v7389_v47, %v7388_v46  ;;  %v7358_v54 = vld [vmem:[%s12498_s17 + $0xe40] sm:$0xff]  ;;  %v9200_v22 = vpack.c.bf16 %v7409_v49, %v7408_v37  ;;  %v7365_v46 = vld [vmem:[%s12498_s17 + $0xe78] sm:$0xff] }
0x1949   :  { %9153 = vmatprep.subr.bf16.mxu1 %v9152_v62  ;;  %9185 = vmatprep.subr.bf16.mxu0 %v9184_v1  ;;  %v7359_v62 = vld [vmem:[%s12498_s17 + $0xe48] sm:$0xff]  ;;  %v9164_v1 = vpack.c.bf16 %v7375_v15, %v7374_v14  ;;  %v7397_v47 = vld [vmem:[%s12498_s17 + $0xf78] sm:$0xff]  ;;  %v9178_v14 = vpack.c.bf16 %v7365_v46, %v7364_v0  ;;  %v5886_v15 = vadd.f32 %v11937_v31, %v5253_v23  ;;  %v5927_v35 = vmax.f32 %v5894_v21, 0.0 }
0x194a   :  { %6563 = vmatmul.mubr.f32.gmra.mrb[86].mxu1 %v5920_v9  ;;  %6638 = vmatmul.mubr.f32.gmra.mrb[84].mxu0 %v5922_v13  ;;  %v9166_v10 = vpack.c.bf16 %v7359_v62, %v7358_v54  ;;  %v7379_v9 = vld [vmem:[%s12498_s17 + $0xee8] sm:$0xff]  ;;  %v7410_v13 = vld [vmem:[%s12498_s17 + $0xfe0] sm:$0xff]  ;;  %v9210_v48 = vpack.c.bf16 %v7397_v47, %v7396_v39  ;;  %v5815_v54 = vadd.f32 %v11969_v26, %v5245_v58 }
0x194b   :  { %6707 = vmatprep.mubr.f32.mxu1 %v5909_v38  ;;  %6782 = vmatprep.mubr.f32.mxu0 %v5911_v6  ;;  %v7363_v38 = vld [vmem:[%s12498_s17 + $0xe68] sm:$0xff]  ;;  %v9172_v6 = vpack.c.bf16 %v7379_v9, %v7378_v25  ;;  %v5892_v62 = vadd.f32 %v11971_v33, %v5253_v23 }
0x194c   :  { %9155 = vmatpush3.bf16.msra.mxu1 %v9154_v17  ;;  %9187 = vmatpush3.bf16.msra.mxu0 %v9186_v5  ;;  %v7411_v17 = vld [vmem:[%s12498_s17 + $0xfe8] sm:$0xff]  ;;  %v9170_v5 = vpack.c.bf16 %v7361_v28, %v7360_v4  ;;  %v5924_v31 = vmax.f32 %v5815_v54, 0.0 }
0x194d   :  { %9157 = vmatprep.subr.bf16.mxu1 %v9156_v59  ;;  %9189 = vmatprep.subr.bf16.mxu0 %v9188_v57  ;;  %v9204_v59 = vpack.c.bf16 %v7411_v17, %v7410_v13  ;;  %v7394_v57 = vld [vmem:[%s12498_s17 + $0xf60] sm:$0xff] }
0x1950   :  { %9159 = vmatpush3.bf16.msra.mxu1 %v9158_v53  ;;  %9191 = vmatpush3.bf16.msra.mxu0 %v9190_v3  ;;  %v9174_v53 = vpack.c.bf16 %v7363_v38, %v7362_v36  ;;  %v9206_v3 = vpack.c.bf16 %v7395_v20, %v7394_v57 }
0x1951   :  { %9161 = vmatprep.subr.bf16.mxu1 %v9160_v34  ;;  %9193 = vmatprep.subr.bf16.mxu0 %v9192_v32  ;;  %v9176_v34 = vpack.c.bf16 %v7381_v40, %v7380_v7  ;;  %v9208_v32 = vpack.c.bf16 %v7413_v41, %v7412_v63 }
0x1954   :  { %9163 = vmatpush3.bf16.msra.mxu1 %v9162_v45  ;;  %9195 = vmatpush3.bf16.msra.mxu0 %v9194_v11  ;;  %v5908_v45 = vmax.f32 %v5809_v50, 0.0  ;;  %v5910_v11 = vmax.f32 %v5886_v15, 0.0 }
0x1955   :  { %9165 = vmatprep.subr.bf16.mxu1 %v9164_v1  ;;  %9197 = vmatprep.subr.bf16.mxu0 %v9196_v12  ;;  %v5925_v1 = vmax.f32 %v5817_v51, 0.0  ;;  %v5926_v12 = vmax.f32 %v5892_v62, 0.0 }
0x1958   :  { %9167 = vmatpush3.bf16.msra.mxu1 %v9166_v10  ;;  %9199 = vmatpush3.bf16.msra.mxu0 %v9198_v56 }
0x1959   :  { %9169 = vmatprep.subr.bf16.mxu1 %v9168_v24  ;;  %9201 = vmatprep.subr.bf16.mxu0 %v9200_v22 }
0x195c   :  { %9171 = vmatpush3.bf16.msra.mxu1 %v9170_v5  ;;  %9203 = vmatpush3.bf16.msra.mxu0 %v9202_v43 }
0x195d   :  { %9173 = vmatprep.subr.bf16.mxu1 %v9172_v6  ;;  %9205 = vmatprep.subr.bf16.mxu0 %v9204_v59 }
0x1960   :  { %9175 = vmatpush3.bf16.msra.mxu1 %v9174_v53  ;;  %9207 = vmatpush3.bf16.msra.mxu0 %v9206_v3 }
0x1961   :  { %9177 = vmatprep.subr.bf16.mxu1 %v9176_v34  ;;  %9209 = vmatprep.subr.bf16.mxu0 %v9208_v32 }
0x1964   :  { %9179 = vmatpush3.bf16.msra.mxu1 %v9178_v14  ;;  %9211 = vmatpush3.bf16.msra.mxu0 %v9210_v48 }
0x1967   :  { %6708 = vmatmul.mubr.f32.vlgmr.msra.gmra.mrb[88].mxu1 %v5908_v45  ;;  %6783 = vmatmul.mubr.f32.vlgmr.msra.gmra.mrb[86].mxu0 %v5910_v11 }
0x1968   :  { %6712 = vmatprep.mubr.f32.mxu1 %v5925_v1  ;;  %6787 = vmatprep.mubr.f32.mxu0 %v5927_v35 }
0x196b   :  { %6713 = vmatmul.mubr.f32.gmra.mrb[90].mxu1 %v5924_v31  ;;  %6788 = vmatmul.mubr.f32.gmra.mrb[88].mxu0 %v5926_v12 }
0x19d8   :  { %v7895_v29 = vpop.f32.mrb[76].mxu1  ;;  %v7933_v61 = vpop.f32.mrb[74].mxu0 }
0x19d9   :  { %v7896_v2 = vpop.f32.mrb[77].mxu1  ;;  %v7934_v26 = vpop.f32.mrb[75].mxu0 }
0x19da   :  { %v7897_v30 = vadd.f32 %v7896_v2, %v7895_v29  ;;  %v7935_v33 = vadd.f32 %v7934_v26, %v7933_v61 }
0x19dc   :  { %v6260_v8 = vadd.f32 %v7897_v30, %v7415_v27  ;;  %v7898_v42 = vpop.f32.mrb[78].mxu1  ;;  %v7936_v18 = vpop.f32.mrb[76].mxu0 }
0x19dd   :  { %v7899_v37 = vpop.f32.mrb[79].mxu1  ;;  %v7937_v49 = vpop.f32.mrb[77].mxu0 }
0x19de   :  { %v6335_v10 = vadd.f32 %v7935_v33, %v6260_v8  ;;  %v7900_v56 = vadd.f32 %v7899_v37, %v7898_v42  ;;  %v7938_v4 = vadd.f32 %v7937_v49, %v7936_v18 }
0x19e0   :  { %v6265_v28 = vadd.f32 %v7900_v56, %v7415_v27 }
0x19e2   :  { %v6340_v24 = vadd.f32 %v7938_v4, %v6265_v28 }
0x19f8   :  { %v7971_v22 = vpop.f32.mrb[80].mxu1  ;;  %v8009_v19 = vpop.f32.mrb[78].mxu0 }
0x19f9   :  { %v7972_v44 = vpop.f32.mrb[81].mxu1  ;;  %v8010_v25 = vpop.f32.mrb[79].mxu0 }
0x19fa   :  { %v7973_v9 = vadd.f32 %v7972_v44, %v7971_v22  ;;  %v8011_v13 = vadd.f32 %v8010_v25, %v8009_v19  ;;  %v6836_v19 = vld [vmem:[%s12503_s22 + $0x8] sm:$0xff]  ;;  %v6837_v25 = vld [vmem:[%s12503_s22 + $0x10] sm:$0xff] }
0x19fc   :  { %v6410_v17 = vadd.f32 %v7973_v9, %v6335_v10  ;;  %v7974_v5 = vpop.f32.mrb[82].mxu1  ;;  %v8012_v43 = vpop.f32.mrb[80].mxu0  ;;  %v6838_v9 = vld [vmem:[%s12503_s22 + $0x18] sm:$0xff] }
0x19fd   :  { %v7975_v36 = vpop.f32.mrb[83].mxu1  ;;  %v8013_v38 = vpop.f32.mrb[81].mxu0 }
0x19fe   :  { %v6485_v6 = vadd.f32 %v8011_v13, %v6410_v17  ;;  %v7976_v59 = vadd.f32 %v7975_v36, %v7974_v5  ;;  %v8014_v57 = vadd.f32 %v8013_v38, %v8012_v43  ;;  %v9216_v13 = vpack.c.bf16 %v6838_v9, %v6837_v25 }
0x1a00   :  { %v6415_v20 = vadd.f32 %v7976_v59, %v6340_v24  ;;  %v7416_v59 = vld [vmem:[%s12502_s21 + $0x2] sm:$0x3]  ;;  %s9465_s21 = smov [#allocation2]  }
0x1a01   :  { %s6934_s11 = sshll.u32 %s9465_s21, 4  ;;  %s6935_s11 = int_to_ptr.vmem [resolvable:$true] %s6934_s11 }
0x1a02   :  { %v6490_v7 = vadd.f32 %v8014_v57, %v6415_v20  ;;  %v6826_v57 = vrot.slane %v7416_v59, %v9858_v55  ;;  %s9426_s0 = scalar_lea.vmem %s6935_s11, 256  ;;  %p9431_p1 = scmp.lt.s32.totalorder %s6935_s11, %s6935_s11 }
0x1a03   :  { %p9427_p0 = scmp.ne.s32.totalorder %s6935_s11, %s9426_s0  ;;  %p9432_p2 = scmp.lt.s32.totalorder %s9426_s0, %s9426_s0 }
0x1a05   :  { %p9433_p3 = por %p9432_p2, %p9431_p1 }
0x1a07   :  { %p9434_p4 = pnand %p9433_p3, %p9427_p0 }
0x1a19   :  { %v8047_v40 = vpop.f32.mrb[84].mxu1  ;;  %v8085_v63 = vpop.f32.mrb[82].mxu0 }
0x1a1a   :  { %v8048_v41 = vpop.f32.mrb[85].mxu1  ;;  %v8086_v58 = vpop.f32.mrb[83].mxu0 }
0x1a1b   :  { %v8049_v53 = vadd.f32 %v8048_v41, %v8047_v40  ;;  %v8087_v3 = vadd.f32 %v8086_v58, %v8085_v63  ;;  %v6832_v40 = vrot.slane %v7416_v59, %v9864_v60 }
0x1a1d   :  { %v6560_v0 = vadd.f32 %v8049_v53, %v6485_v6  ;;  %v8050_v23 = vpop.f32.mrb[86].mxu1  ;;  %v8088_v34 = vpop.f32.mrb[84].mxu0 }
0x1a1e   :  { %v8051_v32 = vpop.f32.mrb[87].mxu1  ;;  %v8089_v46 = vpop.f32.mrb[85].mxu0 }
0x1a1f   :  { %v6635_v39 = vadd.f32 %v8087_v3, %v6560_v0  ;;  %v8052_v47 = vadd.f32 %v8051_v32, %v8050_v23  ;;  %v8090_v14 = vadd.f32 %v8089_v46, %v8088_v34  ;;  %v7417_v23 = vld [vmem:[%s12504_s23] ss:$0 sm:$0xff] }
0x1a21   :  { %v6565_v48 = vadd.f32 %v8052_v47, %v6490_v7 }
0x1a23   :  { %v6640_v50 = vadd.f32 %v8090_v14, %v6565_v48 }
0x1a3a   :  { %v8123_v15 = vpop.f32.mrb[88].mxu1  ;;  %v8161_v51 = vpop.f32.mrb[86].mxu0 }
0x1a3b   :  { %v8124_v21 = vpop.f32.mrb[89].mxu1  ;;  %v8162_v45 = vpop.f32.mrb[87].mxu0 }
0x1a3c   :  { %v8125_v11 = vadd.f32 %v8124_v21, %v8123_v15  ;;  %v8163_v54 = vadd.f32 %v8162_v45, %v8161_v51 }
0x1a3e   :  { %v6710_v62 = vadd.f32 %v8125_v11, %v6635_v39  ;;  %v8126_v1 = vpop.f32.mrb[90].mxu1  ;;  %v8164_v35 = vpop.f32.mrb[88].mxu0 }
0x1a3f   :  { %v8127_v31 = vpop.f32.mrb[91].mxu1  ;;  %v8165_v12 = vpop.f32.mrb[89].mxu0 }
0x1a40   :  { %v6785_v29 = vadd.f32 %v8163_v54, %v6710_v62  ;;  %v8128_v61 = vadd.f32 %v8127_v31, %v8126_v1  ;;  %v8166_v27 = vadd.f32 %v8165_v12, %v8164_v35 }
0x1a42   :  { %v6715_v2 = vadd.f32 %v8128_v61, %v6640_v50  ;;  %v6793_v26 = vadd.f32 %v6785_v29, %v11380_v16 }
0x1a44   :  { %v6790_v30 = vadd.f32 %v8166_v27, %v6715_v2  ;;  %v6797_v33 = vsel %vm285_vm4, %v6793_v26, 0.0 }
0x1a45   :  { %6798 = vadd.xlane.f32.xlu0 %v6797_v33 }
0x1a46   :  { %v6794_v8 = vadd.f32 %v6790_v30, %v11411_v52  ;;  %v6835_v52 = vld [vmem:[%s12503_s22] sm:$0xff] }
0x1a47   :  { %v9212_v44 = vpack.c.bf16 %v6836_v19, %v6835_v52 }
0x1a48   :  { %v6800_v42 = vsel %vm285_vm4, %v6794_v8, 0.0 }
0x1a49   :  { %6801 = vadd.xlane.f32.xlu1 %v6800_v42  ;;  %9213 = vmatprep.subr.bf16.mxu1 %v9212_v44 }
0x1a4a   :  { %9215 = vmatpush3.bf16.msra.mxu1 %v9212_v44 }
0x1a4b   :  { %9217 = vmatprep.subr.bf16.mxu1 %v9216_v13 }
0x1a4e   :  { %9219 = vmatpush3.bf16.msra.mxu1 %v9216_v13 }
0x1ad2   :  { %v6799_v18 = vpop.xlane.xlu0 %6798 }
0x1ad3   :  { %v6803_v37 = vmul.f32 0.03125, %v6799_v18 }
0x1ad5   :  { %v6805_v49 = vsub.f32 %v6793_v26, %v6803_v37 }
0x1ad6   :  { %v6802_v10 = vpop.xlane.xlu1 %6801 }
0x1ad7   :  { %v6804_v56 = vmul.f32 0.03125, %v6802_v10  ;;  %v6807_v4 = vmul.f32 %v6805_v49, %v6805_v49 }
0x1ad9   :  { %v6806_v28 = vsub.f32 %v6794_v8, %v6804_v56  ;;  %v6809_v24 = vsel %vm285_vm4, %v6807_v4, 0.0 }
0x1ada   :  { %6810 = vadd.xlane.f32.xlu0 %v6809_v24 }
0x1adb   :  { %v6808_v16 = vmul.f32 %v6806_v28, %v6806_v28 }
0x1add   :  { %v6812_v22 = vsel %vm285_vm4, %v6808_v16, 0.0 }
0x1ade   :  { %6813 = vadd.xlane.f32.xlu1 %v6812_v22 }
0x1b67   :  { %v6811_v17 = vpop.xlane.xlu0 %6810 }
0x1b68   :  { %v6815_v5 = vmul.f32 0.03125, %v6811_v17 }
0x1b6a   :  { %v6817_v43 = vadd.f32 1e-05, %v6815_v5 }
0x1b6b   :  { %v6814_v36 = vpop.xlane.xlu1 %6813 }
0x1b6c   :  { %9417 = vrsqrt.f32 %v6817_v43  ;;  %v6816_v38 = vmul.f32 0.03125, %v6814_v36 }
0x1b6e   :  { %v6818_v6 = vadd.f32 1e-05, %v6816_v38 }
0x1b70   :  { %9419 = vrsqrt.f32 %v6818_v6 }
0x1b76   :  { %v9418_v20 = vpop.eup %9417 }
0x1b77   :  { %v6821_v7 = vmul.f32 %v9418_v20, %v6805_v49 }
0x1b79   :  { %v6827_v63 = vmul.f32 %v6826_v57, %v6821_v7 }
0x1b7a   :  { %v9420_v41 = vpop.eup %9419 }
0x1b7b   :  { %v6822_v58 = vmul.f32 %v9420_v41, %v6806_v28  ;;  %v6833_v53 = vadd.f32 %v6832_v40, %v6827_v63 }
0x1b7d   :  { %v6828_v3 = vmul.f32 %v6826_v57, %v6822_v58  ;;  %8433 = vmatprep.mubr.msk.f32.mxu1 %vm285_vm4, %v6833_v53 }
0x1b7f   :  { %v6834_v0 = vadd.f32 %v6832_v40, %v6828_v3 }
0x1b81   :  { %8434 = vmatmul.mubr.msk.f32.vlgmr.msra.gmra.mrb[92].mxu1 %vm285_vm4, %v6834_v0 }
0x1c54   :  { %v8435_v55 = vpop.f32.mrb[92].mxu1 }
0x1c55   :  { %v6924_v34 = vadd.f32 %v8435_v55, %v7417_v23  ;;  %v6918_v32 = vpop.f32.mrb[93].mxu1 }
0x1c56   :  { %v6919_v60 = vadd.f32 %v7417_v23, %v6918_v32 }
0x1c57   :  { %6928 = vst.msk [vmem:[#allocation2 + $0x8] sm:$0xff] %vm187_vm1, %v6924_v34 }
0x1c58   :  { %6927 = vst.msk [vmem:[#allocation2] sm:$0xff] %vm187_vm1, %v6919_v60 }
0x1c59   :  { %9437 = shalt.err (!%p9434_p4)
}
0x1c5a   :  { %s12564_s29 = sld [smem:[#allocation15_spill]] }
0x1c60   :  { %s9438_s9 = scalar_lea.hbm %s12564_s29, 256 }
0x1c61   :  { %p9439_p5 = scmp.ne.s32.totalorder %s12564_s29, %s9438_s9  ;;  %p9442_p6 = scmp.lt.u32.totalorder %s9438_s9, %s12564_s29 }
0x1c63   :  { %p9444_p7 = pnand %p9442_p6, %p9439_p5 }
0x1c65   :  { %9447 = shalt.err (!%p9444_p7)
}
0x1c66   :  { %s9466_s2 = smov 128   ;;  %s9467_s1 = smov 8  }
0x1c67   :  { %6940 = dma.vmem_to_hbm [thread:$0]  %s6935_s11, 256, %s12564_s29, [#allocation3], %s9466_s2, %s9466_s2, %s9467_s1  }
0x1c68   :  { %9448 = dma.done.wait [#allocation3], 256  }
0x1c69   :  { %9449 = vsyncadd [#allocation3], 4294967040 }
0x1c6a   :  { %6944 = vsyncpa [#allocation3], 1 }

</bundles_post_ra>
